<compile_context>
chip_gen: v7x
topology: tpu7x:2x2x1
jax: 0.10.0
libtpu: 0.0.40
codegen_flags: <defaults>
</compile_context>

<pallas_src>
import jax
import jax.numpy as jnp
from jax import lax
from jax.experimental import pallas as pl
from jax.experimental.pallas import tpu as pltpu

_HI = lax.Precision.HIGHEST


def _coord_attn_kernel(x_ref, pool_ref, eh_ref, ew_ref, w1_ref, b1_ref,
                       wh_ref, bh_ref, ww_ref, bw_ref, out_ref):
    # x_ref/out_ref: (Bt, C, H*W)   NCHW layout, lane dim = H*W (lane-dense)
    # pool_ref:      (H*W, H+W)     directional-mean matrix (1/W, 1/H folded in)
    # eh_ref:        (H, H*W)       a_h lane-expansion indicator
    # ew_ref:        (W, H*W)       a_w lane-expansion indicator
    # w1_ref:(MID,C) b1_ref:(MID,1) conv1 with eval BN folded in
    # wh_ref:(C,MID) bh_ref:(C,1)   conv_h
    # ww_ref:(C,MID) bw_ref:(C,1)   conv_w
    bt = x_ref.shape[0]
    h = eh_ref.shape[0]

    # Tiny resident weights: load once per grid step.
    pool = pool_ref[...]
    eh = eh_ref[...]
    ew = ew_ref[...]
    w1 = w1_ref[...]
    b1 = b1_ref[...]
    wh = wh_ref[...]
    bh = bh_ref[...]
    ww = ww_ref[...]
    bw = bw_ref[...]

    # Static unroll over the (small) per-step batch block; every op is a plain
    # 2-D matmul or an elementwise op on the lane-dense (C, H*W) tile.
    for bi in range(bt):
        x = x_ref[bi].astype(jnp.float32)                       # (C, H*W)

        # Directional average pools (means folded into `pool`): (C, H+W).
        pooled = jnp.dot(x, pool, precision=_HI,
                         preferred_element_type=jnp.float32)

        # conv1 + folded BatchNorm + ReLU on the concatenated pooled map.
        y = jnp.maximum(
            jnp.dot(w1, pooled, precision=_HI,
                    preferred_element_type=jnp.float32) + b1, 0.0)  # (MID, H+W)

        # conv_h / conv_w + sigmoid -> directional attention maps.
        a_h = jax.nn.sigmoid(
            jnp.dot(wh, y[:, :h], precision=_HI,
                    preferred_element_type=jnp.float32) + bh)       # (C, H)
        a_w = jax.nn.sigmoid(
            jnp.dot(ww, y[:, h:], precision=_HI,
                    preferred_element_type=jnp.float32) + bw)       # (C, W)

        # Expand a_h over W and a_w over H directly in the (C, H*W) layout
        # via indicator-matrix matmuls (no 4-D reshape / relayout), then gate.
        gate = (jnp.dot(a_h, eh, precision=_HI,
                        preferred_element_type=jnp.float32)
                * jnp.dot(a_w, ew, precision=_HI,
                          preferred_element_type=jnp.float32))      # (C, H*W)
        out_ref[bi] = (x * gate).astype(out_ref.dtype)


def _pick_batch_block(b, c, hw, itemsize,
                      vmem_budget_bytes=16 * 1024 * 1024, max_bt=8):
    """Largest per-step batch block that fits the VMEM budget while keeping
    several grid steps (pipelining / megacore work)."""
    per_elem = 4 * c * hw * itemsize          # double-buffered input + output
    cap = max(1, min(max_bt, vmem_budget_bytes // max(per_elem, 1)))
    divisors = [d for d in range(1, b + 1) if b % d == 0 and d <= cap]
    for min_steps in (4, 2, 1):
        cands = [d for d in divisors if b // d >= min_steps]
        if cands:
            return max(cands)
    return 1


def coordinate_attention(x_nchw, params, eps=1e-5, batch_block=None):
    """CoordinateAttention forward pass (inference-mode BatchNorm).

    x_nchw: (B, C, H, W) float32, PyTorch NCHW layout
    params: PyTorch-layout parameters:
      w1 (MID, C), b1 (MID,), bn_gamma/bn_beta/bn_mean/bn_var (MID,),
      wh (C, MID), bh (C,), ww (C, MID), bw (C,)
    returns: (B, C, H, W)
    """
    b, c, h, w = x_nchw.shape
    mid = params["w1"].shape[0]
    hw = h * w
    f32 = jnp.float32

    # Fold eval-mode BatchNorm into conv1.
    scale = params["bn_gamma"] * lax.rsqrt(params["bn_var"] + eps)       # (MID,)
    w1_f = (params["w1"] * scale[:, None]).astype(f32)                   # (MID, C)
    b1_f = (params["b1"] - params["bn_mean"]) * scale + params["bn_beta"]
    b1_col = b1_f.reshape(mid, 1).astype(f32)
    wh = params["wh"].astype(f32)                                        # (C, MID)
    bh_col = params["bh"].reshape(c, 1).astype(f32)
    ww = params["ww"].astype(f32)                                        # (C, MID)
    bw_col = params["bw"].reshape(c, 1).astype(f32)

    # Constant pooling / expansion matrices (pool means folded into `pool`).
    h_of = jnp.arange(hw) // w
    w_of = jnp.arange(hw) % w
    pool_h = (h_of[:, None] == jnp.arange(h)[None, :]).astype(f32) / float(w)
    pool_w = (w_of[:, None] == jnp.arange(w)[None, :]).astype(f32) / float(h)
    pool = jnp.concatenate([pool_h, pool_w], axis=1)                     # (HW, H+W)
    eh = (jnp.arange(h)[:, None] == h_of[None, :]).astype(f32)           # (H, HW)
    ew = (jnp.arange(w)[:, None] == w_of[None, :]).astype(f32)           # (W, HW)

    # Lane-dense, zero-copy view of the NCHW input: (B, C, H*W).
    x3 = x_nchw.reshape(b, c, hw)

    itemsize = jnp.dtype(x_nchw.dtype).itemsize
    bt = _pick_batch_block(b, c, hw, itemsize) if batch_block is None else batch_block
    assert b % bt == 0, "batch must be divisible by the per-step batch block"
    grid = (b // bt,)

    block_bytes = bt * c * hw * itemsize
    weight_bytes = 4 * (pool.size + eh.size + ew.size + w1_f.size
                        + wh.size + ww.size + 4 * c + 2 * mid)
    needed = 4 * block_bytes + 2 * weight_bytes + (2 << 20)
    vmem_limit = int(min(64 * 1024 * 1024, max(32 * 1024 * 1024, needed)))

    out3 = pl.pallas_call(
        _coord_attn_kernel,
        out_shape=jax.ShapeDtypeStruct((b, c, hw), x_nchw.dtype),
        grid_spec=pltpu.PrefetchScalarGridSpec(
            num_scalar_prefetch=0,
            grid=grid,
            in_specs=[
                pl.BlockSpec((bt, c, hw), lambda i: (i, 0, 0)),
                pl.BlockSpec((hw, h + w), lambda i: (0, 0)),
                pl.BlockSpec((h, hw), lambda i: (0, 0)),
                pl.BlockSpec((w, hw), lambda i: (0, 0)),
                pl.BlockSpec((mid, c), lambda i: (0, 0)),
                pl.BlockSpec((mid, 1), lambda i: (0, 0)),
                pl.BlockSpec((c, mid), lambda i: (0, 0)),
                pl.BlockSpec((c, 1), lambda i: (0, 0)),
                pl.BlockSpec((c, mid), lambda i: (0, 0)),
                pl.BlockSpec((c, 1), lambda i: (0, 0)),
            ],
            out_specs=pl.BlockSpec((bt, c, hw), lambda i: (i, 0, 0)),
        ),
        compiler_params=pltpu.CompilerParams(
            dimension_semantics=("parallel",),
            vmem_limit_bytes=vmem_limit),
    )(x3, pool, eh, ew, w1_f, b1_col, wh, bh_col, ww, bw_col)

    return out3.reshape(b, c, h, w)


def _reference(x, params, eps=1e-5):
    """Pure-JAX mirror of the PyTorch CoordinateAttention.forward (eval BN)."""
    b, c, h, w = x.shape
    x_h = jnp.mean(x, axis=3, keepdims=True)                     # (b,c,h,1)
    x_w = jnp.mean(x, axis=2, keepdims=True)                     # (b,c,1,w)
    x_w = jnp.transpose(x_w, (0, 1, 3, 2))                       # (b,c,w,1)
    y = jnp.concatenate([x_h, x_w], axis=2)                      # (b,c,h+w,1)
    y = jnp.einsum("bcpq,mc->bmpq", y, params["w1"], precision=_HI) \
        + params["b1"][None, :, None, None]
    y = (y - params["bn_mean"][None, :, None, None]) / jnp.sqrt(
        params["bn_var"][None, :, None, None] + eps)
    y = y * params["bn_gamma"][None, :, None, None] \
        + params["bn_beta"][None, :, None, None]
    y = jnp.maximum(y, 0.0)
    y_h, y_w = y[:, :, :h, :], y[:, :, h:, :]
    y_w = jnp.transpose(y_w, (0, 1, 3, 2))                       # (b,mid,1,w)
    a_h = jax.nn.sigmoid(
        jnp.einsum("bmpq,cm->bcpq", y_h, params["wh"], precision=_HI)
        + params["bh"][None, :, None, None])                     # (b,c,h,1)
    a_w = jax.nn.sigmoid(
        jnp.einsum("bmpq,cm->bcpq", y_w, params["ww"], precision=_HI)
        + params["bw"][None, :, None, None])                     # (b,c,1,w)
    return x * a_h * a_w


if __name__ == "__main__":
    key = jax.random.PRNGKey(0)
    ks = jax.random.split(key, 12)

    B, C, H, W = 2, 64, 16, 16
    REDUCTION = 32
    MID = max(8, C // REDUCTION)   # = 8, matching the PyTorch module

    x = jax.random.normal(ks[0], (B, C, H, W), dtype=jnp.float32)

    def _uniform(k, shape, fan_in):
        bound = 1.0 / (fan_in ** 0.5)
        return jax.random.uniform(k, shape, minval=-bound, maxval=bound,
                                  dtype=jnp.float32)

    params = {
        "w1": _uniform(ks[1], (MID, C), C),          # conv1.weight (MID, C, 1, 1)
        "b1": _uniform(ks[2], (MID,), C),
        "bn_gamma": jax.random.uniform(ks[3], (MID,), minval=0.5, maxval=1.5,
                                       dtype=jnp.float32),
        "bn_beta": 0.1 * jax.random.normal(ks[4], (MID,), dtype=jnp.float32),
        "bn_mean": 0.1 * jax.random.normal(ks[5], (MID,), dtype=jnp.float32),
        "bn_var": jax.random.uniform(ks[6], (MID,), minval=0.5, maxval=1.5,
                                     dtype=jnp.float32),
        "wh": _uniform(ks[7], (C, MID), MID),        # conv_h.weight (C, MID, 1, 1)
        "bh": _uniform(ks[8], (C,), MID),
        "ww": _uniform(ks[9], (C, MID), MID),        # conv_w.weight (C, MID, 1, 1)
        "bw": _uniform(ks[10], (C,), MID),
    }

    out = coordinate_attention(x, params)
    out = jax.block_until_ready(out)

    ref = _reference(x, params)
    assert out.shape == (B, C, H, W)
    # With precision=HIGHEST on the tiny matmuls the real error is ~1e-5; the
    # tolerance just leaves slack for transcendental / accumulation-order
    # differences between the Pallas kernel and the XLA reference.
    assert jnp.allclose(out, ref, atol=2e-3, rtol=2e-3), "mismatch vs reference"

    print("KERNEL_OK")
</pallas_src>

<mosaic_0001>
module attributes {stable_mosaic.version = 11 : i64} {
  func.func @_coord_attn_kernel(%arg0: i32, %arg1: memref<1x64x256xf32, #tpu.memory_space<vmem>>, %arg2: memref<256x32xf32, #tpu.memory_space<vmem>>, %arg3: memref<16x256xf32, #tpu.memory_space<vmem>>, %arg4: memref<16x256xf32, #tpu.memory_space<vmem>>, %arg5: memref<8x64xf32, #tpu.memory_space<vmem>>, %arg6: memref<8x1xf32, #tpu.memory_space<vmem>>, %arg7: memref<64x8xf32, #tpu.memory_space<vmem>>, %arg8: memref<64x1xf32, #tpu.memory_space<vmem>>, %arg9: memref<64x8xf32, #tpu.memory_space<vmem>>, %arg10: memref<64x1xf32, #tpu.memory_space<vmem>>, %arg11: memref<1x64x256xf32, #tpu.memory_space<vmem>>) attributes {dimension_semantics = [#tpu.dimension_semantics<parallel>], iteration_bounds = array<i64: 2>, scalar_prefetch = 0 : i64, scratch_operands = 0 : i64, tpu.core_type = #tpu.core_type<tc>, window_params = [{transform_indices = @transform_0, window_bounds = array<i64: 1, 64, 256>}, {pipeline_mode = #tpu.pipeline_mode<synchronous>, transform_indices = @transform_1, window_bounds = array<i64: 256, 32>}, {pipeline_mode = #tpu.pipeline_mode<synchronous>, transform_indices = @transform_2, window_bounds = array<i64: 16, 256>}, {pipeline_mode = #tpu.pipeline_mode<synchronous>, transform_indices = @transform_3, window_bounds = array<i64: 16, 256>}, {pipeline_mode = #tpu.pipeline_mode<synchronous>, transform_indices = @transform_4, window_bounds = array<i64: 8, 64>}, {pipeline_mode = #tpu.pipeline_mode<synchronous>, transform_indices = @transform_5, window_bounds = array<i64: 8, 1>}, {pipeline_mode = #tpu.pipeline_mode<synchronous>, transform_indices = @transform_6, window_bounds = array<i64: 64, 8>}, {pipeline_mode = #tpu.pipeline_mode<synchronous>, transform_indices = @transform_7, window_bounds = array<i64: 64, 1>}, {pipeline_mode = #tpu.pipeline_mode<synchronous>, transform_indices = @transform_8, window_bounds = array<i64: 64, 8>}, {pipeline_mode = #tpu.pipeline_mode<synchronous>, transform_indices = @transform_9, window_bounds = array<i64: 64, 1>}, {transform_indices = @transform_10, window_bounds = array<i64: 1, 64, 256>}]} {
    %c0 = arith.constant 0 : index
    %c0_0 = arith.constant 0 : index
    %0 = vector.load %arg2[%c0, %c0_0] : memref<256x32xf32, #tpu.memory_space<vmem>>, vector<256x32xf32>
    %c0_1 = arith.constant 0 : index
    %c0_2 = arith.constant 0 : index
    %1 = vector.load %arg3[%c0_1, %c0_2] : memref<16x256xf32, #tpu.memory_space<vmem>>, vector<16x256xf32>
    %c0_3 = arith.constant 0 : index
    %c0_4 = arith.constant 0 : index
    %2 = vector.load %arg4[%c0_3, %c0_4] : memref<16x256xf32, #tpu.memory_space<vmem>>, vector<16x256xf32>
    %c0_5 = arith.constant 0 : index
    %c0_6 = arith.constant 0 : index
    %3 = vector.load %arg5[%c0_5, %c0_6] : memref<8x64xf32, #tpu.memory_space<vmem>>, vector<8x64xf32>
    %c0_7 = arith.constant 0 : index
    %c0_8 = arith.constant 0 : index
    %4 = vector.load %arg6[%c0_7, %c0_8] : memref<8x1xf32, #tpu.memory_space<vmem>>, vector<8x1xf32>
    %c0_9 = arith.constant 0 : index
    %c0_10 = arith.constant 0 : index
    %5 = vector.load %arg7[%c0_9, %c0_10] : memref<64x8xf32, #tpu.memory_space<vmem>>, vector<64x8xf32>
    %c0_11 = arith.constant 0 : index
    %c0_12 = arith.constant 0 : index
    %6 = vector.load %arg8[%c0_11, %c0_12] : memref<64x1xf32, #tpu.memory_space<vmem>>, vector<64x1xf32>
    %c0_13 = arith.constant 0 : index
    %c0_14 = arith.constant 0 : index
    %7 = vector.load %arg9[%c0_13, %c0_14] : memref<64x8xf32, #tpu.memory_space<vmem>>, vector<64x8xf32>
    %c0_15 = arith.constant 0 : index
    %c0_16 = arith.constant 0 : index
    %8 = vector.load %arg10[%c0_15, %c0_16] : memref<64x1xf32, #tpu.memory_space<vmem>>, vector<64x1xf32>
    %c0_17 = arith.constant 0 : index
    %c0_18 = arith.constant 0 : index
    %c0_19 = arith.constant 0 : index
    %9 = vector.load %arg1[%c0_17, %c0_18, %c0_19] : memref<1x64x256xf32, #tpu.memory_space<vmem>>, vector<1x64x256xf32>
    %10 = vector.shape_cast %9 : vector<1x64x256xf32> to vector<64x256xf32>
    %cst = arith.constant dense<0.000000e+00> : vector<64x32xf32>
    %11 = tpu.matmul %10, %0, %cst {dimension_numbers = #tpu.dot_dimension_numbers<[1], [0], [0], [1], [0, 0, 1, 1], [], []>, precision = #tpu.contract_precision<fp32>} : vector<64x256xf32>, vector<256x32xf32>, vector<64x32xf32> -> vector<64x32xf32>
    %cst_20 = arith.constant dense<0.000000e+00> : vector<8x32xf32>
    %12 = tpu.matmul %3, %11, %cst_20 {dimension_numbers = #tpu.dot_dimension_numbers<[1], [0], [0], [1], [0, 0, 1, 1], [], []>, precision = #tpu.contract_precision<fp32>} : vector<8x64xf32>, vector<64x32xf32>, vector<8x32xf32> -> vector<8x32xf32>
    %13 = vector.broadcast %4 : vector<8x1xf32> to vector<8x32xf32>
    %14 = arith.addf %12, %13 : vector<8x32xf32>
    %cst_21 = arith.constant 0.000000e+00 : f32
    %15 = vector.broadcast %cst_21 : f32 to vector<8x32xf32>
    %16 = arith.maximumf %14, %15 : vector<8x32xf32>
    %17 = vector.extract_strided_slice %16 {offsets = [0, 0], sizes = [8, 16], strides = [1, 1]} : vector<8x32xf32> to vector<8x16xf32>
    %cst_22 = arith.constant dense<0.000000e+00> : vector<64x16xf32>
    %18 = tpu.matmul %5, %17, %cst_22 {dimension_numbers = #tpu.dot_dimension_numbers<[1], [0], [0], [1], [0, 0, 1, 1], [], []>, precision = #tpu.contract_precision<fp32>} : vector<64x8xf32>, vector<8x16xf32>, vector<64x16xf32> -> vector<64x16xf32>
    %19 = vector.broadcast %6 : vector<64x1xf32> to vector<64x16xf32>
    %20 = arith.addf %18, %19 : vector<64x16xf32>
    %21 = arith.negf %20 : vector<64x16xf32>
    %22 = math.exp %21 : vector<64x16xf32>
    %cst_23 = arith.constant 1.000000e+00 : f32
    %23 = vector.broadcast %cst_23 : f32 to vector<64x16xf32>
    %24 = arith.addf %23, %22 : vector<64x16xf32>
    %25 = arith.divf %23, %24 : vector<64x16xf32>
    %26 = vector.extract_strided_slice %16 {offsets = [0, 16], sizes = [8, 16], strides = [1, 1]} : vector<8x32xf32> to vector<8x16xf32>
    %cst_24 = arith.constant dense<0.000000e+00> : vector<64x16xf32>
    %27 = tpu.matmul %7, %26, %cst_24 {dimension_numbers = #tpu.dot_dimension_numbers<[1], [0], [0], [1], [0, 0, 1, 1], [], []>, precision = #tpu.contract_precision<fp32>} : vector<64x8xf32>, vector<8x16xf32>, vector<64x16xf32> -> vector<64x16xf32>
    %28 = vector.broadcast %8 : vector<64x1xf32> to vector<64x16xf32>
    %29 = arith.addf %27, %28 : vector<64x16xf32>
    %30 = arith.negf %29 : vector<64x16xf32>
    %31 = math.exp %30 : vector<64x16xf32>
    %cst_25 = arith.constant 1.000000e+00 : f32
    %32 = vector.broadcast %cst_25 : f32 to vector<64x16xf32>
    %33 = arith.addf %32, %31 : vector<64x16xf32>
    %34 = arith.divf %32, %33 : vector<64x16xf32>
    %cst_26 = arith.constant dense<0.000000e+00> : vector<64x256xf32>
    %35 = tpu.matmul %25, %1, %cst_26 {dimension_numbers = #tpu.dot_dimension_numbers<[1], [0], [0], [1], [0, 0, 1, 1], [], []>, precision = #tpu.contract_precision<fp32>} : vector<64x16xf32>, vector<16x256xf32>, vector<64x256xf32> -> vector<64x256xf32>
    %cst_27 = arith.constant dense<0.000000e+00> : vector<64x256xf32>
    %36 = tpu.matmul %34, %2, %cst_27 {dimension_numbers = #tpu.dot_dimension_numbers<[1], [0], [0], [1], [0, 0, 1, 1], [], []>, precision = #tpu.contract_precision<fp32>} : vector<64x16xf32>, vector<16x256xf32>, vector<64x256xf32> -> vector<64x256xf32>
    %37 = arith.mulf %35, %36 : vector<64x256xf32>
    %38 = arith.mulf %10, %37 : vector<64x256xf32>
    %c0_28 = arith.constant 0 : index
    %c0_29 = arith.constant 0 : index
    %c0_30 = arith.constant 0 : index
    %39 = vector.load %arg11[%c0_28, %c0_29, %c0_30] : memref<1x64x256xf32, #tpu.memory_space<vmem>>, vector<1x64x256xf32>
    %40 = vector.shape_cast %39 : vector<1x64x256xf32> to vector<64x256xf32>
    %41 = vector.shape_cast %38 : vector<64x256xf32> to vector<1x64x256xf32>
    tpu.vector_store %arg11[%c0_28, %c0_29, %c0_30], %41 {strides = array<i32>} : memref<1x64x256xf32, #tpu.memory_space<vmem>>, vector<1x64x256xf32>,
    return
  }
  func.func @transform_0(%arg0: i32) -> (i32, i32, i32) {
    %c0_i32 = arith.constant 0 : i32
    %c0_i32_0 = arith.constant 0 : i32
    %c0_i32_1 = arith.constant 0 : i32
    return %arg0, %c0_i32, %c0_i32_0 : i32, i32, i32
  }
  func.func @transform_1(%arg0: i32) -> (i32, i32) {
    %c0_i32 = arith.constant 0 : i32
    %c0_i32_0 = arith.constant 0 : i32
    %c0_i32_1 = arith.constant 0 : i32
    return %c0_i32, %c0_i32_0 : i32, i32
  }
  func.func @transform_2(%arg0: i32) -> (i32, i32) {
    %c0_i32 = arith.constant 0 : i32
    %c0_i32_0 = arith.constant 0 : i32
    %c0_i32_1 = arith.constant 0 : i32
    return %c0_i32, %c0_i32_0 : i32, i32
  }
  func.func @transform_3(%arg0: i32) -> (i32, i32) {
    %c0_i32 = arith.constant 0 : i32
    %c0_i32_0 = arith.constant 0 : i32
    %c0_i32_1 = arith.constant 0 : i32
    return %c0_i32, %c0_i32_0 : i32, i32
  }
  func.func @transform_4(%arg0: i32) -> (i32, i32) {
    %c0_i32 = arith.constant 0 : i32
    %c0_i32_0 = arith.constant 0 : i32
    %c0_i32_1 = arith.constant 0 : i32
    return %c0_i32, %c0_i32_0 : i32, i32
  }
  func.func @transform_5(%arg0: i32) -> (i32, i32) {
    %c0_i32 = arith.constant 0 : i32
    %c0_i32_0 = arith.constant 0 : i32
    %c0_i32_1 = arith.constant 0 : i32
    return %c0_i32, %c0_i32_0 : i32, i32
  }
  func.func @transform_6(%arg0: i32) -> (i32, i32) {
    %c0_i32 = arith.constant 0 : i32
    %c0_i32_0 = arith.constant 0 : i32
    %c0_i32_1 = arith.constant 0 : i32
    return %c0_i32, %c0_i32_0 : i32, i32
  }
  func.func @transform_7(%arg0: i32) -> (i32, i32) {
    %c0_i32 = arith.constant 0 : i32
    %c0_i32_0 = arith.constant 0 : i32
    %c0_i32_1 = arith.constant 0 : i32
    return %c0_i32, %c0_i32_0 : i32, i32
  }
  func.func @transform_8(%arg0: i32) -> (i32, i32) {
    %c0_i32 = arith.constant 0 : i32
    %c0_i32_0 = arith.constant 0 : i32
    %c0_i32_1 = arith.constant 0 : i32
    return %c0_i32, %c0_i32_0 : i32, i32
  }
  func.func @transform_9(%arg0: i32) -> (i32, i32) {
    %c0_i32 = arith.constant 0 : i32
    %c0_i32_0 = arith.constant 0 : i32
    %c0_i32_1 = arith.constant 0 : i32
    return %c0_i32, %c0_i32_0 : i32, i32
  }
  func.func @transform_10(%arg0: i32) -> (i32, i32, i32) {
    %c0_i32 = arith.constant 0 : i32
    %c0_i32_0 = arith.constant 0 : i32
    %c0_i32_1 = arith.constant 0 : i32
    return %arg0, %c0_i32, %c0_i32_0 : i32, i32, i32
  }
}

</mosaic_0001>

<bundles_post_ra>
// kernel: tpu_custom_call.1
= control target key start
LH: loop header
LB: loop body
LE: loop exit
PB: predicated region body
PF: predicated region fallthrough
CT: control target
= control target key end

     0   :  { %15 = vsyncpa [#allocation3], 0  ;;  %s9284_s0 = inlined_call_operand.vmem [shape: f32[2,64,256], index: 0, kind: input, shape index: {}]   ;;  %s9285_s1 = inlined_call_operand.vmem [shape: f32[256,32], index: 1, kind: input, shape index: {}]   ;;  %s9286_s2 = inlined_call_operand.vmem [shape: f32[16,256], index: 2, kind: input, shape index: {}]   ;;  %s9287_s3 = inlined_call_operand.vmem [shape: f32[16,256], index: 3, kind: input, shape index: {}]   ;;  %s9288_s4 = inlined_call_operand.vmem [shape: f32[8,64], index: 4, kind: input, shape index: {}]   ;;  %s9289_s5 = inlined_call_operand.vmem [shape: f32[8,1], index: 5, kind: input, shape index: {}]   ;;  %s9290_s6 = inlined_call_operand.vmem [shape: f32[64,8], index: 6, kind: input, shape index: {}]   ;;  %s9291_s7 = inlined_call_operand.vmem [shape: f32[64,1], index: 7, kind: input, shape index: {}]   ;;  %s9292_s8 = inlined_call_operand.vmem [shape: f32[64,8], index: 8, kind: input, shape index: {}]   ;;  %s9293_s9 = inlined_call_operand.vmem [shape: f32[64,1], index: 9, kind: input, shape index: {}]   ;;  %s9294_s10 = inlined_call_operand.hbm [shape: f32[2,64,256], index: 10, kind: output, shape index: {}]  }
   0x1   :  { %17 = vsyncpa [#allocation3 + $0x1], 0  ;;  %s7456_s13 = smov 0   ;;  %s7458_s14 = smov 0  }
   0x2   :  { %s7460_s15 = smov 0   ;;  %s7462_s16 = smov 0  }
   0x3 LB: > { %s7477_s17 = sadd.s32 4294967295, %s7391_s16   ;;  %s5813_s18 = sadd.s32 4294967294, %s7391_s16   ;;  %s7391_s16 = sphi %s7462_s16, %s9531_s16   ;;  %s7387_s15 = sphi %s7460_s15, %s9530_s15   ;;  %s7383_s14 = sphi %s7458_s14, %s9529_s14   ;;  %s7379_s13 = sphi %s7456_s13, %s9528_s13  }
   0x4   : > { %s7481_s19 = sadd.s32 1, %s7391_s16   ;;  %s245_s20 = sadd.s32 1, %s7387_s15 }
   0x5   : > { %s242_s21 = ssub.s32 %s7391_s16, %s7481_s19  ;;  %p255_p0 = scmp.ne.s32.totalorder %s7387_s15, %s7383_s14 }
   0x6   : > { %p243_p1 = scmp.eq.s32.totalorder %s242_s21, 0  ;;  %p256_p2 = scmp.eq.s32.totalorder %s7477_s17, 1 }
   0x7   : > { %p261_p3 = scmp.ne.s32.totalorder %s7383_s14, %s7379_s13  ;;  %p262_p4 = scmp.eq.s32.totalorder %s5813_s18, 1 }
   0x8   : > { %s7492_s22 = scalar_select %p243_p1, %s7387_s15, %s245_s20  }
   0x9   : > { %p7494_p5 = por %p256_p2, %p255_p0  ;;  %p7498_p6 = por %p262_p4, %p261_p3 }
   0xa   : > { %p5816_p7 = scmp.ge.s32.totalorder %s7391_s16, 1  ;;  %p315_p8 = scmp.lt.s32.totalorder %s7391_s16, 3 }
   0xc   : > { %p316_p9 = pnand %p5816_p7, %p315_p8 }
   0xe   : > { %319 = sbr.rel (%p316_p9) target bundleno = 1577 (0x629), region = 60 }
  0x15   : > { %v374_v0 = vld [vmem:[%s9285_s1 + $0x80] sm:$0xff]  ;;  %v375_v1 = vld [vmem:[%s9285_s1 + $0x88] sm:$0xff]  ;;  %v376_v7 = vld [vmem:[%s9285_s1 + $0x90] sm:$0xff]  ;;  %p353_p10 = scmp.lt.s32.totalorder %s7477_s17, 1  ;;  %vm7394_vm0 = vmmov 0   ;;  %vm1707_vm1 = vcmask 523264  }
  0x16   : > { %v358_v2 = vld [vmem:[%s9285_s1] sm:$0xff]  ;;  %v497_v3 = vand.u32 4294901760, %v374_v0  ;;  %v500_v4 = vand.u32 4294901760, %v375_v1  ;;  %v359_v5 = vld [vmem:[%s9285_s1 + $0x8] sm:$0xff]  ;;  %v377_v8 = vld [vmem:[%s9285_s1 + $0x98] sm:$0xff]  ;;  %v503_v10 = vand.u32 4294901760, %v376_v7 }
  0x17   : > { %v449_v6 = vand.u32 4294901760, %v358_v2  ;;  %v452_v9 = vand.u32 4294901760, %v359_v5  ;;  %v506_v11 = vand.u32 4294901760, %v377_v8  ;;  %v360_v12 = vld [vmem:[%s9285_s1 + $0x10] sm:$0xff]  ;;  %v361_v13 = vld [vmem:[%s9285_s1 + $0x18] sm:$0xff]  ;;  %v378_v14 = vld [vmem:[%s9285_s1 + $0xa0] sm:$0xff] }
  0x18   : > { %v7531_v15 = vpack.c.bf16 %v500_v4, %v497_v3  ;;  %v7533_v16 = vsub.f32 %v374_v0, %v497_v3  ;;  %v7535_v17 = vsub.f32 %v375_v1, %v500_v4  ;;  %v379_v19 = vld [vmem:[%s9285_s1 + $0xa8] sm:$0xff]  ;;  %v362_v20 = vld [vmem:[%s9285_s1 + $0x20] sm:$0xff]  ;;  %v7555_v25 = vsub.f32 %v376_v7, %v503_v10  ;;  %v380_v26 = vld [vmem:[%s9285_s1 + $0xb0] sm:$0xff]  ;;  %s7594_s30 = scalar_select %p353_p10, %s7477_s17, 1 }
  0x19   : > { %v7537_v18 = vsub.f32 %v358_v2, %v449_v6  ;;  %v363_v21 = vld [vmem:[%s9285_s1 + $0x28] sm:$0xff]  ;;  %v7549_v22 = vpack.c.bf16 %v452_v9, %v449_v6  ;;  %v7551_v23 = vsub.f32 %v359_v5, %v452_v9  ;;  %v7553_v24 = vpack.c.bf16 %v506_v11, %v503_v10  ;;  %v381_v31 = vld [vmem:[%s9285_s1 + $0xb8] sm:$0xff]  ;;  %v364_v36 = vld [vmem:[%s9285_s1 + $0x30] sm:$0xff]  ;;  %s7397_s12 = smov 112   ;;  %s350_s21 = sand.u32 1, %s7383_s14  }
  0x1a   : > { %6624 = vmatprep.subr.bf16.mxu1 %v7531_v15  ;;  %v7561_v27 = vsub.f32 %v377_v8, %v506_v11  ;;  %v455_v28 = vand.u32 4294901760, %v360_v12  ;;  %v458_v29 = vand.u32 4294901760, %v361_v13  ;;  %v509_v30 = vand.u32 4294901760, %v378_v14  ;;  %v365_v37 = vld [vmem:[%s9285_s1 + $0x38] sm:$0xff]  ;;  %v382_v42 = vld [vmem:[%s9285_s1 + $0xc0] sm:$0xff]  ;;  %v383_v43 = vld [vmem:[%s9285_s1 + $0xc8] sm:$0xff] }
  0x1b   : > { %9407 = vst [vmem:[#allocation5_spill] sm:$0xff] %v7553_v24  ;;  %6626 = vmatpush3.bf16.msra.mxu1 %v7549_v22  ;;  %v512_v32 = vand.u32 4294901760, %v379_v19  ;;  %v461_v33 = vand.u32 4294901760, %v362_v20  ;;  %v464_v34 = vand.u32 4294901760, %v363_v21  ;;  %v515_v35 = vand.u32 4294901760, %v380_v26  ;;  %v366_v44 = vld [vmem:[%s9285_s1 + $0x40] sm:$0xff] }
  0x1c   : > { %6628 = vmatprep.subr.bf16.mxu1 %v7553_v24  ;;  %v7574_v38 = vpack.c.bf16 %v458_v29, %v455_v28  ;;  %v7576_v39 = vsub.f32 %v360_v12, %v455_v28  ;;  %v7578_v40 = vsub.f32 %v361_v13, %v458_v29  ;;  %v7580_v41 = vsub.f32 %v378_v14, %v509_v30  ;;  %v367_v49 = vld [vmem:[%s9285_s1 + $0x48] sm:$0xff]  ;;  %v384_v58 = vld [vmem:[%s9285_s1 + $0xd0] sm:$0xff]  ;;  %v385_v59 = vld [vmem:[%s9285_s1 + $0xd8] sm:$0xff]  ;;  %s5841_s18 = sshll.u32 %s7594_s30, 7  ;;  %s5817_s25 = sshll.u32 %s350_s21, 7 }
  0x1d   : > { %v7596_v45 = vpack.c.bf16 %v512_v32, %v509_v30  ;;  %v7598_v46 = vsub.f32 %v379_v19, %v512_v32  ;;  %v7600_v47 = vpack.c.bf16 %v464_v34, %v461_v33  ;;  %v7602_v48 = vsub.f32 %v362_v20, %v461_v33  ;;  %v368_v0 = vld [vmem:[%s9285_s1 + $0x50] sm:$0xff]  ;;  %v369_v1 = vld [vmem:[%s9285_s1 + $0x58] sm:$0xff]  ;;  %v386_v2 = vld [vmem:[%s9285_s1 + $0xe0] sm:$0xff]  ;;  %s7664_s11 = scalar_lea.vmem %s9284_s0, %s5841_s18  ;;  %s9196_s26 = scalar_lea.vmem [#allocation2], %s5817_s25 }
  0x1e   : > { %9408 = vst [vmem:[#allocation6_spill] sm:$0xff] %v7574_v38  ;;  %v7607_v50 = vsub.f32 %v363_v21, %v464_v34  ;;  %v518_v51 = vand.u32 4294901760, %v381_v31  ;;  %v7609_v52 = vsub.f32 %v380_v26, %v515_v35  ;;  %v467_v53 = vand.u32 4294901760, %v364_v36  ;;  %v387_v7 = vld [vmem:[%s9285_s1 + $0xe8] sm:$0xff]  ;;  %v370_v8 = vld [vmem:[%s9285_s1 + $0x60] sm:$0xff]  ;;  %s5842_s27 = sshll.u32 %s7477_s17, 11 }
  0x1f   : > { %9409 = vst [vmem:[#allocation7_spill] sm:$0xff] %v7596_v45  ;;  %9410 = vst [vmem:[#allocation8_spill] sm:$0xff] %v7600_v47  ;;  %6630 = vmatpush3.bf16.msra.mxu1 %v7574_v38  ;;  %v470_v54 = vand.u32 4294901760, %v365_v37  ;;  %v521_v55 = vand.u32 4294901760, %v382_v42  ;;  %v524_v56 = vand.u32 4294901760, %v383_v43  ;;  %v473_v57 = vand.u32 4294901760, %v366_v44 }
  0x20   : > { %6632 = vmatprep.subr.bf16.mxu1 %v7596_v45  ;;  %v7619_v60 = vpack.c.bf16 %v518_v51, %v515_v35  ;;  %v7621_v61 = vsub.f32 %v381_v31, %v518_v51  ;;  %v7623_v62 = vsub.f32 %v364_v36, %v467_v53  ;;  %v476_v63 = vand.u32 4294901760, %v367_v49  ;;  %v371_v9 = vld [vmem:[%s9285_s1 + $0x68] sm:$0xff]  ;;  %v388_v31 = vld [vmem:[%s9285_s1 + $0xf0] sm:$0xff]  ;;  %v389_v36 = vld [vmem:[%s9285_s1 + $0xf8] sm:$0xff]  ;;  %s5751_s28 = sshll.u32 %s9196_s26, 4  ;;  %s9243_s17 = scalar_lea.sflag [#allocation3], %s350_s21  ;;  %s9236_s28 = int_to_ptr.vmem [resolvable:$true] %s5751_s28 }
  0x21   : > { %v7635_v3 = vpack.c.bf16 %v470_v54, %v467_v53  ;;  %v7637_v4 = vsub.f32 %v365_v37, %v470_v54  ;;  %v7639_v5 = vpack.c.bf16 %v524_v56, %v521_v55  ;;  %v7641_v6 = vsub.f32 %v382_v42, %v521_v55  ;;  %v372_v37 = vld [vmem:[%s9285_s1 + $0x70] sm:$0xff]  ;;  %v373_v42 = vld [vmem:[%s9285_s1 + $0x78] sm:$0xff]  ;;  %v433_v53 = vld [vmem:[%s7664_s11 + $0x8] sm:$0xff]  ;;  %s7329_s20 = scalar_lea.vmem %s9236_s28, 2048  ;;  %s7398_s18 = smov [#allocation2]  }
  0x22   : > { %9411 = vst [vmem:[#allocation9_spill] sm:$0xff] %v7619_v60  ;;  %v7652_v10 = vsub.f32 %v383_v43, %v524_v56  ;;  %v7654_v11 = vpack.c.bf16 %v476_v63, %v473_v57  ;;  %v7656_v12 = vsub.f32 %v366_v44, %v473_v57  ;;  %v7658_v13 = vsub.f32 %v367_v49, %v476_v63  ;;  %v432_v54 = vld [vmem:[%s7664_s11] sm:$0xff]  ;;  %p7330_p11 = scmp.ne.s32.totalorder %s9236_s28, %s7329_s20  ;;  %s7333_s25 = sshll.u32 %s7398_s18, 4  ;;  %s7334_s25 = int_to_ptr.vmem [resolvable:$false] %s7333_s25 }
  0x23   : > { %9412 = vst [vmem:[#allocation10_spill] sm:$0xff] %v7635_v3  ;;  %9413 = vst [vmem:[#allocation11_spill] sm:$0xff] %v7639_v5  ;;  %6634 = vmatpush3.bf16.msra.mxu1 %v7600_v47  ;;  %v527_v14 = vand.u32 4294901760, %v384_v58  ;;  %v530_v19 = vand.u32 4294901760, %v385_v59  ;;  %v479_v20 = vand.u32 4294901760, %v368_v0  ;;  %v482_v21 = vand.u32 4294901760, %v369_v1  ;;  %p7336_p0 = scmp.lt.s32.totalorder %s9236_s28, %s7334_s25 }
  0x24   : > { %9414 = vst [vmem:[#allocation12_spill] sm:$0xff] %v7654_v11  ;;  %9415 = vst [vmem:[#allocation13_spill] sm:$0xff] %v7656_v12  ;;  %6636 = vmatprep.subr.bf16.mxu1 %v7619_v60  ;;  %v533_v26 = vand.u32 4294901760, %v386_v2  ;;  %v536_v28 = vand.u32 4294901760, %v387_v7  ;;  %v485_v29 = vand.u32 4294901760, %v370_v8  ;;  %v488_v30 = vand.u32 4294901760, %v371_v9  ;;  %p7331_p12 = pnand %p7330_p11, %p7494_p5 }
  0x25   : > { %9416 = vst [vmem:[#allocation14_spill] sm:$0xff] %v7658_v13  ;;  %v7670_v32 = vpack.c.bf16 %v530_v19, %v527_v14  ;;  %v7672_v33 = vsub.f32 %v384_v58, %v527_v14  ;;  %v7674_v34 = vsub.f32 %v385_v59, %v530_v19  ;;  %v7676_v35 = vpack.c.bf16 %v482_v21, %v479_v20 }
  0x26   : > { %v7687_v43 = vsub.f32 %v368_v0, %v479_v20  ;;  %v7689_v44 = vsub.f32 %v369_v1, %v482_v21  ;;  %v7691_v49 = vpack.c.bf16 %v536_v28, %v533_v26  ;;  %v7693_v51 = vsub.f32 %v386_v2, %v533_v26  ;;  %v435_v26 = vld [vmem:[%s7664_s11 + $0x18] sm:$0xff]  ;;  %p7332_p13 = pneg %p7331_p12 }
  0x27   : > { %9417 = vst [vmem:[#allocation15_spill] sm:$0xff] %v7670_v32  ;;  %9418 = vst [vmem:[#allocation16_spill] sm:$0xff] %v7676_v35  ;;  %6638 = vmatpush3.bf16.msra.mxu1 %v7635_v3  ;;  %v7698_v55 = vsub.f32 %v387_v7, %v536_v28  ;;  %v7700_v56 = vpack.c.bf16 %v488_v30, %v485_v29  ;;  %v7702_v57 = vsub.f32 %v370_v8, %v485_v29  ;;  %vm2289_vm2 = vcmask 64512  }
  0x28   : > { %9419 = vst [vmem:[#allocation17_spill] sm:$0xff] %v7691_v49  ;;  %v7704_v58 = vsub.f32 %v371_v9, %v488_v30  ;;  %6640 = vmatprep.subr.bf16.mxu1 %v7639_v5  ;;  %v539_v59 = vand.u32 4294901760, %v388_v31  ;;  %v542_v63 = vand.u32 4294901760, %v389_v36  ;;  %v491_v0 = vand.u32 4294901760, %v372_v37 }
  0x29   : > { %9420 = vst [vmem:[#allocation18_spill] sm:$0xff] %v7700_v56  ;;  %9421 = vst [vmem:[#allocation19_spill] sm:$0xff] %v7702_v57  ;;  %v494_v1 = vand.u32 4294901760, %v373_v42  ;;  %v7707_v2 = vand.u32 4294901760, %v433_v53  ;;  %v7709_v14 = vand.u32 4294901760, %v432_v54  ;;  %v9295_v7 = vand.u32 4294901760, %v7533_v16 }
  0x2a   : > { %9422 = vst [vmem:[#allocation20_spill] sm:$0xff] %v7704_v58  ;;  %v7713_v20 = vpack.c.bf16 %v542_v63, %v539_v59  ;;  %v7715_v8 = vsub.f32 %v388_v31, %v539_v59  ;;  %v7717_v9 = vsub.f32 %v389_v36, %v542_v63  ;;  %v7723_v28 = vsub.f32 %v372_v37, %v491_v0  ;;  %v434_v63 = vld [vmem:[%s7664_s11 + $0x10] sm:$0xff] }
  0x2b   : > { %v7719_v21 = vpack.c.bf16 %v494_v1, %v491_v0  ;;  %6642 = vmatpush3.bf16.msra.mxu1 %v7654_v11  ;;  %v7725_v29 = vsub.f32 %v373_v42, %v494_v1  ;;  %v7728_v30 = vsub.f32 %v433_v53, %v7707_v2  ;;  %v7731_v19 = vsub.f32 %v432_v54, %v7709_v14 }
  0x2c   : > { %9423 = vst [vmem:[#allocation21_spill] sm:$0xff] %v7713_v20  ;;  %6644 = vmatprep.subr.bf16.mxu1 %v7670_v32  ;;  %v781_v31 = vsub.f32 %v7533_v16, %v9295_v7  ;;  %v9426_v36 = vand.u32 4294901760, %v7535_v17  ;;  %v9302_v37 = vand.u32 4294901760, %v7537_v18  ;;  %v9303_v42 = vand.u32 4294901760, %v7551_v23 }
  0x2d   : > { %9424 = vst [vmem:[#allocation22_spill] sm:$0xff] %v7719_v21  ;;  %9425 = vst [vmem:[#allocation23_spill] sm:$0xff] %v7728_v30  ;;  %v9312_v53 = vand.u32 4294901760, %v7728_v30  ;;  %v6687_v0 = vpack.c.bf16 %v7535_v17, %v7533_v16  ;;  %v7747_v1 = vand.u32 4294901760, %v435_v26  ;;  %1076 = vmatprep.mubr.f32.mxu0 %v7728_v30  ;;  %v9427_v5 = vand.u32 4294901760, %v7731_v19 }
  0x2e   : > { %v788_v59 = vsub.f32 %v7535_v17, %v9426_v36  ;;  %v782_v7 = vand.u32 4294901760, %v781_v31  ;;  %v669_v36 = vsub.f32 %v7537_v18, %v9302_v37  ;;  %v676_v11 = vsub.f32 %v7551_v23, %v9303_v42 }
  0x2f   : > { %6646 = vmatpush3.bf16.msra.mxu1 %v7676_v35  ;;  %v547_v54 = vsub.f32 %v7728_v30, %v9312_v53  ;;  %v553_v31 = vsub.f32 %v7731_v19, %v9427_v5  ;;  %6688 = vmatprep.subr.bf16.mxu0 %v6687_v0  ;;  %v7766_v37 = vand.u32 4294901760, %v434_v63  ;;  %v6689_v35 = vpack.c.bf16 %v7551_v23, %v7537_v18  ;;  %v437_v0 = vld [vmem:[%s7664_s11 + $0x28] sm:$0xff] }
  0x30   : > { %v789_v32 = vand.u32 4294901760, %v788_v59  ;;  %v7764_v59 = vsub.f32 %v435_v26, %v7747_v1  ;;  %6648 = vmatprep.subr.bf16.mxu1 %v7691_v49  ;;  %v670_v3 = vand.u32 4294901760, %v669_v36  ;;  %v677_v60 = vand.u32 4294901760, %v676_v11 }
  0x31   : > { %9428 = vst [vmem:[#allocation24_spill] sm:$0xff] %v7766_v37  ;;  %v548_v47 = vand.u32 4294901760, %v547_v54  ;;  %v554_v53 = vand.u32 4294901760, %v553_v31  ;;  %v7773_v5 = vsub.f32 %v434_v63, %v7766_v37  ;;  %6690 = vmatpush3.bf16.msra.mxu0 %v6689_v35  ;;  %v9319_v45 = vand.u32 4294901760, %v7555_v25  ;;  %v436_v31 = vld [vmem:[%s7664_s11 + $0x20] sm:$0xff] }
  0x32   : > { %v6655_v42 = vpack.c.bf16 %v789_v32, %v782_v7  ;;  %v9316_v30 = vand.u32 4294901760, %v7764_v59  ;;  %v6657_v26 = vpack.c.bf16 %v677_v60, %v670_v3  ;;  %v9320_v32 = vand.u32 4294901760, %v7561_v27 }
  0x33   : > { %v9325_v11 = vand.u32 4294901760, %v7576_v39  ;;  %6650 = vmatpush3.bf16.msra.mxu1 %v7700_v56  ;;  %549 = vmatprep.mubr.f32.mxu1 %v548_v47  ;;  %v9330_v63 = vand.u32 4294901760, %v7773_v5  ;;  %v6691_v60 = vpack.c.bf16 %v7561_v27, %v7555_v25  ;;  %v795_v3 = vsub.f32 %v7555_v25, %v9319_v45 }
  0x34   : > { %v562_v7 = vsub.f32 %v7764_v59, %v9316_v30  ;;  %6652 = vmatprep.subr.bf16.mxu1 %v7713_v20  ;;  %v802_v47 = vsub.f32 %v7561_v27, %v9320_v32  ;;  %v7797_v36 = vand.u32 4294901760, %v437_v0  ;;  %v9429_v20 = vand.u32 4294901760, %v7578_v40 }
  0x35   : > { %v683_v35 = vsub.f32 %v7576_v39, %v9325_v11  ;;  %v568_v54 = vsub.f32 %v7773_v5, %v9330_v63  ;;  %6692 = vmatprep.subr.bf16.mxu0 %v6691_v60  ;;  %v6693_v32 = vpack.c.bf16 %v7578_v40, %v7576_v39  ;;  %v796_v56 = vand.u32 4294901760, %v795_v3 }
  0x36   : > { %v563_v30 = vand.u32 4294901760, %v562_v7  ;;  %v690_v45 = vsub.f32 %v7578_v40, %v9429_v20  ;;  %v803_v49 = vand.u32 4294901760, %v802_v47  ;;  %v7809_v38 = vsub.f32 %v437_v0, %v7797_v36  ;;  %v439_v0 = vld [vmem:[%s7664_s11 + $0x38] sm:$0xff] }
  0x37   : > { %v684_v11 = vand.u32 4294901760, %v683_v35  ;;  %6654 = vmatpush3.bf16.msra.mxu1 %v7719_v21  ;;  %v569_v7 = vand.u32 4294901760, %v568_v54  ;;  %6694 = vmatpush3.bf16.msra.mxu0 %v6693_v32  ;;  %v7812_v63 = vand.u32 4294901760, %v436_v31  ;;  %v9337_v20 = vand.u32 4294901760, %v7580_v41 }
  0x38   : > { %v691_v37 = vand.u32 4294901760, %v690_v45  ;;  %6656 = vmatprep.subr.bf16.mxu1 %v6655_v42  ;;  %v6659_v60 = vpack.c.bf16 %v803_v49, %v796_v56  ;;  %v9335_v24 = vand.u32 4294901760, %v7809_v38  ;;  %v9336_v3 = vand.u32 4294901760, %v7598_v46 }
  0x39   : > { %9430 = vst [vmem:[#allocation25_spill] sm:$0xff] %v7812_v63  ;;  %v9338_v47 = vand.u32 4294901760, %v7602_v48  ;;  %v7820_v21 = vsub.f32 %v436_v31, %v7812_v63  ;;  %v809_v45 = vsub.f32 %v7580_v41, %v9337_v20  ;;  %v9341_v32 = vand.u32 4294901760, %v7607_v50 }
  0x3a   : > { %v6661_v35 = vpack.c.bf16 %v691_v37, %v684_v11  ;;  %555 = vmatmul.mubr.f32.vlgmr.msra.gmra.mrb[0].mxu1 %v554_v53  ;;  %v577_v49 = vsub.f32 %v7809_v38, %v9335_v24  ;;  %v816_v56 = vsub.f32 %v7598_v46, %v9336_v3  ;;  %v6695_v42 = vpack.c.bf16 %v7598_v46, %v7580_v41  ;;  %v438_v11 = vld [vmem:[%s7664_s11 + $0x30] sm:$0xff] }
  0x3b   : > { %v697_v37 = vsub.f32 %v7602_v48, %v9338_v47  ;;  %6658 = vmatpush3.bf16.msra.mxu1 %v6657_v26  ;;  %564 = vmatprep.mubr.f32.mxu1 %v563_v30  ;;  %v9342_v53 = vand.u32 4294901760, %v7820_v21  ;;  %v810_v54 = vand.u32 4294901760, %v809_v45  ;;  %v704_v31 = vsub.f32 %v7607_v50, %v9341_v32 }
  0x3c   : > { %v7842_v24 = vand.u32 4294901760, %v439_v0  ;;  %6660 = vmatprep.subr.bf16.mxu1 %v6659_v60  ;;  %v578_v3 = vand.u32 4294901760, %v577_v49  ;;  %v817_v20 = vand.u32 4294901760, %v816_v56  ;;  %6696 = vmatprep.subr.bf16.mxu0 %v6695_v42  ;;  %v6697_v63 = vpack.c.bf16 %v7607_v50, %v7602_v48  ;;  %v441_v42 = vld [vmem:[%s7664_s11 + $0x48] sm:$0xff] }
  0x3d   : > { %v698_v47 = vand.u32 4294901760, %v697_v37  ;;  %v583_v30 = vsub.f32 %v7820_v21, %v9342_v53  ;;  %v705_v26 = vand.u32 4294901760, %v704_v31  ;;  %v7852_v32 = vand.u32 4294901760, %v438_v11 }
  0x3e   : > { %9431 = vst [vmem:[#allocation26_spill] sm:$0xff] %v7842_v24  ;;  %v7850_v45 = vsub.f32 %v439_v0, %v7842_v24  ;;  %570 = vmatmul.mubr.f32.gmra.mrb[2].mxu1 %v569_v7  ;;  %v6663_v60 = vpack.c.bf16 %v817_v20, %v810_v54  ;;  %6698 = vmatpush3.bf16.msra.mxu0 %v6697_v63  ;;  %v9347_v49 = vand.u32 4294901760, %v7609_v52  ;;  %v9345_v56 = vand.u32 4294901760, %v7621_v61 }
  0x3f   : > { %9432 = vst [vmem:[#allocation27_spill] sm:$0xff] %v7852_v32  ;;  %v9346_v37 = vand.u32 4294901760, %v7623_v62  ;;  %6662 = vmatpush3.bf16.msra.mxu1 %v6661_v35  ;;  %579 = vmatprep.mubr.f32.mxu1 %v578_v3  ;;  %v584_v53 = vand.u32 4294901760, %v583_v30  ;;  %v6665_v31 = vpack.c.bf16 %v705_v26, %v698_v47  ;;  %v7860_v24 = vsub.f32 %v438_v11, %v7852_v32  ;;  %v440_v30 = vld [vmem:[%s7664_s11 + $0x40] sm:$0xff] }
  0x40   : > { %v9348_v0 = vand.u32 4294901760, %v7850_v45  ;;  %6664 = vmatprep.subr.bf16.mxu1 %v6663_v60  ;;  %v823_v63 = vsub.f32 %v7609_v52, %v9347_v49  ;;  %v830_v7 = vsub.f32 %v7621_v61, %v9345_v56  ;;  %v9351_v3 = vand.u32 4294901760, %v7637_v4 }
  0x41   : > { %9433 = vst [vmem:[#allocation28_spill] sm:$0xff] %v7860_v24  ;;  %v711_v20 = vsub.f32 %v7623_v62, %v9346_v37  ;;  %v9352_v35 = vand.u32 4294901760, %v7860_v24  ;;  %v6699_v11 = vpack.c.bf16 %v7621_v61, %v7609_v52  ;;  %v7878_v54 = vand.u32 4294901760, %v441_v42 }
  0x42   : > { %v592_v47 = vsub.f32 %v7850_v45, %v9348_v0  ;;  %585 = vmatmul.mubr.f32.gmra.mrb[4].mxu1 %v584_v53  ;;  %v824_v26 = vand.u32 4294901760, %v823_v63  ;;  %v831_v60 = vand.u32 4294901760, %v830_v7  ;;  %v718_v37 = vsub.f32 %v7637_v4, %v9351_v3 }
  0x43   : > { %9434 = vst [vmem:[#allocation29_spill] sm:$0xff] %v7878_v54  ;;  %v712_v56 = vand.u32 4294901760, %v711_v20  ;;  %6666 = vmatpush3.bf16.msra.mxu1 %v6665_v31  ;;  %v598_v0 = vsub.f32 %v7860_v24, %v9352_v35  ;;  %6700 = vmatprep.subr.bf16.mxu0 %v6699_v11  ;;  %v7888_v32 = vsub.f32 %v441_v42, %v7878_v54  ;;  %v7892_v20 = vand.u32 4294901760, %v440_v30  ;;  %v443_v35 = vld [vmem:[%s7664_s11 + $0x58] sm:$0xff] }
  0x44   : > { %v593_v49 = vand.u32 4294901760, %v592_v47  ;;  %v6701_v53 = vpack.c.bf16 %v7637_v4, %v7623_v62  ;;  %v6667_v63 = vpack.c.bf16 %v831_v60, %v824_v26  ;;  %v719_v7 = vand.u32 4294901760, %v718_v37 }
  0x45   : > { %9435 = vst [vmem:[#allocation30_spill] sm:$0xff] %v7888_v32  ;;  %9436 = vst [vmem:[#allocation31_spill] sm:$0xff] %v7892_v20  ;;  %v9357_v3 = vand.u32 4294901760, %v7641_v6  ;;  %v599_v31 = vand.u32 4294901760, %v598_v0  ;;  %v9355_v47 = vand.u32 4294901760, %v7888_v32  ;;  %v9356_v11 = vand.u32 4294901760, %v7652_v10 }
  0x46   : > { %594 = vmatprep.mubr.f32.mxu1 %v593_v49  ;;  %6702 = vmatpush3.bf16.msra.mxu0 %v6701_v53  ;;  %v9360_v42 = vand.u32 4294901760, %v7656_v12  ;;  %v6669_v54 = vpack.c.bf16 %v719_v7, %v712_v56  ;;  %v7900_v26 = vsub.f32 %v440_v30, %v7892_v20  ;;  %v9365_v49 = vand.u32 4294901760, %v7658_v13  ;;  %v442_v53 = vld [vmem:[%s7664_s11 + $0x50] sm:$0xff] }
  0x47   : > { %6668 = vmatprep.subr.bf16.mxu1 %v6667_v63  ;;  %v837_v37 = vsub.f32 %v7641_v6, %v9357_v3  ;;  %600 = vmatmul.mubr.f32.gmra.mrb[6].mxu1 %v599_v31  ;;  %v607_v0 = vsub.f32 %v7888_v32, %v9355_v47  ;;  %v844_v60 = vsub.f32 %v7652_v10, %v9356_v11  ;;  %v7922_v47 = vand.u32 4294901760, %v443_v35 }
  0x48   : > { %v725_v56 = vsub.f32 %v7656_v12, %v9360_v42  ;;  %v6703_v30 = vpack.c.bf16 %v7652_v10, %v7641_v6  ;;  %6670 = vmatpush3.bf16.msra.mxu1 %v6669_v54  ;;  %v9368_v63 = vand.u32 4294901760, %v7900_v26  ;;  %v732_v31 = vsub.f32 %v7658_v13, %v9365_v49 }
  0x49   : > { %v838_v7 = vand.u32 4294901760, %v837_v37  ;;  %9437 = vst [vmem:[#allocation32_spill] sm:$0xff] %v7922_v47  ;;  %v608_v11 = vand.u32 4294901760, %v607_v0  ;;  %v845_v3 = vand.u32 4294901760, %v844_v60  ;;  %v6705_v42 = vpack.c.bf16 %v7658_v13, %v7656_v12 }
  0x4a   : > { %v726_v20 = vand.u32 4294901760, %v725_v56  ;;  %6704 = vmatprep.subr.bf16.mxu0 %v6703_v30  ;;  %v613_v54 = vsub.f32 %v7900_v26, %v9368_v63  ;;  %v733_v32 = vand.u32 4294901760, %v732_v31  ;;  %v7930_v37 = vsub.f32 %v443_v35, %v7922_v47  ;;  %v445_v30 = vld [vmem:[%s7664_s11 + $0x68] sm:$0xff] }
  0x4b   : > { %v7932_v24 = vand.u32 4294901760, %v442_v53  ;;  %609 = vmatprep.mubr.f32.mxu1 %v608_v11  ;;  %v6671_v49 = vpack.c.bf16 %v845_v3, %v838_v7  ;;  %6706 = vmatpush3.bf16.msra.mxu0 %v6705_v42  ;;  %v9370_v0 = vand.u32 4294901760, %v7672_v33  ;;  %v9369_v60 = vand.u32 4294901760, %v7674_v34 }
  0x4c   : > { %v9371_v56 = vand.u32 4294901760, %v7687_v43  ;;  %v614_v13 = vand.u32 4294901760, %v613_v54  ;;  %v6673_v12 = vpack.c.bf16 %v733_v32, %v726_v20  ;;  %v9372_v31 = vand.u32 4294901760, %v7930_v37  ;;  %v444_v54 = vld [vmem:[%s7664_s11 + $0x60] sm:$0xff] }
  0x4d   : > { %9438 = vst [vmem:[#allocation33_spill] sm:$0xff] %v7932_v24  ;;  %v7940_v35 = vsub.f32 %v442_v53, %v7932_v24  ;;  %6672 = vmatprep.subr.bf16.mxu1 %v6671_v49  ;;  %v851_v3 = vsub.f32 %v7672_v33, %v9370_v0  ;;  %v858_v11 = vsub.f32 %v7674_v34, %v9369_v60  ;;  %v9377_v32 = vand.u32 4294901760, %v7689_v44 }
  0x4e   : > { %v739_v42 = vsub.f32 %v7687_v43, %v9371_v56  ;;  %615 = vmatmul.mubr.f32.gmra.mrb[8].mxu1 %v614_v13  ;;  %v622_v20 = vsub.f32 %v7930_v37, %v9372_v31  ;;  %v6707_v53 = vpack.c.bf16 %v7674_v34, %v7672_v33  ;;  %v7958_v7 = vand.u32 4294901760, %v445_v30 }
  0x4f   : > { %9439 = vst [vmem:[#allocation34_spill] sm:$0xff] %v7940_v35  ;;  %v9378_v49 = vand.u32 4294901760, %v7940_v35  ;;  %6674 = vmatpush3.bf16.msra.mxu1 %v6673_v12  ;;  %v852_v63 = vand.u32 4294901760, %v851_v3  ;;  %v859_v60 = vand.u32 4294901760, %v858_v11  ;;  %v746_v13 = vsub.f32 %v7689_v44, %v9377_v32 }
  0x50   : > { %9440 = vst [vmem:[#allocation35_spill] sm:$0xff] %v7958_v7  ;;  %v740_v0 = vand.u32 4294901760, %v739_v42  ;;  %v623_v56 = vand.u32 4294901760, %v622_v20  ;;  %6708 = vmatprep.subr.bf16.mxu0 %v6707_v53  ;;  %v7968_v24 = vsub.f32 %v445_v30, %v7958_v7  ;;  %v6709_v12 = vpack.c.bf16 %v7689_v44, %v7687_v43 }
  0x51   : > { %v628_v31 = vsub.f32 %v7940_v35, %v9378_v49  ;;  %v6675_v3 = vpack.c.bf16 %v859_v60, %v852_v63  ;;  %v747_v11 = vand.u32 4294901760, %v746_v13  ;;  %v7972_v42 = vand.u32 4294901760, %v444_v54  ;;  %v447_v49 = vld [vmem:[%s7664_s11 + $0x78] sm:$0xff] }
  0x52   : > { %9441 = vst [vmem:[#allocation36_spill] sm:$0xff] %v7968_v24  ;;  %v9382_v47 = vand.u32 4294901760, %v7693_v51  ;;  %624 = vmatprep.mubr.f32.mxu1 %v623_v56  ;;  %v9381_v20 = vand.u32 4294901760, %v7968_v24  ;;  %6710 = vmatpush3.bf16.msra.mxu0 %v6709_v12  ;;  %v9383_v53 = vand.u32 4294901760, %v7698_v55  ;;  %v9386_v30 = vand.u32 4294901760, %v7702_v57  ;;  %v446_v12 = vld [vmem:[%s7664_s11 + $0x70] sm:$0xff] }
  0x53   : > { %9442 = vst [vmem:[#allocation37_spill] sm:$0xff] %v7972_v42  ;;  %v629_v32 = vand.u32 4294901760, %v628_v31  ;;  %6676 = vmatprep.subr.bf16.mxu1 %v6675_v3  ;;  %v6677_v7 = vpack.c.bf16 %v747_v11, %v740_v0  ;;  %v7980_v63 = vsub.f32 %v444_v54, %v7972_v42  ;;  %v9391_v56 = vand.u32 4294901760, %v7704_v58 }
  0x54   : > { %v865_v60 = vsub.f32 %v7693_v51, %v9382_v47  ;;  %v637_v31 = vsub.f32 %v7968_v24, %v9381_v20  ;;  %v872_v13 = vsub.f32 %v7698_v55, %v9383_v53  ;;  %v753_v0 = vsub.f32 %v7702_v57, %v9386_v30 }
  0x55   : > { %630 = vmatmul.mubr.f32.gmra.mrb[10].mxu1 %v629_v32  ;;  %v6711_v54 = vpack.c.bf16 %v7698_v55, %v7693_v51  ;;  %v9394_v3 = vand.u32 4294901760, %v7980_v63  ;;  %v760_v11 = vsub.f32 %v7704_v58, %v9391_v56  ;;  %v8002_v20 = vand.u32 4294901760, %v447_v49 }
  0x56   : > { %6678 = vmatpush3.bf16.msra.mxu1 %v6677_v7  ;;  %v866_v32 = vand.u32 4294901760, %v865_v60  ;;  %v638_v47 = vand.u32 4294901760, %v637_v31  ;;  %v873_v53 = vand.u32 4294901760, %v872_v13  ;;  %v754_v42 = vand.u32 4294901760, %v753_v0 }
  0x57   : > { %9443 = vst [vmem:[#allocation38_spill] sm:$0xff] %v8002_v20  ;;  %6712 = vmatprep.subr.bf16.mxu0 %v6711_v54  ;;  %v6713_v30 = vpack.c.bf16 %v7704_v58, %v7702_v57  ;;  %v643_v7 = vsub.f32 %v7980_v63, %v9394_v3  ;;  %v761_v24 = vand.u32 4294901760, %v760_v11  ;;  %v8010_v60 = vsub.f32 %v447_v49, %v8002_v20 }
  0x58   : > { %v8012_v35 = vand.u32 4294901760, %v446_v12  ;;  %639 = vmatprep.mubr.f32.mxu1 %v638_v47  ;;  %v6679_v56 = vpack.c.bf16 %v873_v53, %v866_v32  ;;  %v9398_v31 = vand.u32 4294901760, %v7715_v8  ;;  %v9397_v13 = vand.u32 4294901760, %v7717_v9 }
  0x59   : > { %6714 = vmatpush3.bf16.msra.mxu0 %v6713_v30  ;;  %v9395_v0 = vand.u32 4294901760, %v7723_v28  ;;  %v644_v54 = vand.u32 4294901760, %v643_v7  ;;  %v6681_v58 = vpack.c.bf16 %v761_v24, %v754_v42  ;;  %v9396_v57 = vand.u32 4294901760, %v8010_v60 }
  0x5a   : > { %9444 = vst [vmem:[#allocation39_spill] sm:$0xff] %v8012_v35  ;;  %v8019_v11 = vsub.f32 %v446_v12, %v8012_v35  ;;  %6680 = vmatprep.subr.bf16.mxu1 %v6679_v56  ;;  %v879_v47 = vsub.f32 %v7715_v8, %v9398_v31  ;;  %v886_v49 = vsub.f32 %v7717_v9, %v9397_v13  ;;  %v9403_v24 = vand.u32 4294901760, %v7725_v29 }
  0x5b   : > { %v767_v53 = vsub.f32 %v7723_v28, %v9395_v0  ;;  %645 = vmatmul.mubr.f32.gmra.mrb[12].mxu1 %v644_v54  ;;  %v652_v42 = vsub.f32 %v8010_v60, %v9396_v57  ;;  %v6715_v56 = vpack.c.bf16 %v7717_v9, %v7715_v8  ;;  %v6717_v12 = vpack.c.bf16 %v7725_v29, %v7723_v28 }
  0x5c   : > { %v9404_v30 = vand.u32 4294901760, %v8019_v11  ;;  %6682 = vmatpush3.bf16.msra.mxu1 %v6681_v58  ;;  %v880_v32 = vand.u32 4294901760, %v879_v47  ;;  %v887_v7 = vand.u32 4294901760, %v886_v49  ;;  %v774_v54 = vsub.f32 %v7725_v29, %v9403_v24 }
  0x5d   : > { %v768_v3 = vand.u32 4294901760, %v767_v53  ;;  %v653_v0 = vand.u32 4294901760, %v652_v42  ;;  %6716 = vmatprep.subr.bf16.mxu0 %v6715_v56  ;;  %v9445_v13 = vand.u32 4294901760, %v7533_v16  ;;  %v9446_v31 = vand.u32 4294901760, %v7535_v17 }
  0x5e   : > { %v658_v57 = vsub.f32 %v8019_v11, %v9404_v30  ;;  %v6683_v20 = vpack.c.bf16 %v887_v7, %v880_v32  ;;  %v775_v58 = vand.u32 4294901760, %v774_v54  ;;  %6718 = vmatpush3.bf16.msra.mxu0 %v6717_v12  ;;  %v9447_v49 = vand.u32 4294901760, %v7537_v18  ;;  %v9467_v12 = vld [vmem:[#allocation25_spill] sm:$0xff]  ;;  %v9468_v32 = vld [vmem:[#allocation28_spill] sm:$0xff]  ;;  %v9470_v54 = vld [vmem:[#allocation26_spill] sm:$0xff] }
  0x5f   : > { %v6751_v35 = vpack.c.bf16 %v9446_v31, %v9445_v13  ;;  %654 = vmatprep.mubr.f32.mxu1 %v653_v0  ;;  %v9448_v53 = vand.u32 4294901760, %v7551_v23  ;;  %v9449_v56 = vand.u32 4294901760, %v7555_v25  ;;  %v9450_v16 = vand.u32 4294901760, %v7561_v27  ;;  %v9460_v31 = vld [vmem:[#allocation24_spill] sm:$0xff]  ;;  %v9461_v13 = vld [vmem:[#allocation6_spill] sm:$0xff] }
  0x60   : > { %v659_v47 = vand.u32 4294901760, %v658_v57  ;;  %6684 = vmatprep.subr.bf16.mxu1 %v6683_v20  ;;  %v6685_v24 = vpack.c.bf16 %v775_v58, %v768_v3  ;;  %v9451_v17 = vand.u32 4294901760, %v7576_v39  ;;  %v9452_v18 = vand.u32 4294901760, %v7578_v40  ;;  %v9455_v39 = vld [vmem:[#allocation5_spill] sm:$0xff]  ;;  %v9469_v7 = vld [vmem:[#allocation8_spill] sm:$0xff] }
  0x61   : > { %6752 = vmatprep.subr.bf16.mxu0 %v6751_v35  ;;  %v6753_v42 = vpack.c.bf16 %v9448_v53, %v9447_v49  ;;  %v6755_v30 = vpack.c.bf16 %v9450_v16, %v9449_v56  ;;  %1079 = vmatmul.mubr.f32.vlgmr.msra.gmra.mrb[0].mxu0 %v7731_v19  ;;  %v9453_v25 = vand.u32 4294901760, %v7580_v41  ;;  %v9454_v27 = vand.u32 4294901760, %v7598_v46  ;;  %v9479_v16 = vld [vmem:[#allocation27_spill] sm:$0xff] }
  0x62   : > { %660 = vmatmul.mubr.f32.gmra.mrb[14].mxu1 %v659_v47  ;;  %v6757_v23 = vpack.c.bf16 %v9452_v18, %v9451_v17  ;;  %1085 = vmatprep.mubr.f32.mxu0 %v7764_v59  ;;  %v9456_v40 = vand.u32 4294901760, %v7602_v48  ;;  %v9457_v35 = vand.u32 4294901760, %v7607_v50  ;;  %v9458_v41 = vand.u32 4294901760, %v7609_v52  ;;  %v9462_v48 = vld [vmem:[#allocation7_spill] sm:$0xff]  ;;  %v9474_v47 = vld [vmem:[#allocation14_spill] sm:$0xff]  ;;  %v9481_v18 = vld [vmem:[#allocation29_spill] sm:$0xff] }
  0x63   : > { %6686 = vmatpush3.bf16.msra.mxu1 %v6685_v24  ;;  %890 = vmatprep.mubr.f32.mxu1 %v7707_v2  ;;  %v6759_v57 = vpack.c.bf16 %v9454_v27, %v9453_v25  ;;  %v9459_v46 = vand.u32 4294901760, %v7621_v61  ;;  %v9463_v50 = vand.u32 4294901760, %v7623_v62  ;;  %v9464_v0 = vand.u32 4294901760, %v7637_v4  ;;  %v9471_v62 = vld [vmem:[#allocation9_spill] sm:$0xff]  ;;  %v9480_v17 = vld [vmem:[#allocation10_spill] sm:$0xff] }
  0x64   : > { %6720 = vmatprep.subr.bf16.mxu1 %v7531_v15  ;;  %6754 = vmatpush3.bf16.msra.mxu0 %v6753_v42  ;;  %v6761_v20 = vpack.c.bf16 %v9457_v35, %v9456_v40  ;;  %v9465_v52 = vand.u32 4294901760, %v7641_v6  ;;  %v9466_v61 = vand.u32 4294901760, %v7652_v10  ;;  %v9472_v4 = vld [vmem:[#allocation13_spill] sm:$0xff]  ;;  %v9475_v49 = vand.u32 4294901760, %v9474_v47  ;;  %v9476_v6 = vld [vmem:[#allocation30_spill] sm:$0xff]  ;;  %v9487_v35 = vld [vmem:[#allocation31_spill] sm:$0xff] }
  0x65   : > { %6756 = vmatprep.subr.bf16.mxu0 %v6755_v30  ;;  %1088 = vmatmul.mubr.f32.gmra.mrb[2].mxu0 %v7773_v5  ;;  %v6763_v3 = vpack.c.bf16 %v9459_v46, %v9458_v41  ;;  %v6765_v24 = vpack.c.bf16 %v9464_v0, %v9463_v50  ;;  %v9473_v58 = vand.u32 4294901760, %v9472_v4  ;;  %v9477_v10 = vand.u32 4294901760, %v7672_v33  ;;  %v9489_v41 = vld [vmem:[#allocation12_spill] sm:$0xff]  ;;  %v9502_v47 = vld [vmem:[#allocation17_spill] sm:$0xff] }
  0x66   : > { %892 = vmatmul.mubr.f32.vlgmr.msra.gmra.mrb[16].mxu1 %v7709_v14  ;;  %1094 = vmatprep.mubr.f32.mxu0 %v7809_v38  ;;  %v6767_v30 = vpack.c.bf16 %v9466_v61, %v9465_v52  ;;  %v9478_v42 = vand.u32 4294901760, %v7674_v34  ;;  %v9483_v25 = vand.u32 4294901760, %v7687_v43  ;;  %v9484_v27 = vand.u32 4294901760, %v7689_v44  ;;  %v9490_v46 = vld [vmem:[#allocation32_spill] sm:$0xff]  ;;  %v9491_v43 = vld [vmem:[#allocation15_spill] sm:$0xff] }
  0x67   : > { %6722 = vmatpush3.bf16.msra.mxu1 %v7549_v22  ;;  %897 = vmatprep.mubr.f32.mxu1 %v7747_v1  ;;  %v6769_v53 = vpack.c.bf16 %v9475_v49, %v9473_v58  ;;  %v9485_v33 = vand.u32 4294901760, %v7693_v51  ;;  %v9486_v34 = vand.u32 4294901760, %v7698_v55  ;;  %v9492_v44 = vld [vmem:[#allocation19_spill] sm:$0xff]  ;;  %v9494_v50 = vld [vmem:[#allocation20_spill] sm:$0xff]  ;;  %v9497_v55 = vand.u32 4294901760, %v7715_v8  ;;  %v9505_v8 = vld [vmem:[#allocation37_spill] sm:$0xff] }
  0x68   : > { %6724 = vmatprep.subr.bf16.mxu1 %v9455_v39  ;;  %6758 = vmatpush3.bf16.msra.mxu0 %v6757_v23  ;;  %v6771_v56 = vpack.c.bf16 %v9478_v42, %v9477_v10  ;;  %v9482_v23 = vld [vmem:[#allocation11_spill] sm:$0xff]  ;;  %v9495_v0 = vand.u32 4294901760, %v9494_v50  ;;  %v9496_v51 = vld [vmem:[#allocation36_spill] sm:$0xff]  ;;  %v9498_v52 = vand.u32 4294901760, %v7717_v9  ;;  %v9503_v49 = vand.u32 4294901760, %v7723_v28  ;;  %v9506_v9 = vld [vmem:[#allocation18_spill] sm:$0xff] }
  0x69   : > { %6760 = vmatprep.subr.bf16.mxu0 %v6759_v57  ;;  %1097 = vmatmul.mubr.f32.gmra.mrb[4].mxu0 %v7820_v21  ;;  %v6773_v57 = vpack.c.bf16 %v9484_v27, %v9483_v25  ;;  %v6775_v40 = vpack.c.bf16 %v9486_v34, %v9485_v33  ;;  %v9500_v4 = vld [vmem:[#allocation16_spill] sm:$0xff]  ;;  %v9501_v58 = vld [vmem:[#allocation35_spill] sm:$0xff]  ;;  %v9507_v42 = vld [vmem:[#allocation38_spill] sm:$0xff]  ;;  %v9514_v33 = vand.u32 4294901760, %v7764_v59  ;;  %v9516_v34 = vand.u32 4294901760, %v7809_v38 }
  0x6a   : > { %899 = vmatmul.mubr.f32.gmra.mrb[18].mxu1 %v9460_v31  ;;  %1103 = vmatprep.mubr.f32.mxu0 %v7850_v45  ;;  %v6779_v61 = vpack.c.bf16 %v9498_v52, %v9497_v55  ;;  %v9509_v28 = vld [vmem:[#allocation39_spill] sm:$0xff]  ;;  %v9519_v38 = vand.u32 4294901760, %v9468_v32  ;;  %v9520_v59 = vand.u32 4294901760, %v9476_v6  ;;  %vm3972_vm3 = vcmask 130048  }
  0x6b   : > { %6726 = vmatpush3.bf16.msra.mxu1 %v9461_v13  ;;  %904 = vmatprep.mubr.f32.mxu1 %v7797_v36  ;;  %v9511_v25 = vld [vmem:[#allocation23_spill] sm:$0xff] }
  0x6c   : > { %6728 = vmatprep.subr.bf16.mxu1 %v9462_v48  ;;  %6762 = vmatpush3.bf16.msra.mxu0 %v6761_v20  ;;  %v9488_v20 = vld [vmem:[#allocation34_spill] sm:$0xff]  ;;  %v9512_v27 = vand.u32 4294901760, %v9511_v25 }
  0x6d   : > { %6764 = vmatprep.subr.bf16.mxu0 %v6763_v3  ;;  %1106 = vmatmul.mubr.f32.gmra.mrb[6].mxu0 %v9468_v32  ;;  %v9493_v3 = vand.u32 4294901760, %v9492_v44 }
  0x6e   : > { %906 = vmatmul.mubr.f32.gmra.mrb[20].mxu1 %v9467_v12  ;;  %1112 = vmatprep.mubr.f32.mxu0 %v9476_v6 }
  0x6f   : > { %6730 = vmatpush3.bf16.msra.mxu1 %v9469_v7  ;;  %911 = vmatprep.mubr.f32.mxu1 %v9470_v54 }
  0x70   : > { %6732 = vmatprep.subr.bf16.mxu1 %v9471_v62  ;;  %6766 = vmatpush3.bf16.msra.mxu0 %v6765_v24  ;;  %v6777_v24 = vpack.c.bf16 %v9495_v0, %v9493_v3 }
  0x71   : > { %6768 = vmatprep.subr.bf16.mxu0 %v6767_v30  ;;  %1115 = vmatmul.mubr.f32.gmra.mrb[8].mxu0 %v7900_v26  ;;  %v9499_v30 = vld [vmem:[#allocation33_spill] sm:$0xff] }
  0x72   : > { %913 = vmatmul.mubr.f32.gmra.mrb[22].mxu1 %v9479_v16  ;;  %1121 = vmatprep.mubr.f32.mxu0 %v7930_v37 }
  0x73   : > { %6734 = vmatpush3.bf16.msra.mxu1 %v9480_v17  ;;  %918 = vmatprep.mubr.f32.mxu1 %v9481_v18 }
  0x74   : > { %6736 = vmatprep.subr.bf16.mxu1 %v9482_v23  ;;  %6770 = vmatpush3.bf16.msra.mxu0 %v6769_v53  ;;  %v9504_v53 = vand.u32 4294901760, %v7725_v29  ;;  %v9510_v29 = vld [vmem:[#allocation22_spill] sm:$0xff] }
  0x75   : > { %6772 = vmatprep.subr.bf16.mxu0 %v6771_v56  ;;  %1124 = vmatmul.mubr.f32.gmra.mrb[10].mxu0 %v9488_v20  ;;  %v9508_v56 = vld [vmem:[#allocation21_spill] sm:$0xff] }
  0x76   : > { %920 = vmatmul.mubr.f32.gmra.mrb[24].mxu1 %v9487_v35  ;;  %1130 = vmatprep.mubr.f32.mxu0 %v9496_v51  ;;  %v6781_v10 = vpack.c.bf16 %v9504_v53, %v9503_v49 }
  0x77   : > { %6738 = vmatpush3.bf16.msra.mxu1 %v9489_v41  ;;  %925 = vmatprep.mubr.f32.mxu1 %v9490_v46 }
  0x78   : > { %6740 = vmatprep.subr.bf16.mxu1 %v9491_v43  ;;  %6774 = vmatpush3.bf16.msra.mxu0 %v6773_v57  ;;  %v9513_v57 = vand.u32 4294901760, %v7731_v19  ;;  %v9518_v19 = vand.u32 4294901760, %v7850_v45  ;;  %v9523_v45 = vand.u32 4294901760, %v9488_v20 }
  0x79   : > { %6776 = vmatprep.subr.bf16.mxu0 %v6775_v40  ;;  %1133 = vmatmul.mubr.f32.gmra.mrb[12].mxu0 %v7980_v63 }
  0x7a   : > { %927 = vmatmul.mubr.f32.gmra.mrb[26].mxu1 %v9499_v30  ;;  %1139 = vmatprep.mubr.f32.mxu0 %v8010_v60 }
  0x7b   : > { %6742 = vmatpush3.bf16.msra.mxu1 %v9500_v4  ;;  %932 = vmatprep.mubr.f32.mxu1 %v9501_v58 }
  0x7c   : > { %6744 = vmatprep.subr.bf16.mxu1 %v9502_v47  ;;  %6778 = vmatpush3.bf16.msra.mxu0 %v6777_v24 }
  0x7d   : > { %6780 = vmatprep.subr.bf16.mxu0 %v6779_v61  ;;  %1142 = vmatmul.mubr.f32.gmra.mrb[14].mxu0 %v8019_v11 }
  0x7e   : > { %934 = vmatmul.mubr.f32.gmra.mrb[28].mxu1 %v9505_v8  ;;  %1493 = vmatprep.mubr.f32.mxu0 %v7707_v2 }
  0x7f   : > { %6746 = vmatpush3.bf16.msra.mxu1 %v9506_v9  ;;  %939 = vmatprep.mubr.f32.mxu1 %v9507_v42 }
  0x80   : > { %6748 = vmatprep.subr.bf16.mxu1 %v9508_v56  ;;  %6782 = vmatpush3.bf16.msra.mxu0 %v6781_v10 }
  0x82   : > { %941 = vmatmul.mubr.f32.gmra.mrb[30].mxu1 %v9509_v28 }
  0x83   : > { %6750 = vmatpush3.bf16.msra.mxu1 %v9510_v29  ;;  %1246 = vmatprep.mubr.f32.mxu1 %v9512_v27 }
  0x84   : > { %6784 = vmatprep.subr.bf16.mxu1 %v7531_v15  ;;  %1495 = vmatmul.mubr.f32.vlgmr.msra.gmra.mrb[16].mxu0 %v7709_v14  ;;  %v9515_v15 = vand.u32 4294901760, %v7773_v5  ;;  %v9522_v5 = vand.u32 4294901760, %v7930_v37  ;;  %v9526_v37 = vand.u32 4294901760, %v8010_v60 }
  0x85   : > { %1500 = vmatprep.mubr.f32.mxu0 %v7747_v1 }
  0x86   : > { %1250 = vmatmul.mubr.f32.vlgmr.msra.gmra.mrb[32].mxu1 %v9513_v57 }
  0x87   : > { %6786 = vmatpush3.bf16.msra.mxu1 %v7549_v22  ;;  %1257 = vmatprep.mubr.f32.mxu1 %v9514_v33  ;;  %v9517_v22 = vand.u32 4294901760, %v7820_v21  ;;  %v9521_v21 = vand.u32 4294901760, %v7900_v26  ;;  %v9525_v26 = vand.u32 4294901760, %v7980_v63 }
  0x88   : > { %6788 = vmatprep.subr.bf16.mxu1 %v9455_v39  ;;  %1502 = vmatmul.mubr.f32.gmra.mrb[18].mxu0 %v9460_v31  ;;  %v9524_v39 = vand.u32 4294901760, %v9496_v51 }
  0x89   : > { %1507 = vmatprep.mubr.f32.mxu0 %v7797_v36 }
  0x8a   : > { %1261 = vmatmul.mubr.f32.gmra.mrb[34].mxu1 %v9515_v15 }
  0x8b   : > { %6790 = vmatpush3.bf16.msra.mxu1 %v9461_v13  ;;  %1268 = vmatprep.mubr.f32.mxu1 %v9516_v34  ;;  %v9527_v13 = vand.u32 4294901760, %v8019_v11 }
  0x8c   : > { %6792 = vmatprep.subr.bf16.mxu1 %v9462_v48  ;;  %1509 = vmatmul.mubr.f32.gmra.mrb[20].mxu0 %v9467_v12 }
  0x8d   : > { %1514 = vmatprep.mubr.f32.mxu0 %v9470_v54 }
  0x8e   : > { %1272 = vmatmul.mubr.f32.gmra.mrb[36].mxu1 %v9517_v22 }
  0x8f   : > { %6794 = vmatpush3.bf16.msra.mxu1 %v9469_v7  ;;  %1279 = vmatprep.mubr.f32.mxu1 %v9518_v19 }
  0x90   : > { %6796 = vmatprep.subr.bf16.mxu1 %v9471_v62  ;;  %1516 = vmatmul.mubr.f32.gmra.mrb[22].mxu0 %v9479_v16 }
  0x91   : > { %1521 = vmatprep.mubr.f32.mxu0 %v9481_v18 }
  0x92   : > { %1283 = vmatmul.mubr.f32.gmra.mrb[38].mxu1 %v9519_v38 }
  0x93   : > { %6798 = vmatpush3.bf16.msra.mxu1 %v9480_v17  ;;  %1290 = vmatprep.mubr.f32.mxu1 %v9520_v59 }
  0x94   : > { %6800 = vmatprep.subr.bf16.mxu1 %v9482_v23  ;;  %1523 = vmatmul.mubr.f32.gmra.mrb[24].mxu0 %v9487_v35 }
  0x95   : > { %1528 = vmatprep.mubr.f32.mxu0 %v9490_v46 }
  0x96   : > { %1294 = vmatmul.mubr.f32.gmra.mrb[40].mxu1 %v9521_v21 }
  0x97   : > { %6802 = vmatpush3.bf16.msra.mxu1 %v9489_v41  ;;  %1301 = vmatprep.mubr.f32.mxu1 %v9522_v5 }
  0x98   : > { %6804 = vmatprep.subr.bf16.mxu1 %v9491_v43  ;;  %1530 = vmatmul.mubr.f32.gmra.mrb[26].mxu0 %v9499_v30 }
  0x99   : > { %1535 = vmatprep.mubr.f32.mxu0 %v9501_v58 }
  0x9a   : > { %1305 = vmatmul.mubr.f32.gmra.mrb[42].mxu1 %v9523_v45 }
  0x9b   : > { %6806 = vmatpush3.bf16.msra.mxu1 %v9500_v4  ;;  %1312 = vmatprep.mubr.f32.mxu1 %v9524_v39 }
  0x9c   : > { %6808 = vmatprep.subr.bf16.mxu1 %v9502_v47  ;;  %1537 = vmatmul.mubr.f32.gmra.mrb[28].mxu0 %v9505_v8 }
  0x9d   : > { %1542 = vmatprep.mubr.f32.mxu0 %v9507_v42 }
  0x9e   : > { %1316 = vmatmul.mubr.f32.gmra.mrb[44].mxu1 %v9525_v26 }
  0x9f   : > { %6810 = vmatpush3.bf16.msra.mxu1 %v9506_v9  ;;  %1323 = vmatprep.mubr.f32.mxu1 %v9526_v37 }
  0xa0   : > { %6812 = vmatprep.subr.bf16.mxu1 %v9508_v56  ;;  %1544 = vmatmul.mubr.f32.gmra.mrb[30].mxu0 %v9509_v28 }
  0xa2   : > { %1327 = vmatmul.mubr.f32.gmra.mrb[46].mxu1 %v9527_v13 }
  0xa3   : > { %6814 = vmatpush3.bf16.msra.mxu1 %v9510_v29  ;;  %1646 = vmatprep.mubr.f32.mxu1 %v7707_v2  ;;  %v7393_v2 = vmov 0.0|0.0  }
  0xa4   : > { %6815 = vmatprep.subr.bf16.mxu1 %v7393_v2  ;;  %6827 = vmatprep.subr.bf16.mxu0 %v7393_v2 }
  0xa6   : > { %1648 = vmatmul.mubr.f32.vlgmr.msra.gmra.mrb[48].mxu1 %v7709_v14 }
  0xa7   : > { %1653 = vmatprep.mubr.f32.mxu1 %v7747_v1 }
  0xaa   : > { %1655 = vmatmul.mubr.f32.gmra.mrb[50].mxu1 %v9460_v31 }
  0xab   : > { %1660 = vmatprep.mubr.f32.mxu1 %v7797_v36 }
  0xae   : > { %1662 = vmatmul.mubr.f32.gmra.mrb[52].mxu1 %v9467_v12 }
  0xaf   : > { %1667 = vmatprep.mubr.f32.mxu1 %v9470_v54 }
  0xb2   : > { %1669 = vmatmul.mubr.f32.gmra.mrb[54].mxu1 %v9479_v16 }
  0xb3   : > { %1674 = vmatprep.mubr.f32.mxu1 %v9481_v18  ;;  %v7395_v18 = vmov 0.0  }
  0xb4   : > { %6376 = vmatprep.mubr.msk.f32.mxu0 %vm7394_vm0, %v7395_v18 }
  0xb6   : > { %1676 = vmatmul.mubr.f32.gmra.mrb[56].mxu1 %v9487_v35 }
  0xb7   : > { %1681 = vmatprep.mubr.f32.mxu1 %v9490_v46 }
  0xba   : > { %1683 = vmatmul.mubr.f32.gmra.mrb[58].mxu1 %v9499_v30 }
  0xbb   : > { %1688 = vmatprep.mubr.f32.mxu1 %v9501_v58 }
  0xbe   : > { %1690 = vmatmul.mubr.f32.gmra.mrb[60].mxu1 %v9505_v8 }
  0xbf   : > { %1695 = vmatprep.mubr.f32.mxu1 %v9507_v42 }
  0xc2   : > { %1697 = vmatmul.mubr.f32.gmra.mrb[62].mxu1 %v9509_v28 }
  0xc3   : > { %6357 = vmatprep.mubr.msk.f32.mxu1 %vm7394_vm0, %v7395_v18 }
 0x10d   : > { %v5875_v14 = vpop.f32.mrb[0].mxu1 }
 0x10e   : > { %v5876_v1 = vpop.f32.mrb[1].mxu1 }
 0x10f   : > { %v5877_v36 = vadd.f32 %v5876_v1, %v5875_v14 }
 0x111   : > { %v5878_v63 = vpop.f32.mrb[2].mxu1 }
 0x112   : > { %v5879_v60 = vpop.f32.mrb[3].mxu1 }
 0x113   : > { %v5880_v11 = vadd.f32 %v5879_v60, %v5878_v63 }
 0x115   : > { %v5881_v31 = vpop.f32.mrb[4].mxu1 }
 0x116   : > { %v5882_v48 = vpop.f32.mrb[5].mxu1 }
 0x117   : > { %v5883_v12 = vadd.f32 %v5882_v48, %v5881_v31 }
 0x11a   : > { %v5884_v32 = vpop.f32.mrb[6].mxu1 }
 0x11b   : > { %v5885_v7 = vpop.f32.mrb[7].mxu1 }
 0x11c   : > { %v5886_v54 = vadd.f32 %v5885_v7, %v5884_v32 }
 0x121   : > { %v5887_v62 = vpop.f32.mrb[8].mxu1 }
 0x122   : > { %v5888_v6 = vpop.f32.mrb[9].mxu1 }
 0x123   : > { %v5889_v16 = vadd.f32 %v5888_v6, %v5887_v62 }
 0x128   : > { %v5890_v17 = vpop.f32.mrb[10].mxu1 }
 0x129   : > { %v5891_v23 = vpop.f32.mrb[11].mxu1 }
 0x12a   : > { %v5892_v40 = vadd.f32 %v5891_v23, %v5890_v17 }
 0x12e   : > { %v5893_v35 = vpop.f32.mrb[12].mxu1 }
 0x12f   : > { %v5894_v20 = vpop.f32.mrb[13].mxu1 }
 0x130   : > { %v5895_v41 = vadd.f32 %v5894_v20, %v5893_v35 }
 0x134   : > { %v5987_v43 = vpop.f32.mrb[0].mxu0 }
 0x135   : > { %v5896_v46 = vpop.f32.mrb[14].mxu1  ;;  %v5988_v3 = vpop.f32.mrb[1].mxu0 }
 0x136   : > { %v5897_v44 = vpop.f32.mrb[15].mxu1  ;;  %v5989_v0 = vadd.f32 %v5988_v3, %v5987_v43 }
 0x137   : > { %v8242_v50 = vadd.f32 %v5897_v44, %v5896_v46 }
 0x138   : > { %v5990_v51 = vpop.f32.mrb[2].mxu0 }
 0x139   : > { %v5931_v24 = vpop.f32.mrb[16].mxu1  ;;  %v5991_v52 = vpop.f32.mrb[3].mxu0 }
 0x13a   : > { %v5932_v55 = vpop.f32.mrb[17].mxu1  ;;  %v5992_v30 = vadd.f32 %v5991_v52, %v5990_v51 }
 0x13b   : > { %v5933_v61 = vadd.f32 %v5932_v55, %v5931_v24 }
 0x13c   : > { %v5993_v47 = vpop.f32.mrb[4].mxu0 }
 0x13d   : > { %v894_v4 = vadd.f32 %v5933_v61, %v5877_v36  ;;  %v5934_v58 = vpop.f32.mrb[18].mxu1  ;;  %v5994_v53 = vpop.f32.mrb[5].mxu0 }
 0x13e   : > { %v5935_v49 = vpop.f32.mrb[19].mxu1  ;;  %v5995_v9 = vadd.f32 %v5994_v53, %v5993_v47 }
 0x13f   : > { %v1081_v10 = vadd.f32 %v5989_v0, %v894_v4  ;;  %v5936_v8 = vadd.f32 %v5935_v49, %v5934_v58 }
 0x140   : > { %v5996_v28 = vpop.f32.mrb[6].mxu0 }
 0x141   : > { %v901_v42 = vadd.f32 %v5936_v8, %v5880_v11  ;;  %v5937_v56 = vpop.f32.mrb[20].mxu1  ;;  %v5997_v25 = vpop.f32.mrb[7].mxu0 }
 0x142   : > { %v5938_v29 = vpop.f32.mrb[21].mxu1  ;;  %v5998_v33 = vadd.f32 %v5997_v25, %v5996_v28 }
 0x143   : > { %v1090_v27 = vadd.f32 %v5992_v30, %v901_v42  ;;  %v5939_v57 = vadd.f32 %v5938_v29, %v5937_v56 }
 0x144   : > { %v5999_v22 = vpop.f32.mrb[8].mxu0 }
 0x145   : > { %v908_v15 = vadd.f32 %v5939_v57, %v5883_v12  ;;  %v5940_v34 = vpop.f32.mrb[22].mxu1  ;;  %v6000_v38 = vpop.f32.mrb[9].mxu0 }
 0x146   : > { %v5941_v19 = vpop.f32.mrb[23].mxu1  ;;  %v6001_v5 = vadd.f32 %v6000_v38, %v5999_v22 }
 0x147   : > { %v1099_v59 = vadd.f32 %v5995_v9, %v908_v15  ;;  %v5942_v21 = vadd.f32 %v5941_v19, %v5940_v34 }
 0x148   : > { %v6002_v26 = vpop.f32.mrb[10].mxu0 }
 0x149   : > { %v915_v45 = vadd.f32 %v5942_v21, %v5886_v54  ;;  %v5943_v39 = vpop.f32.mrb[24].mxu1  ;;  %v6003_v13 = vpop.f32.mrb[11].mxu0 }
 0x14a   : > { %v5944_v37 = vpop.f32.mrb[25].mxu1  ;;  %v6004_v36 = vadd.f32 %v6003_v13, %v6002_v26 }
 0x14b   : > { %v1108_v14 = vadd.f32 %v5998_v33, %v915_v45  ;;  %v5945_v1 = vadd.f32 %v5944_v37, %v5943_v39 }
 0x14c   : > { %v6005_v11 = vpop.f32.mrb[12].mxu0 }
 0x14d   : > { %v922_v63 = vadd.f32 %v5945_v1, %v5889_v16  ;;  %v5946_v60 = vpop.f32.mrb[26].mxu1  ;;  %v6006_v48 = vpop.f32.mrb[13].mxu0 }
 0x14e   : > { %v5947_v31 = vpop.f32.mrb[27].mxu1  ;;  %v6007_v7 = vadd.f32 %v6006_v48, %v6005_v11 }
 0x14f   : > { %v8244_v12 = vadd.f32 %v6001_v5, %v922_v63  ;;  %v5948_v32 = vadd.f32 %v5947_v31, %v5946_v60  ;;  %v7396_v31 = vmov 0  }
 0x150   : > { %v6008_v17 = vpop.f32.mrb[14].mxu0  ;;  %7247 = vset.pattern.permute.xlu0 %v7396_v31  ;;  %7248 = vset.pattern.permute.xlu1 %v7396_v31 }
 0x151   : > { %v929_v62 = vadd.f32 %v5948_v32, %v5892_v40  ;;  %v5949_v6 = vpop.f32.mrb[28].mxu1  ;;  %v6009_v23 = vpop.f32.mrb[15].mxu0 }
 0x152   : > { %v5950_v54 = vpop.f32.mrb[29].mxu1  ;;  %v6010_v46 = vadd.f32 %v6009_v23, %v6008_v17 }
 0x153   : > { %v8246_v35 = vadd.f32 %v6004_v36, %v929_v62  ;;  %v5951_v20 = vadd.f32 %v5950_v54, %v5949_v6 }
 0x155   : > { %v936_v43 = vadd.f32 %v5951_v20, %v5895_v41  ;;  %v5952_v44 = vpop.f32.mrb[30].mxu1 }
 0x156   : > { %v5953_v16 = vpop.f32.mrb[31].mxu1 }
 0x157   : > { %v8248_v3 = vadd.f32 %v6007_v7, %v936_v43  ;;  %v5954_v0 = vadd.f32 %v5953_v16, %v5952_v44  ;;  %v6099_v24 = vpop.f32.mrb[16].mxu0 }
 0x158   : > { %v6100_v51 = vpop.f32.mrb[17].mxu0 }
 0x159   : > { %v943_v55 = vadd.f32 %v5954_v0, %v8242_v50  ;;  %v6043_v52 = vpop.f32.mrb[32].mxu1  ;;  %v6101_v40 = vadd.f32 %v6100_v51, %v6099_v24 }
 0x15a   : > { %v6044_v61 = vpop.f32.mrb[33].mxu1 }
 0x15b   : > { %v8251_v30 = vadd.f32 %v6010_v46, %v943_v55  ;;  %v6045_v4 = vadd.f32 %v6044_v61, %v6043_v52  ;;  %v6102_v58 = vpop.f32.mrb[18].mxu0 }
 0x15c   : > { %v6103_v47 = vpop.f32.mrb[19].mxu0 }
 0x15d   : > { %v1252_v49 = vadd.f32 %v6045_v4, %v1081_v10  ;;  %v6046_v53 = vpop.f32.mrb[34].mxu1  ;;  %v6104_v41 = vadd.f32 %v6103_v47, %v6102_v58 }
 0x15e   : > { %v6047_v8 = vpop.f32.mrb[35].mxu1 }
 0x15f   : > { %v1497_v9 = vadd.f32 %v6101_v40, %v1252_v49  ;;  %v6048_v42 = vadd.f32 %v6047_v8, %v6046_v53  ;;  %v6105_v56 = vpop.f32.mrb[20].mxu0 }
 0x160   : > { %v6106_v28 = vpop.f32.mrb[21].mxu0 }
 0x161   : > { %v1263_v29 = vadd.f32 %v6048_v42, %v1090_v27  ;;  %v6049_v25 = vpop.f32.mrb[36].mxu1  ;;  %v6107_v57 = vadd.f32 %v6106_v28, %v6105_v56  ;;  %v399_v27 = vld [vmem:[%s9289_s5] sm:$0xff] }
 0x162   : > { %v6050_v50 = vpop.f32.mrb[37].mxu1  ;;  %1704 = vperm.xlu0 %7247, %v399_v27  }
 0x163   : > { %v1504_v33 = vadd.f32 %v6104_v41, %v1263_v29  ;;  %v6051_v15 = vadd.f32 %v6050_v50, %v6049_v25  ;;  %v6108_v34 = vpop.f32.mrb[22].mxu0 }
 0x164   : > { %v6109_v22 = vpop.f32.mrb[23].mxu0 }
 0x165   : > { %v1274_v19 = vadd.f32 %v6051_v15, %v1099_v59  ;;  %v6052_v38 = vpop.f32.mrb[38].mxu1  ;;  %v6110_v21 = vadd.f32 %v6109_v22, %v6108_v34 }
 0x166   : > { %v6053_v5 = vpop.f32.mrb[39].mxu1 }
 0x167   : > { %v1511_v10 = vadd.f32 %v6107_v57, %v1274_v19  ;;  %v6054_v45 = vadd.f32 %v6053_v5, %v6052_v38  ;;  %v6111_v39 = vpop.f32.mrb[24].mxu0 }
 0x168   : > { %v6112_v26 = vpop.f32.mrb[25].mxu0 }
 0x169   : > { %v1285_v37 = vadd.f32 %v6054_v45, %v1108_v14  ;;  %v6055_v13 = vpop.f32.mrb[40].mxu1  ;;  %v6113_v1 = vadd.f32 %v6112_v26, %v6111_v39 }
 0x16a   : > { %v6056_v36 = vpop.f32.mrb[41].mxu1 }
 0x16b   : > { %v1518_v63 = vadd.f32 %v6110_v21, %v1285_v37  ;;  %v6057_v60 = vadd.f32 %v6056_v36, %v6055_v13  ;;  %v6114_v11 = vpop.f32.mrb[26].mxu0 }
 0x16c   : > { %v6115_v59 = vpop.f32.mrb[27].mxu0 }
 0x16d   : > { %v1296_v48 = vadd.f32 %v6057_v60, %v8244_v12  ;;  %v6058_v32 = vpop.f32.mrb[42].mxu1  ;;  %v6116_v7 = vadd.f32 %v6115_v59, %v6114_v11 }
 0x16e   : > { %v6059_v14 = vpop.f32.mrb[43].mxu1 }
 0x16f   : > { %v1525_v62 = vadd.f32 %v6113_v1, %v1296_v48  ;;  %v6060_v6 = vadd.f32 %v6059_v14, %v6058_v32  ;;  %v6117_v17 = vpop.f32.mrb[28].mxu0 }
 0x170   : > { %v6118_v54 = vpop.f32.mrb[29].mxu0 }
 0x171   : > { %v1307_v23 = vadd.f32 %v6060_v6, %v8246_v35  ;;  %v6061_v20 = vpop.f32.mrb[44].mxu1  ;;  %v6119_v46 = vadd.f32 %v6118_v54, %v6117_v17 }
 0x172   : > { %v6062_v43 = vpop.f32.mrb[45].mxu1 }
 0x173   : > { %v8258_v44 = vadd.f32 %v6116_v7, %v1307_v23  ;;  %v6063_v16 = vadd.f32 %v6062_v43, %v6061_v20  ;;  %v6120_v0 = vpop.f32.mrb[30].mxu0 }
 0x174   : > { %v6121_v24 = vpop.f32.mrb[31].mxu0 }
 0x175   : > { %v1318_v51 = vadd.f32 %v6063_v16, %v8248_v3  ;;  %v6064_v12 = vpop.f32.mrb[46].mxu1  ;;  %v6122_v55 = vadd.f32 %v6121_v24, %v6120_v0 }
 0x176   : > { %v6065_v52 = vpop.f32.mrb[47].mxu1 }
 0x177   : > { %v8261_v40 = vadd.f32 %v6119_v46, %v1318_v51  ;;  %v6066_v61 = vadd.f32 %v6065_v52, %v6064_v12 }
 0x179   : > { %v1329_v4 = vadd.f32 %v6066_v61, %v8251_v30  ;;  %v6155_v58 = vpop.f32.mrb[48].mxu1 }
 0x17a   : > { %v6156_v35 = vpop.f32.mrb[49].mxu1 }
 0x17b   : > { %v8264_v47 = vadd.f32 %v6122_v55, %v1329_v4  ;;  %v6157_v49 = vadd.f32 %v6156_v35, %v6155_v58 }
 0x17d   : > { %v1650_v53 = vadd.f32 %v6157_v49, %v1497_v9  ;;  %v6158_v41 = vpop.f32.mrb[50].mxu1 }
 0x17e   : > { %v6159_v8 = vpop.f32.mrb[51].mxu1 }
 0x17f   : > { %v1712_v42 = vand.u32 4294901760, %v1650_v53  ;;  %v6160_v56 = vadd.f32 %v6159_v8, %v6158_v41 }
 0x181   : > { %v8266_v28 = vsub.f32 %v1650_v53, %v1712_v42  ;;  %v1657_v3 = vadd.f32 %v6160_v56, %v1504_v33  ;;  %v6161_v29 = vpop.f32.mrb[52].mxu1 }
 0x182   : > { %v6162_v25 = vpop.f32.mrb[53].mxu1 }
 0x183   : > { %v1715_v57 = vand.u32 4294901760, %v1657_v3  ;;  %v6163_v50 = vadd.f32 %v6162_v25, %v6161_v29  ;;  %v1797_v15 = vand.u32 4294901760, %v8266_v28 }
 0x185   : > { %v8269_v30 = vpack.c.bf16 %v1715_v57, %v1712_v42  ;;  %v8271_v34 = vsub.f32 %v1657_v3, %v1715_v57  ;;  %v1664_v22 = vadd.f32 %v6163_v50, %v1511_v10  ;;  %v6164_v19 = vpop.f32.mrb[54].mxu1  ;;  %v1798_v33 = vsub.f32 %v8266_v28, %v1797_v15 }
 0x186   : > { %v6165_v9 = vpop.f32.mrb[55].mxu1 }
 0x187   : > { %v1804_v38 = vand.u32 4294901760, %v8271_v34  ;;  %v1718_v21 = vand.u32 4294901760, %v1664_v22  ;;  %v6166_v5 = vadd.f32 %v6165_v9, %v6164_v19  ;;  %6817 = vmatpush3.bf16.msra.mxu1 %v8269_v30  ;;  %v6840_v45 = vpack.c.bf16 %v8271_v34, %v8266_v28  ;;  %v400_v28 = vld [vmem:[%s9290_s6] sm:$0xff] }
 0x188   : > { %6818 = vmatprep.subr.bf16.mxu1 %v7393_v2  ;;  %v1799_v31 = vand.u32 4294901760, %v1798_v33 }
 0x189   : > { %v1805_v39 = vsub.f32 %v8271_v34, %v1804_v38  ;;  %v8280_v26 = vsub.f32 %v1664_v22, %v1718_v21  ;;  %v1671_v10 = vadd.f32 %v6166_v5, %v1518_v63  ;;  %v6167_v37 = vpop.f32.mrb[56].mxu1  ;;  %v8282_v13 = vpack.c.bf16 %v1804_v38, %v1797_v15  ;;  %v398_v63 = vld [vmem:[%s9288_s4] sm:$0xff] }
 0x18a   : > { %v6168_v1 = vpop.f32.mrb[57].mxu1 }
 0x18b   : > { %v1721_v36 = vand.u32 4294901760, %v1671_v10  ;;  %v6169_v27 = vadd.f32 %v6168_v1, %v6167_v37  ;;  %v1806_v60 = vand.u32 4294901760, %v1805_v39  ;;  %v1811_v11 = vand.u32 4294901760, %v8280_v26 }
 0x18d   : > { %v8285_v59 = vpack.c.bf16 %v1721_v36, %v1718_v21  ;;  %v8287_v48 = vsub.f32 %v1671_v10, %v1721_v36  ;;  %v1678_v32 = vadd.f32 %v6169_v27, %v1525_v62  ;;  %v6170_v7 = vpop.f32.mrb[58].mxu1  ;;  %v6828_v6 = vpack.c.bf16 %v1806_v60, %v1799_v31 }
 0x18e   : > { %v6171_v14 = vpop.f32.mrb[59].mxu1  ;;  %v1812_v20 = vsub.f32 %v8280_v26, %v1811_v11  ;;  %v1709_v62 = vsel %vm1707_vm1, %v398_v63, 0 }
 0x18f   : > { %v1818_v17 = vand.u32 4294901760, %v8287_v48  ;;  %v1724_v54 = vand.u32 4294901760, %v1678_v32  ;;  %v6172_v23 = vadd.f32 %v6171_v14, %v6170_v7  ;;  %6820 = vmatpush3.bf16.msra.mxu1 %v8285_v59  ;;  %6829 = vmatpush3.bf16.msra.mxu0 %v6828_v6  ;;  %v6843_v46 = vpack.c.bf16 %v8287_v48, %v8280_v26  ;;  %v401_v14 = vld [vmem:[%s9290_s6 + $0x8] sm:$0xff]  ;;  %v402_v6 = vld [vmem:[%s9290_s6 + $0x10] sm:$0xff] }
 0x190   : > { %6821 = vmatprep.subr.bf16.mxu1 %v7393_v2  ;;  %6830 = vmatprep.subr.bf16.mxu0 %v7393_v2  ;;  %v1813_v58 = vand.u32 4294901760, %v1812_v20  ;;  %v8303_v35 = vand.u32 4294901760, %v1709_v62 }
 0x191   : > { %v1819_v43 = vsub.f32 %v8287_v48, %v1818_v17  ;;  %v1824_v16 = vsub.f32 %v1678_v32, %v1724_v54  ;;  %v1685_v0 = vadd.f32 %v6172_v23, %v8258_v44  ;;  %v6173_v24 = vpop.f32.mrb[60].mxu1  ;;  %v8301_v51 = vpack.c.bf16 %v1818_v17, %v1811_v11  ;;  %v416_v17 = vld [vmem:[%s9292_s8] sm:$0xff] }
 0x192   : > { %v6174_v12 = vpop.f32.mrb[61].mxu1  ;;  %v1785_v56 = vsub.f32 %v1709_v62, %v8303_v35  ;;  %v3154_v23 = vsel %vm2289_vm2, %v416_v17, 0  ;;  %v2297_v62 = vsel %vm2289_vm2, %v402_v6, 0 }
 0x193   : > { %v1825_v55 = vand.u32 4294901760, %v1824_v16  ;;  %v1727_v52 = vand.u32 4294901760, %v1685_v0  ;;  %v6175_v61 = vadd.f32 %v6174_v12, %v6173_v24  ;;  %v1820_v4 = vand.u32 4294901760, %v1819_v43 }
 0x194   : > { %v1786_v15 = vand.u32 4294901760, %v1785_v56  ;;  %v8376_v20 = vand.u32 4294901760, %v3154_v23  ;;  %v8390_v24 = vand.u32 4294901760, %v2297_v62 }
 0x195   : > { %v8305_v49 = vpack.c.bf16 %v1727_v52, %v1724_v54  ;;  %v1831_v53 = vsub.f32 %v1685_v0, %v1727_v52  ;;  %v1692_v41 = vadd.f32 %v6175_v61, %v8261_v40  ;;  %v6176_v8 = vpop.f32.mrb[62].mxu1  ;;  %v6831_v42 = vpack.c.bf16 %v1820_v4, %v1813_v58  ;;  %v405_v52 = vld [vmem:[%s9290_s6 + $0x28] sm:$0xff]  ;;  %v406_v4 = vld [vmem:[%s9290_s6 + $0x30] sm:$0xff] }
 0x196   : > { %v6177_v44 = vpop.f32.mrb[63].mxu1  ;;  %v1826_v3 = vsub.f32 %v1824_v16, %v1825_v55  ;;  %v1787_v38 = vsub.f32 %v1785_v56, %v1786_v15  ;;  %v2294_v54 = vsel %vm2289_vm2, %v401_v14, 0  ;;  %v8388_v0 = vsub.f32 %v3154_v23, %v8376_v20  ;;  %v410_v14 = vld [vmem:[%s9291_s7 + $0x10] sm:$0xff] }
 0x197   : > { %v1832_v29 = vand.u32 4294901760, %v1831_v53  ;;  %v1730_v25 = vand.u32 4294901760, %v1692_v41  ;;  %v6178_v57 = vadd.f32 %v6177_v44, %v6176_v8  ;;  %6823 = vmatpush3.bf16.msra.mxu1 %v8305_v49  ;;  %6832 = vmatpush3.bf16.msra.mxu0 %v6831_v42  ;;  %v6846_v50 = vpack.c.bf16 %v1831_v53, %v1824_v16  ;;  %v404_v16 = vld [vmem:[%s9290_s6 + $0x20] sm:$0xff] }
 0x198   : > { %6824 = vmatprep.subr.bf16.mxu1 %v7393_v2  ;;  %6833 = vmatprep.subr.bf16.mxu0 %v7393_v2  ;;  %v1827_v33 = vand.u32 4294901760, %v1826_v3  ;;  %v1788_v1 = vand.u32 4294901760, %v1787_v38  ;;  %v8382_v43 = vand.u32 4294901760, %v2294_v54  ;;  %v3245_v12 = vand.u32 4294901760, %v8388_v0 }
 0x199   : > { %v1833_v22 = vsub.f32 %v1831_v53, %v1832_v29  ;;  %v1838_v19 = vsub.f32 %v1692_v41, %v1730_v25  ;;  %v1699_v40 = vadd.f32 %v6178_v57, %v8264_v47  ;;  %v6870_v9 = vpack.c.bf16 %v1832_v29, %v1825_v55 }
 0x19a   : > { %v2303_v55 = vsel %vm2289_vm2, %v404_v16, 0  ;;  %v8399_v61 = vsub.f32 %v2294_v54, %v8382_v43  ;;  %v3246_v58 = vsub.f32 %v8388_v0, %v3245_v12  ;;  %v8410_v53 = vsub.f32 %v2297_v62, %v8390_v24  ;;  %v411_v16 = vld [vmem:[%s9291_s7 + $0x18] sm:$0xff] }
 0x19b   : > { %v1839_v21 = vand.u32 4294901760, %v1838_v19  ;;  %v1733_v5 = vand.u32 4294901760, %v1699_v40  ;;  %v1834_v39 = vand.u32 4294901760, %v1833_v22  ;;  %v8412_v41 = vand.u32 4294901760, %v2303_v55 }
 0x19c   : > { %v2306_v8 = vsel %vm2289_vm2, %v405_v52, 0  ;;  %v3247_v44 = vand.u32 4294901760, %v3246_v58  ;;  %v2309_v42 = vsel %vm2289_vm2, %v406_v4, 0  ;;  %v2392_v3 = vand.u32 4294901760, %v8399_v61  ;;  %v412_v52 = vld [vmem:[%s9291_s7 + $0x20] sm:$0xff]  ;;  %v413_v4 = vld [vmem:[%s9291_s7 + $0x28] sm:$0xff] }
 0x19d   : > { %v6825_v26 = vpack.c.bf16 %v1733_v5, %v1730_v25  ;;  %v1845_v10 = vsub.f32 %v1699_v40, %v1733_v5  ;;  %v6834_v37 = vpack.c.bf16 %v1834_v39, %v1827_v33  ;;  %v1840_v36 = vsub.f32 %v1838_v19, %v1839_v21  ;;  %v414_v58 = vld [vmem:[%s9291_s7 + $0x30] sm:$0xff] }
 0x19e   : > { %v8423_v57 = vand.u32 4294901760, %v2306_v8  ;;  %v8429_v22 = vand.u32 4294901760, %v2309_v42 }
 0x19f   : > { %v1846_v27 = vand.u32 4294901760, %v1845_v10  ;;  %6826 = vmatpush3.bf16.msra.mxu1 %v6825_v26  ;;  %6835 = vmatpush3.bf16.msra.mxu0 %v6834_v37  ;;  %v6849_v60 = vpack.c.bf16 %v1845_v10, %v1838_v19  ;;  %v1841_v31 = vand.u32 4294901760, %v1840_v36 }
 0x1a0   : > { %6836 = vmatprep.subr.bf16.mxu0 %v7393_v2  ;;  %v8437_v33 = vsub.f32 %v2306_v8, %v8423_v57  ;;  %v8446_v37 = vsub.f32 %v2309_v42, %v8429_v22  ;;  %v408_v8 = vld [vmem:[%s9291_s7] sm:$0xff] }
 0x1a1   : > { %v1847_v47 = vsub.f32 %v1845_v10, %v1846_v27  ;;  %v6873_v11 = vpack.c.bf16 %v1846_v27, %v1839_v21  ;;  %2251 = vperm.xlu1 %7248, %v408_v8  }
 0x1a2   : > { %6358 = vmatmul.mubr.f32.vlgmr.msra.gmra.mrb[64].mxu1 %v1788_v1 }
 0x1a3   : > { %v1848_v48 = vand.u32 4294901760, %v1847_v47  ;;  %v2432_v47 = vand.u32 4294901760, %v8437_v33 }
 0x1a5   : > { %v6837_v32 = vpack.c.bf16 %v1848_v48, %v1841_v31  ;;  %v409_v31 = vld [vmem:[%s9291_s7 + $0x8] sm:$0xff] }
 0x1a7   : > { %6838 = vmatpush3.bf16.msra.mxu0 %v6837_v32 }
 0x1a8   : > { %6839 = vmatprep.subr.bf16.mxu0 %v7393_v2 }
 0x1aa   : > { %6377 = vmatmul.mubr.f32.vlgmr.msra.gmra.mrb[32].mxu0 %v8303_v35 }
 0x1ab   : > { %6841 = vmatpush3.bf16.msra.mxu0 %v6840_v45  ;;  %6395 = vmatprep.mubr.msk.f32.mxu0 %vm7394_vm0, %v7395_v18 }
 0x1ac   : > { %6842 = vmatprep.subr.bf16.mxu0 %v7393_v2 }
 0x1af   : > { %6844 = vmatpush3.bf16.msra.mxu0 %v6843_v46  ;;  %v403_v46 = vld [vmem:[%s9290_s6 + $0x18] sm:$0xff] }
 0x1b0   : > { %6845 = vmatprep.subr.bf16.mxu0 %v7393_v2 }
 0x1b3   : > { %6847 = vmatpush3.bf16.msra.mxu0 %v6846_v50  ;;  %v2402_v50 = vand.u32 4294901760, %v8410_v53 }
 0x1b4   : > { %6848 = vmatprep.subr.bf16.mxu0 %v7393_v2 }
 0x1b7   : > { %6850 = vmatpush3.bf16.msra.mxu0 %v6849_v60 }
 0x1b8   : > { %6851 = vmatprep.subr.bf16.mxu0 %v7393_v2 }
 0x1ba   : > { %6396 = vmatmul.mubr.f32.vlgmr.msra.gmra.mrb[32].mxu0 %v1785_v56  ;;  %v407_v56 = vld [vmem:[%s9290_s6 + $0x38] sm:$0xff] }
 0x1bb   : > { %6853 = vmatpush3.bf16.msra.mxu0 %v8269_v30  ;;  %6414 = vmatprep.mubr.msk.f32.mxu0 %vm7394_vm0, %v7395_v18  ;;  %v2312_v19 = vsel %vm2289_vm2, %v407_v56, 0  ;;  %v420_v56 = vld [vmem:[%s9292_s8 + $0x20] sm:$0xff] }
 0x1bc   : > { %6854 = vmatprep.subr.bf16.mxu0 %v7393_v2  ;;  %v8439_v39 = vand.u32 4294901760, %v2312_v19 }
 0x1bf   : > { %6856 = vmatpush3.bf16.msra.mxu0 %v8285_v59 }
 0x1c0   : > { %6857 = vmatprep.subr.bf16.mxu0 %v7393_v2 }
 0x1c3   : > { %6859 = vmatpush3.bf16.msra.mxu0 %v8305_v49 }
 0x1c4   : > { %6860 = vmatprep.subr.bf16.mxu0 %v7393_v2 }
 0x1c7   : > { %6862 = vmatpush3.bf16.msra.mxu0 %v6825_v26 }
 0x1c8   : > { %6863 = vmatprep.subr.bf16.mxu0 %v7393_v2 }
 0x1ca   : > { %6415 = vmatmul.mubr.f32.vlgmr.msra.gmra.mrb[32].mxu0 %v1786_v15  ;;  %v8427_v15 = vsub.f32 %v2303_v55, %v8412_v41 }
 0x1cb   : > { %6865 = vmatpush3.bf16.msra.mxu0 %v8282_v13  ;;  %6433 = vmatprep.mubr.msk.f32.mxu0 %vm7394_vm0, %v7395_v18 }
 0x1cc   : > { %6866 = vmatprep.subr.bf16.mxu0 %v7393_v2  ;;  %v2422_v10 = vand.u32 4294901760, %v8427_v15 }
 0x1ce   : > { %v2423_v32 = vsub.f32 %v8427_v15, %v2422_v10 }
 0x1cf   : > { %6868 = vmatpush3.bf16.msra.mxu0 %v8301_v51  ;;  %v2300_v51 = vsel %vm2289_vm2, %v403_v46, 0 }
 0x1d0   : > { %6869 = vmatprep.subr.bf16.mxu0 %v7393_v2  ;;  %v2424_v6 = vand.u32 4294901760, %v2423_v32 }
 0x1d3   : > { %6871 = vmatpush3.bf16.msra.mxu0 %v6870_v9  ;;  %v2393_v9 = vsub.f32 %v8399_v61, %v2392_v3 }
 0x1d4   : > { %6872 = vmatprep.subr.bf16.mxu0 %v7393_v2 }
 0x1d5   : > { %v2394_v36 = vand.u32 4294901760, %v2393_v9 }
 0x1d7   : > { %6874 = vmatpush3.bf16.msra.mxu0 %v6873_v11  ;;  %v8455_v11 = vsub.f32 %v2312_v19, %v8439_v39 }
 0x1d8   : > { %6875 = vmatprep.subr.bf16.mxu0 %v7393_v2 }
 0x1da   : > { %6434 = vmatmul.mubr.f32.vlgmr.msra.gmra.mrb[32].mxu0 %v8303_v35 }
 0x1db   : > { %6877 = vmatpush3.bf16.msra.mxu0 %v8269_v30  ;;  %6452 = vmatprep.mubr.msk.f32.mxu0 %vm7394_vm0, %v7395_v18  ;;  %v2291_v30 = vsel %vm2289_vm2, %v400_v28, 0  ;;  %v2442_v28 = vand.u32 4294901760, %v8446_v37 }
 0x1dc   : > { %6878 = vmatprep.subr.bf16.mxu0 %v7393_v2  ;;  %v8356_v34 = vand.u32 4294901760, %v2291_v30 }
 0x1dd   : > { %v2443_v17 = vsub.f32 %v8446_v37, %v2442_v28 }
 0x1de   : > { %v8359_v45 = vsub.f32 %v2291_v30, %v8356_v34 }
 0x1df   : > { %6880 = vmatpush3.bf16.msra.mxu0 %v8285_v59 }
 0x1e0   : > { %6881 = vmatprep.subr.bf16.mxu0 %v7393_v2  ;;  %v2382_v13 = vand.u32 4294901760, %v8359_v45 }
 0x1e3   : > { %6883 = vmatpush3.bf16.msra.mxu0 %v8305_v49  ;;  %v1705_v49 = vpop.permute.xlu0 %1704 }
 0x1e4   : > { %6884 = vmatprep.subr.bf16.mxu0 %v7393_v2  ;;  %v2383_v2 = vsub.f32 %v8359_v45, %v2382_v13 }
 0x1e6   : > { %v2384_v59 = vand.u32 4294901760, %v2383_v2 }
 0x1e7   : > { %6886 = vmatpush3.bf16.msra.mxu0 %v6825_v26  ;;  %v2403_v26 = vsub.f32 %v8410_v53, %v2402_v50 }
 0x1e8   : > { %6457 = vmatprep.mubr.f32.mxu1 %v2384_v59 }
 0x1e9   : > { %v2404_v48 = vand.u32 4294901760, %v2403_v26 }
 0x1ea   : > { %6453 = vmatmul.mubr.f32.vlgmr.msra.gmra.mrb[32].mxu0 %v8303_v35  ;;  %v8407_v35 = vand.u32 4294901760, %v2300_v51 }
 0x1eb   : > { %6541 = vmatprep.mubr.f32.mxu0 %v3247_v44  ;;  %v428_v44 = vld [vmem:[%s9293_s9 + $0x20] sm:$0xff] }
 0x1ec   : > { %v8421_v25 = vsub.f32 %v2300_v51, %v8407_v35  ;;  %v2444_v51 = vand.u32 4294901760, %v2443_v17 }
 0x1ee   : > { %v2412_v5 = vand.u32 4294901760, %v8421_v25 }
 0x1f0   : > { %v2413_v60 = vsub.f32 %v8421_v25, %v2412_v5 }
 0x1f2   : > { %v2414_v2 = vand.u32 4294901760, %v2413_v60  ;;  %v431_v60 = vld [vmem:[%s9293_s9 + $0x38] sm:$0xff] }
 0x275   : > { %v1790_v7 = vpop.f32.mrb[64].mxu1 }
 0x276   : > { %v6359_v63 = vpop.f32.mrb[65].mxu1  ;;  %v1791_v29 = vadd.f32 %v1790_v7, %v1705_v49  ;;  %v2433_v7 = vsub.f32 %v8437_v33, %v2432_v47  ;;  %v415_v49 = vld [vmem:[%s9291_s7 + $0x38] sm:$0xff] }
 0x277   : > { %v2452_v63 = vand.u32 4294901760, %v8455_v11 }
 0x278   : > { %v2434_v62 = vand.u32 4294901760, %v2433_v7 }
 0x279   : > { %v2453_v46 = vsub.f32 %v8455_v11, %v2452_v63 }
 0x27b   : > { %v2454_v55 = vand.u32 4294901760, %v2453_v46 }
 0x2bd   : > { %v2244_v40 = vpop.f32.mrb[32].mxu0 }
 0x2be   : > { %v6936_v38 = vadd.f32 %v2244_v40, %v1791_v29  ;;  %v6454_v21 = vpop.f32.mrb[33].mxu0 }
 0x2c0   : > { %v2248_v1 = vmax.f32 %v6936_v38, 0.0 }
 0x2c2   : > { %v8448_v27 = vand.u32 4294901760, %v2248_v1  ;;  %3150 = vrot.lane.b32.xlu0 %v2248_v1, %s7397_s12  ;;  %s9234_s12 = scalar_lea.hbm %s9294_s10, %s5842_s27  ;;  %s7335_s27 = scalar_lea.vmem %s7334_s25, 4096 }
 0x2c3   : > { %p7337_p1 = scmp.lt.s32.totalorder %s7335_s27, %s7329_s20 }
 0x2c4   : > { %v2462_v30 = vsub.f32 %v2248_v1, %v8448_v27  ;;  %6455 = vmatprep.subr.mxu1 %v8448_v27 }
 0x2c5   : > { %6456 = vmatpush3.msra.mxu1 %v8448_v27  ;;  %p7338_p2 = por %p7337_p1, %p7336_p0 }
 0x2c6   : > { %2256 = vperm.xlu0 %7247, %v409_v31   ;;  %6458 = vmatmul.mubr.f32.vlgmr.msra.gmra.mrb[66].mxu1 %v2394_v36  ;;  %v2463_v59 = vand.u32 4294901760, %v2462_v30 }
 0x2c7   : > { %6460 = vmatprep.mubr.f32.mxu1 %v2404_v48  ;;  %p7339_p3 = pnand %p7338_p2, %p7332_p13 }
 0x2c8   : > { %v2464_v54 = vsub.f32 %v2462_v30, %v2463_v59 }
 0x2ca   : > { %2261 = vperm.xlu0 %7247, %v410_v14   ;;  %6461 = vmatmul.mubr.f32.gmra.mrb[68].mxu1 %v2414_v2  ;;  %v2465_v23 = vand.u32 4294901760, %v2464_v54 }
 0x2cb   : > { %6463 = vmatprep.mubr.f32.mxu1 %v2424_v6 }
 0x2cc   : > { %6469 = vmatprep.subr.mxu1 %v2465_v23 }
 0x2cd   : > { %6470 = vmatpush3.msra.mxu1 %v2465_v23 }
 0x2ce   : > { %2266 = vperm.xlu0 %7247, %v411_v16   ;;  %6464 = vmatmul.mubr.f32.gmra.mrb[70].mxu1 %v2434_v62 }
 0x2cf   : > { %6483 = vmatprep.subr.mxu1 %v2462_v30  ;;  %6466 = vmatprep.mubr.f32.mxu1 %v2444_v51 }
 0x2d2   : > { %2271 = vperm.xlu0 %7247, %v412_v52   ;;  %6467 = vmatmul.mubr.f32.gmra.mrb[72].mxu1 %v2454_v55 }
 0x2d3   : > { %6471 = vmatprep.mubr.f32.mxu1 %v8356_v34 }
 0x2d6   : > { %2276 = vperm.xlu0 %7247, %v413_v4   ;;  %6472 = vmatmul.mubr.f32.vlgmr.msra.gmra.mrb[66].mxu1 %v8382_v43 }
 0x2d7   : > { %6484 = vmatpush3.msra.mxu1 %v2462_v30  ;;  %6474 = vmatprep.mubr.f32.mxu1 %v8390_v24 }
 0x2d8   : > { %6497 = vmatprep.subr.mxu1 %v8448_v27 }
 0x2da   : > { %2281 = vperm.xlu0 %7247, %v414_v58   ;;  %6475 = vmatmul.mubr.f32.gmra.mrb[68].mxu1 %v8407_v35 }
 0x2db   : > { %6477 = vmatprep.mubr.f32.mxu1 %v8412_v41 }
 0x2de   : > { %2286 = vperm.xlu0 %7247, %v415_v49   ;;  %6478 = vmatmul.mubr.f32.gmra.mrb[70].mxu1 %v8423_v57 }
 0x2df   : > { %6480 = vmatprep.mubr.f32.mxu1 %v8429_v22 }
 0x2e2   : > { %6481 = vmatmul.mubr.f32.gmra.mrb[72].mxu1 %v8439_v39 }
 0x2e3   : > { %6485 = vmatprep.mubr.f32.mxu1 %v8359_v45  ;;  %v424_v45 = vld [vmem:[%s9293_s9] sm:$0xff] }
 0x2e4   : > { %3111 = vperm.xlu1 %7248, %v424_v45  }
 0x2e6   : > { %6486 = vmatmul.mubr.f32.vlgmr.msra.gmra.mrb[66].mxu1 %v8399_v61  ;;  %v418_v61 = vld [vmem:[%s9292_s8 + $0x10] sm:$0xff] }
 0x2e7   : > { %6498 = vmatpush3.msra.mxu1 %v8448_v27  ;;  %6488 = vmatprep.mubr.f32.mxu1 %v8410_v53  ;;  %v3160_v53 = vsel %vm2289_vm2, %v418_v61, 0 }
 0x2e8   : > { %6511 = vmatprep.subr.mxu1 %v2463_v59 }
 0x2ea   : > { %6489 = vmatmul.mubr.f32.gmra.mrb[68].mxu1 %v8421_v25  ;;  %v3166_v25 = vsel %vm2289_vm2, %v420_v56, 0 }
 0x2eb   : > { %6491 = vmatprep.mubr.f32.mxu1 %v8427_v15  ;;  %v8599_v9 = vand.u32 4294901760, %v3166_v25 }
 0x2ed   : > { %v8617_v1 = vsub.f32 %v3166_v25, %v8599_v9 }
 0x2ee   : > { %6492 = vmatmul.mubr.f32.gmra.mrb[70].mxu1 %v8437_v33  ;;  %v430_v33 = vld [vmem:[%s9293_s9 + $0x30] sm:$0xff] }
 0x2ef   : > { %6494 = vmatprep.mubr.f32.mxu1 %v8446_v37 }
 0x2f2   : > { %6495 = vmatmul.mubr.f32.gmra.mrb[72].mxu1 %v8455_v11 }
 0x2f3   : > { %6499 = vmatprep.mubr.f32.mxu1 %v2382_v13  ;;  %v425_v13 = vld [vmem:[%s9293_s9 + $0x8] sm:$0xff] }
 0x2f4   : > { %3116 = vperm.xlu1 %7248, %v425_v13  }
 0x2f6   : > { %6500 = vmatmul.mubr.f32.vlgmr.msra.gmra.mrb[66].mxu1 %v2392_v3  ;;  %v8578_v3 = vand.u32 4294901760, %v3160_v53 }
 0x2f7   : > { %6512 = vmatpush3.msra.mxu1 %v2463_v59  ;;  %6502 = vmatprep.mubr.f32.mxu1 %v2402_v50  ;;  %v429_v50 = vld [vmem:[%s9293_s9 + $0x28] sm:$0xff] }
 0x2f8   : > { %6525 = vmatprep.subr.mxu1 %v8448_v27  ;;  %v8597_v40 = vsub.f32 %v3160_v53, %v8578_v3 }
 0x2fa   : > { %6503 = vmatmul.mubr.f32.gmra.mrb[68].mxu1 %v2412_v5  ;;  %v423_v5 = vld [vmem:[%s9292_s8 + $0x38] sm:$0xff]  ;;  %v3265_v37 = vand.u32 4294901760, %v8597_v40 }
 0x2fb   : > { %6505 = vmatprep.mubr.f32.mxu1 %v2422_v10 }
 0x2fc   : > { %v3266_v32 = vsub.f32 %v8597_v40, %v3265_v37 }
 0x2fe   : > { %6506 = vmatmul.mubr.f32.gmra.mrb[70].mxu1 %v2432_v47  ;;  %v3267_v17 = vand.u32 4294901760, %v3266_v32 }
 0x2ff   : > { %6508 = vmatprep.mubr.f32.mxu1 %v2442_v28  ;;  %v3285_v28 = vand.u32 4294901760, %v8617_v1 }
 0x301   : > { %v3286_v54 = vsub.f32 %v8617_v1, %v3285_v28 }
 0x302   : > { %6509 = vmatmul.mubr.f32.gmra.mrb[72].mxu1 %v2452_v63 }
 0x303   : > { %6513 = vmatprep.mubr.f32.mxu1 %v8356_v34  ;;  %v3287_v52 = vand.u32 4294901760, %v3286_v54 }
 0x306   : > { %6514 = vmatmul.mubr.f32.vlgmr.msra.gmra.mrb[66].mxu1 %v8382_v43 }
 0x307   : > { %6526 = vmatpush3.msra.mxu1 %v8448_v27  ;;  %6516 = vmatprep.mubr.f32.mxu1 %v8390_v24  ;;  %v3175_v27 = vsel %vm2289_vm2, %v423_v5, 0 }
 0x308   : > { %v8632_v48 = vand.u32 4294901760, %v3175_v27 }
 0x30a   : > { %6517 = vmatmul.mubr.f32.gmra.mrb[68].mxu1 %v8407_v35  ;;  %v3314_v6 = vsub.f32 %v3175_v27, %v8632_v48 }
 0x30b   : > { %6519 = vmatprep.mubr.f32.mxu1 %v8412_v41 }
 0x30c   : > { %v3315_v55 = vand.u32 4294901760, %v3314_v6 }
 0x30e   : > { %6520 = vmatmul.mubr.f32.gmra.mrb[70].mxu1 %v8423_v57  ;;  %v3316_v45 = vsub.f32 %v3314_v6, %v3315_v55 }
 0x30f   : > { %6522 = vmatprep.mubr.f32.mxu1 %v8429_v22 }
 0x312   : > { %6523 = vmatmul.mubr.f32.gmra.mrb[72].mxu1 %v8439_v39 }
 0x313   : > { %6527 = vmatprep.mubr.f32.mxu1 %v8356_v34  ;;  %v426_v34 = vld [vmem:[%s9293_s9 + $0x10] sm:$0xff] }
 0x314   : > { %3121 = vperm.xlu1 %7248, %v426_v34   ;;  %v3317_v34 = vand.u32 4294901760, %v3316_v45 }
 0x316   : > { %6528 = vmatmul.mubr.f32.vlgmr.msra.gmra.mrb[66].mxu1 %v8382_v43  ;;  %v417_v43 = vld [vmem:[%s9292_s8 + $0x8] sm:$0xff] }
 0x317   : > { %6530 = vmatprep.mubr.f32.mxu1 %v8390_v24  ;;  %v427_v24 = vld [vmem:[%s9293_s9 + $0x18] sm:$0xff] }
 0x318   : > { %3126 = vperm.xlu1 %7248, %v427_v24  }
 0x31a   : > { %6531 = vmatmul.mubr.f32.gmra.mrb[68].mxu1 %v8407_v35  ;;  %v3157_v35 = vsel %vm2289_vm2, %v417_v43, 0  ;;  %v390_v43 = vld [vmem:[%s9286_s2] sm:$0xff] }
 0x31b   : > { %6533 = vmatprep.mubr.f32.mxu1 %v8412_v41  ;;  %v419_v41 = vld [vmem:[%s9292_s8 + $0x18] sm:$0xff]  ;;  %v8573_v42 = vand.u32 4294901760, %v3157_v35 }
 0x31c   : > { %v3163_v29 = vsel %vm2289_vm2, %v419_v41, 0  ;;  %3131 = vperm.xlu1 %7248, %v428_v44  }
 0x31d   : > { %v8589_v15 = vsub.f32 %v3157_v35, %v8573_v42  ;;  %v8594_v19 = vand.u32 4294901760, %v3163_v29  ;;  %v3999_v35 = vand.u32 4294901760, %v390_v43 }
 0x31e   : > { %6534 = vmatmul.mubr.f32.gmra.mrb[70].mxu1 %v8423_v57  ;;  %v421_v57 = vld [vmem:[%s9292_s8 + $0x28] sm:$0xff] }
 0x31f   : > { %6536 = vmatprep.mubr.f32.mxu1 %v8429_v22  ;;  %v422_v22 = vld [vmem:[%s9292_s8 + $0x30] sm:$0xff]  ;;  %v3169_v38 = vsel %vm2289_vm2, %v421_v57, 0  ;;  %v8611_v26 = vsub.f32 %v3163_v29, %v8594_v19  ;;  %v8708_v44 = vsub.f32 %v390_v43, %v3999_v35 }
 0x320   : > { %3136 = vperm.xlu1 %7248, %v429_v50   ;;  %v3172_v21 = vsel %vm2289_vm2, %v422_v22, 0  ;;  %v8613_v10 = vand.u32 4294901760, %v3169_v38 }
 0x321   : > { %v8619_v36 = vand.u32 4294901760, %v3172_v21  ;;  %v3275_v11 = vand.u32 4294901760, %v8611_v26  ;;  %v4162_v50 = vand.u32 4294901760, %v8708_v44 }
 0x322   : > { %6537 = vmatmul.mubr.f32.gmra.mrb[72].mxu1 %v8439_v39  ;;  %v3255_v39 = vand.u32 4294901760, %v8589_v15  ;;  %v8630_v31 = vsub.f32 %v3169_v38, %v8613_v10 }
 0x323   : > { %4065 = vmatprep.mubr.f32.mxu1 %v7395_v18  ;;  %v8639_v30 = vsub.f32 %v3172_v21, %v8619_v36  ;;  %v3276_v63 = vsub.f32 %v8611_v26, %v3275_v11 }
 0x324   : > { %3141 = vperm.xlu1 %7248, %v430_v33   ;;  %v3256_v47 = vsub.f32 %v8589_v15, %v3255_v39  ;;  %v3295_v14 = vand.u32 4294901760, %v8630_v31 }
 0x325   : > { %v3305_v23 = vand.u32 4294901760, %v8639_v30  ;;  %v3277_v46 = vand.u32 4294901760, %v3276_v63 }
 0x326   : > { %v3257_v59 = vand.u32 4294901760, %v3256_v47  ;;  %v3296_v51 = vsub.f32 %v8630_v31, %v3295_v14  ;;  %v2252_v47 = vpop.permute.xlu1 %2251 }
 0x327   : > { %v3306_v4 = vsub.f32 %v8639_v30, %v3305_v23 }
 0x328   : > { %3146 = vperm.xlu1 %7248, %v431_v60   ;;  %v3297_v8 = vand.u32 4294901760, %v3296_v51 }
 0x329   : > { %v3307_v13 = vand.u32 4294901760, %v3306_v4 }
 0x334   : > { %v3151_v2 = vpop.permute.xlu0 %3150 }
 0x335   : > { %v8641_v7 = vand.u32 4294901760, %v3151_v2 }
 0x337   : > { %v3325_v62 = vsub.f32 %v3151_v2, %v8641_v7  ;;  %6539 = vmatprep.subr.mxu0 %v8641_v7 }
 0x338   : > { %6540 = vmatpush3.msra.mxu0 %v8641_v7 }
 0x339   : > { %6542 = vmatmul.mubr.f32.vlgmr.msra.gmra.mrb[34].mxu0 %v3257_v59  ;;  %v3326_v16 = vand.u32 4294901760, %v3325_v62 }
 0x33a   : > { %6544 = vmatprep.mubr.f32.mxu0 %v3267_v17 }
 0x33b   : > { %v3327_v58 = vsub.f32 %v3325_v62, %v3326_v16 }
 0x33d   : > { %6545 = vmatmul.mubr.f32.gmra.mrb[36].mxu0 %v3277_v46  ;;  %v3328_v49 = vand.u32 4294901760, %v3327_v58 }
 0x33e   : > { %6547 = vmatprep.mubr.f32.mxu0 %v3287_v52 }
 0x33f   : > { %6553 = vmatprep.subr.mxu0 %v3328_v49 }
 0x340   : > { %6554 = vmatpush3.msra.mxu0 %v3328_v49 }
 0x341   : > { %6548 = vmatmul.mubr.f32.gmra.mrb[38].mxu0 %v3297_v8  ;;  %6567 = vmatprep.subr.mxu0 %v3325_v62 }
 0x342   : > { %6550 = vmatprep.mubr.f32.mxu0 %v3307_v13 }
 0x345   : > { %6551 = vmatmul.mubr.f32.gmra.mrb[40].mxu0 %v3317_v34 }
 0x346   : > { %6555 = vmatprep.mubr.f32.mxu0 %v8376_v20 }
 0x349   : > { %6556 = vmatmul.mubr.f32.vlgmr.msra.gmra.mrb[34].mxu0 %v8573_v42 }
 0x34a   : > { %6568 = vmatpush3.msra.mxu0 %v3325_v62  ;;  %6558 = vmatprep.mubr.f32.mxu0 %v8578_v3 }
 0x34b   : > { %6581 = vmatprep.subr.mxu0 %v8641_v7 }
 0x34d   : > { %6559 = vmatmul.mubr.f32.gmra.mrb[36].mxu0 %v8594_v19 }
 0x34e   : > { %6561 = vmatprep.mubr.f32.mxu0 %v8599_v9 }
 0x351   : > { %6562 = vmatmul.mubr.f32.gmra.mrb[38].mxu0 %v8613_v10 }
 0x352   : > { %6564 = vmatprep.mubr.f32.mxu0 %v8619_v36 }
 0x355   : > { %6565 = vmatmul.mubr.f32.gmra.mrb[40].mxu0 %v8632_v48 }
 0x356   : > { %6569 = vmatprep.mubr.f32.mxu0 %v8388_v0  ;;  %v391_v0 = vld [vmem:[%s9286_s2 + $0x8] sm:$0xff] }
 0x357   : > { %v3997_v24 = vand.u32 4294901760, %v391_v0 }
 0x359   : > { %6570 = vmatmul.mubr.f32.vlgmr.msra.gmra.mrb[34].mxu0 %v8589_v15 }
 0x35a   : > { %6582 = vmatpush3.msra.mxu0 %v8641_v7  ;;  %6572 = vmatprep.mubr.f32.mxu0 %v8597_v40  ;;  %v4163_v40 = vsub.f32 %v8708_v44, %v4162_v50 }
 0x35b   : > { %6595 = vmatprep.subr.mxu0 %v3326_v16 }
 0x35c   : > { %v4164_v5 = vand.u32 4294901760, %v4163_v40 }
 0x35d   : > { %6573 = vmatmul.mubr.f32.gmra.mrb[36].mxu0 %v8611_v26 }
 0x35e   : > { %6575 = vmatprep.mubr.f32.mxu0 %v8617_v1  ;;  %v2257_v1 = vpop.permute.xlu0 %2256 }
 0x361   : > { %6576 = vmatmul.mubr.f32.gmra.mrb[38].mxu0 %v8630_v31 }
 0x362   : > { %6578 = vmatprep.mubr.f32.mxu0 %v8639_v30 }
 0x365   : > { %6579 = vmatmul.mubr.f32.gmra.mrb[40].mxu0 %v3314_v6 }
 0x366   : > { %6583 = vmatprep.mubr.f32.mxu0 %v3245_v12  ;;  %v393_v12 = vld [vmem:[%s9286_s2 + $0x18] sm:$0xff] }
 0x367   : > { %v4001_v61 = vand.u32 4294901760, %v393_v12 }
 0x369   : > { %6584 = vmatmul.mubr.f32.vlgmr.msra.gmra.mrb[34].mxu0 %v3255_v39  ;;  %v8706_v41 = vpack.c.bf16 %v4001_v61, %v3997_v24  ;;  %v8723_v29 = vsub.f32 %v393_v12, %v4001_v61 }
 0x36a   : > { %6596 = vmatpush3.msra.mxu0 %v3326_v16  ;;  %6586 = vmatprep.mubr.f32.mxu0 %v3265_v37 }
 0x36b   : > { %6609 = vmatprep.subr.mxu0 %v8641_v7  ;;  %6888 = vmatprep.subr.bf16.mxu1 %v8706_v41  ;;  %v4168_v57 = vand.u32 4294901760, %v8723_v29 }
 0x36d   : > { %6587 = vmatmul.mubr.f32.gmra.mrb[36].mxu0 %v3275_v11 }
 0x36e   : > { %6589 = vmatprep.mubr.f32.mxu0 %v3285_v28 }
 0x371   : > { %6590 = vmatmul.mubr.f32.gmra.mrb[38].mxu0 %v3295_v14 }
 0x372   : > { %6592 = vmatprep.mubr.f32.mxu0 %v3305_v23 }
 0x375   : > { %6593 = vmatmul.mubr.f32.gmra.mrb[40].mxu0 %v3315_v55 }
 0x376   : > { %6597 = vmatprep.mubr.f32.mxu0 %v8376_v20 }
 0x379   : > { %6598 = vmatmul.mubr.f32.vlgmr.msra.gmra.mrb[34].mxu0 %v8573_v42 }
 0x37a   : > { %6610 = vmatpush3.msra.mxu0 %v8641_v7  ;;  %6600 = vmatprep.mubr.f32.mxu0 %v8578_v3 }
 0x37d   : > { %6601 = vmatmul.mubr.f32.gmra.mrb[36].mxu0 %v8594_v19 }
 0x37e   : > { %6603 = vmatprep.mubr.f32.mxu0 %v8599_v9 }
 0x381   : > { %6604 = vmatmul.mubr.f32.gmra.mrb[38].mxu0 %v8613_v10 }
 0x382   : > { %6606 = vmatprep.mubr.f32.mxu0 %v8619_v36 }
 0x385   : > { %6607 = vmatmul.mubr.f32.gmra.mrb[40].mxu0 %v8632_v48 }
 0x386   : > { %6611 = vmatprep.mubr.f32.mxu0 %v8376_v20  ;;  %v392_v20 = vld [vmem:[%s9286_s2 + $0x10] sm:$0xff] }
 0x387   : > { %v4003_v53 = vand.u32 4294901760, %v392_v20 }
 0x389   : > { %6612 = vmatmul.mubr.f32.vlgmr.msra.gmra.mrb[34].mxu0 %v8573_v42  ;;  %v8711_v42 = vpack.c.bf16 %v4003_v53, %v3999_v35  ;;  %v8713_v56 = vsub.f32 %v392_v20, %v4003_v53  ;;  %v395_v35 = vld [vmem:[%s9287_s3 + $0x8] sm:$0xff]  ;;  %v397_v53 = vld [vmem:[%s9287_s3 + $0x18] sm:$0xff] }
 0x38a   : > { %6614 = vmatprep.mubr.f32.mxu0 %v8578_v3  ;;  %v8721_v3 = vsub.f32 %v391_v0, %v3997_v24  ;;  %v4855_v40 = vand.u32 4294901760, %v395_v35 }
 0x38b   : > { %6890 = vmatpush1.bf16.msra.mxu1 %v8711_v42  ;;  %v4174_v15 = vand.u32 4294901760, %v8713_v56  ;;  %v6897_v37 = vpack.c.bf16 %v8713_v56, %v8708_v44 }
 0x38c   : > { %v4156_v25 = vand.u32 4294901760, %v8721_v3 }
 0x38d   : > { %6615 = vmatmul.mubr.f32.gmra.mrb[36].mxu0 %v8594_v19  ;;  %v4169_v19 = vsub.f32 %v8723_v29, %v4168_v57 }
 0x38e   : > { %6617 = vmatprep.mubr.f32.mxu0 %v8599_v9  ;;  %v4157_v22 = vsub.f32 %v8721_v3, %v4156_v25  ;;  %v4175_v9 = vsub.f32 %v8713_v56, %v4174_v15 }
 0x38f   : > { %v4170_v21 = vand.u32 4294901760, %v4169_v19 }
 0x390   : > { %v4158_v38 = vand.u32 4294901760, %v4157_v22  ;;  %v4176_v33 = vand.u32 4294901760, %v4175_v9  ;;  %v394_v22 = vld [vmem:[%s9287_s3] sm:$0xff]  ;;  %v4859_v9 = vand.u32 4294901760, %v397_v53 }
 0x391   : > { %6618 = vmatmul.mubr.f32.gmra.mrb[38].mxu0 %v8613_v10  ;;  %v6895_v10 = vpack.c.bf16 %v8723_v29, %v8721_v3 }
 0x392   : > { %6620 = vmatprep.mubr.f32.mxu0 %v8619_v36  ;;  %v6891_v39 = vpack.c.bf16 %v4170_v21, %v4158_v38  ;;  %v8741_v26 = vpack.c.bf16 %v4176_v33, %v4164_v5  ;;  %v2262_v36 = vpop.permute.xlu0 %2261  ;;  %v396_v38 = vld [vmem:[%s9287_s3 + $0x10] sm:$0xff]  ;;  %v4857_v21 = vand.u32 4294901760, %v394_v22 }
 0x393   : > { %v4861_v5 = vand.u32 4294901760, %v396_v38 }
 0x394   : > { %6892 = vmatprep.subr.bf16.mxu1 %v6891_v39  ;;  %v8759_v39 = vpack.c.bf16 %v4859_v9, %v4855_v40 }
 0x395   : > { %6621 = vmatmul.mubr.f32.gmra.mrb[40].mxu0 %v8632_v48 }
 0x396   : > { %4923 = vmatprep.mubr.f32.mxu0 %v7395_v18  ;;  %v2267_v27 = vpop.permute.xlu0 %2266  ;;  %6912 = vmatprep.subr.bf16.mxu0 %v8759_v39 }
 0x39a   : > { %v2272_v60 = vpop.permute.xlu0 %2271 }
 0x39e   : > { %v2277_v11 = vpop.permute.xlu0 %2276 }
 0x3a2   : > { %v2282_v14 = vpop.permute.xlu0 %2281 }
 0x3a6   : > { %v2287_v55 = vpop.permute.xlu0 %2286 }
 0x3e9   : > { %v6529_v31 = vpop.f32.mrb[66].mxu1 }
 0x3ea   : > { %v6937_v48 = vadd.f32 %v6529_v31, %v2257_v1  ;;  %v3015_v32 = vpop.f32.mrb[67].mxu1 }
 0x3eb   : > { %v6938_v28 = vadd.f32 %v3015_v32, %v2252_v47  ;;  %v8765_v47 = vsub.f32 %v396_v38, %v4861_v5 }
 0x3ec   : > { %v5821_v30 = vmul.f32 -1.442695, %v6937_v48 }
 0x3ed   : > { %v5820_v2 = vmul.f32 -1.442695, %v6938_v28  ;;  %v6532_v59 = vpop.f32.mrb[68].mxu1 }
 0x3ee   : > { %7249 = vpow2.f32 %v5821_v30  ;;  %v6939_v7 = vadd.f32 %v6532_v59, %v2267_v27  ;;  %v3027_v63 = vpop.f32.mrb[69].mxu1  ;;  %v8761_v27 = vpack.c.bf16 %v4861_v5, %v4857_v21  ;;  %v8770_v30 = vsub.f32 %v395_v35, %v4855_v40 }
 0x3ef   : > { %7251 = vpow2.f32 %v5820_v2  ;;  %v6940_v6 = vadd.f32 %v3027_v63, %v2262_v36  ;;  %v8775_v63 = vsub.f32 %v397_v53, %v4859_v9 }
 0x3f0   : > { %v5823_v17 = vmul.f32 -1.442695, %v6939_v7  ;;  %6914 = vmatpush1.bf16.msra.mxu0 %v8761_v27 }
 0x3f1   : > { %v5822_v54 = vmul.f32 -1.442695, %v6940_v6  ;;  %v6535_v23 = vpop.f32.mrb[70].mxu1 }
 0x3f2   : > { %7253 = vpow2.f32 %v5823_v17  ;;  %v6941_v62 = vadd.f32 %v6535_v23, %v2277_v11  ;;  %v3039_v46 = vpop.f32.mrb[71].mxu1 }
 0x3f3   : > { %7255 = vpow2.f32 %v5822_v54  ;;  %v6942_v16 = vadd.f32 %v3039_v46, %v2272_v60  ;;  %v8763_v60 = vsub.f32 %v394_v22, %v4857_v21 }
 0x3f4   : > { %v5825_v51 = vmul.f32 -1.442695, %v6941_v62 }
 0x3f5   : > { %v5824_v52 = vmul.f32 -1.442695, %v6942_v16  ;;  %v6538_v4 = vpop.f32.mrb[72].mxu1 }
 0x3f6   : > { %7257 = vpow2.f32 %v5825_v51  ;;  %v6943_v58 = vadd.f32 %v6538_v4, %v2287_v55  ;;  %v3051_v49 = vpop.f32.mrb[73].mxu1  ;;  %v5014_v51 = vand.u32 4294901760, %v8770_v30 }
 0x3f7   : > { %7259 = vpow2.f32 %v5824_v52  ;;  %v6944_v8 = vadd.f32 %v3051_v49, %v2282_v14 }
 0x3f8   : > { %v7250_v45 = vpop.eup %7249  ;;  %v5827_v13 = vmul.f32 -1.442695, %v6943_v58  ;;  %v5026_v58 = vand.u32 4294901760, %v8775_v63 }
 0x3f9   : > { %v7252_v34 = vpop.eup %7251  ;;  %v3086_v0 = vadd.f32 1.0, %v7250_v45  ;;  %v5826_v12 = vmul.f32 -1.442695, %v6944_v8  ;;  %v5015_v45 = vsub.f32 %v8770_v30, %v5014_v51 }
 0x3fa   : > { %v3085_v43 = vadd.f32 1.0, %v7252_v34  ;;  %7261 = vpow2.f32 %v5827_v13  ;;  %v5027_v34 = vsub.f32 %v8775_v63, %v5026_v58 }
 0x3fb   : > { %7263 = vrcp.f32 %v3086_v0  ;;  %v5020_v0 = vand.u32 4294901760, %v8763_v60 }
 0x3fc   : > { %v7254_v24 = vpop.eup %7253  ;;  %7265 = vrcp.f32 %v3085_v43  ;;  %v5028_v38 = vand.u32 4294901760, %v5027_v34 }
 0x3fd   : > { %v7256_v61 = vpop.eup %7255  ;;  %v3088_v20 = vadd.f32 1.0, %v7254_v24  ;;  %7267 = vpow2.f32 %v5826_v12  ;;  %v5032_v12 = vand.u32 4294901760, %v8765_v47  ;;  %v5021_v5 = vsub.f32 %v8763_v60, %v5020_v0 }
 0x3fe   : > { %v3087_v19 = vadd.f32 1.0, %v7256_v61 }
 0x3ff   : > { %7269 = vrcp.f32 %v3088_v20  ;;  %v5016_v20 = vand.u32 4294901760, %v5015_v45 }
 0x400   : > { %v7258_v33 = vpop.eup %7257  ;;  %7271 = vrcp.f32 %v3087_v19 }
 0x401   : > { %v7260_v1 = vpop.eup %7259  ;;  %v3090_v36 = vadd.f32 1.0, %v7258_v33  ;;  %v5033_v33 = vsub.f32 %v8765_v47, %v5032_v12 }
 0x402   : > { %v3089_v11 = vadd.f32 1.0, %v7260_v1  ;;  %v6915_v1 = vpack.c.bf16 %v5028_v38, %v5016_v20 }
 0x403   : > { %7273 = vrcp.f32 %v3090_v36 }
 0x404   : > { %v7262_v31 = vpop.eup %7261  ;;  %7275 = vrcp.f32 %v3089_v11  ;;  %6916 = vmatprep.subr.bf16.mxu0 %v6915_v1 }
 0x405   : > { %v7264_v48 = vpop.eup %7263  ;;  %v3092_v6 = vadd.f32 1.0, %v7262_v31  ;;  %v5022_v31 = vand.u32 4294901760, %v5021_v5 }
 0x406   : > { %v7266_v32 = vpop.eup %7265  ;;  %v3977_v28 = vsel %vm3972_vm3, %v7264_v48, 0 }
 0x407   : > { %v7268_v2 = vpop.eup %7267  ;;  %v3974_v59 = vsel %vm3972_vm3, %v7266_v32, 0  ;;  %v8773_v7 = vand.u32 4294901760, %v3977_v28 }
 0x408   : > { %v8777_v14 = vand.u32 4294901760, %v3974_v59  ;;  %v3091_v17 = vadd.f32 1.0, %v7268_v2 }
 0x409   : > { %v7270_v54 = vpop.eup %7269  ;;  %v8780_v23 = vsub.f32 %v3977_v28, %v8773_v7 }
 0x40a   : > { %v7272_v62 = vpop.eup %7271  ;;  %v8783_v46 = vsub.f32 %v3974_v59, %v8777_v14  ;;  %7277 = vrcp.f32 %v3091_v17  ;;  %v3983_v16 = vsel %vm3972_vm3, %v7270_v54, 0  ;;  %v5034_v59 = vand.u32 4294901760, %v5033_v33 }
 0x40b   : > { %v4079_v55 = vand.u32 4294901760, %v8780_v23  ;;  %v3980_v52 = vsel %vm3972_vm3, %v7272_v62, 0  ;;  %v8789_v4 = vand.u32 4294901760, %v3983_v16  ;;  %7279 = vrcp.f32 %v3092_v6 }
 0x40c   : > { %v4068_v49 = vand.u32 4294901760, %v8783_v46  ;;  %v8793_v8 = vand.u32 4294901760, %v3980_v52  ;;  %v8841_v17 = vpack.c.bf16 %v5034_v59, %v5022_v31  ;;  %v6919_v31 = vpack.c.bf16 %v8775_v63, %v8770_v30  ;;  %v3112_v59 = vpop.permute.xlu1 %3111 }
 0x40d   : > { %v7274_v13 = vpop.eup %7273  ;;  %v4080_v35 = vsub.f32 %v8780_v23, %v4079_v55  ;;  %v8813_v53 = vsub.f32 %v3983_v16, %v8789_v4  ;;  %v6929_v30 = vpack.c.bf16 %v5032_v12, %v5020_v0 }
 0x40e   : > { %v7276_v43 = vpop.eup %7275  ;;  %v4069_v24 = vsub.f32 %v8783_v46, %v4068_v49  ;;  %v8807_v61 = vsub.f32 %v3980_v52, %v8793_v8  ;;  %v3989_v21 = vsel %vm3972_vm3, %v7274_v13, 0 }
 0x40f   : > { %v3986_v22 = vsel %vm3972_vm3, %v7276_v43, 0  ;;  %v4081_v36 = vand.u32 4294901760, %v4080_v35  ;;  %v4101_v11 = vand.u32 4294901760, %v8813_v53  ;;  %v8835_v2 = vand.u32 4294901760, %v3989_v21 }
 0x410   : > { %v4070_v19 = vand.u32 4294901760, %v4069_v24  ;;  %v4090_v40 = vand.u32 4294901760, %v8807_v61  ;;  %v8817_v9 = vand.u32 4294901760, %v3986_v22 }
 0x411   : > { %v4102_v54 = vsub.f32 %v8813_v53, %v4101_v11  ;;  %v8849_v52 = vsub.f32 %v3989_v21, %v8835_v2 }
 0x412   : > { %4071 = vmatmul.mubr.f32.vlgmr.msra.gmra.mrb[74].mxu1 %v4070_v19  ;;  %v4091_v32 = vsub.f32 %v8807_v61, %v4090_v40  ;;  %v8833_v28 = vsub.f32 %v3986_v22, %v8817_v9 }
 0x413   : > { %4076 = vmatprep.mubr.f32.mxu1 %v7395_v18  ;;  %6894 = vmatpush1.bf16.msra.mxu1 %v8741_v26  ;;  %v4103_v13 = vand.u32 4294901760, %v4102_v54  ;;  %v4123_v43 = vand.u32 4294901760, %v8849_v52  ;;  %v6903_v54 = vpack.c.bf16 %v4168_v57, %v4156_v25 }
 0x414   : > { %v7278_v48 = vpop.eup %7277  ;;  %6896 = vmatprep.subr.bf16.mxu1 %v6895_v10  ;;  %v4092_v62 = vand.u32 4294901760, %v4091_v32  ;;  %v4112_v16 = vand.u32 4294901760, %v8833_v28 }
 0x415   : > { %v3992_v6 = vsel %vm3972_vm3, %v7278_v48, 0  ;;  %v7280_v26 = vpop.eup %7279  ;;  %v4124_v22 = vsub.f32 %v8849_v52, %v4123_v43  ;;  %v6921_v48 = vpack.c.bf16 %v8765_v47, %v8763_v60 }
 0x416   : > { %4082 = vmatmul.mubr.f32.gmra.mrb[76].mxu1 %v4081_v36  ;;  %v8851_v10 = vand.u32 4294901760, %v3992_v6  ;;  %v3995_v45 = vsel %vm3972_vm3, %v7280_v26, 0  ;;  %v4113_v34 = vsub.f32 %v8833_v28, %v4112_v16 }
 0x417   : > { %4087 = vmatprep.mubr.f32.mxu1 %v7395_v18  ;;  %v8862_v20 = vand.u32 4294901760, %v3995_v45  ;;  %v4125_v21 = vand.u32 4294901760, %v4124_v22 }
 0x418   : > { %v8860_v24 = vsub.f32 %v3992_v6, %v8851_v10  ;;  %v4114_v35 = vand.u32 4294901760, %v4113_v34 }
 0x419   : > { %v8870_v38 = vsub.f32 %v3995_v45, %v8862_v20 }
 0x41a   : > { %4093 = vmatmul.mubr.f32.gmra.mrb[78].mxu1 %v4092_v62  ;;  %v4134_v19 = vand.u32 4294901760, %v8860_v24 }
 0x41b   : > { %4098 = vmatprep.mubr.f32.mxu1 %v7395_v18  ;;  %v4145_v33 = vand.u32 4294901760, %v8870_v38 }
 0x41c   : > { %v4135_v5 = vsub.f32 %v8860_v24, %v4134_v19 }
 0x41d   : > { %v4146_v36 = vsub.f32 %v8870_v38, %v4145_v33 }
 0x41e   : > { %4104 = vmatmul.mubr.f32.gmra.mrb[80].mxu1 %v4103_v13  ;;  %v4136_v1 = vand.u32 4294901760, %v4135_v5 }
 0x41f   : > { %4109 = vmatprep.mubr.f32.mxu1 %v7395_v18  ;;  %v4147_v32 = vand.u32 4294901760, %v4146_v36 }
 0x422   : > { %4115 = vmatmul.mubr.f32.gmra.mrb[82].mxu1 %v4114_v35 }
 0x423   : > { %4120 = vmatprep.mubr.f32.mxu1 %v7395_v18 }
 0x426   : > { %4126 = vmatmul.mubr.f32.gmra.mrb[84].mxu1 %v4125_v21 }
 0x427   : > { %4131 = vmatprep.mubr.f32.mxu1 %v7395_v18 }
 0x42a   : > { %4137 = vmatmul.mubr.f32.gmra.mrb[86].mxu1 %v4136_v1 }
 0x42b   : > { %4142 = vmatprep.mubr.f32.mxu1 %v7395_v18 }
 0x42e   : > { %4148 = vmatmul.mubr.f32.gmra.mrb[88].mxu1 %v4147_v32 }
 0x42f   : > { %4238 = vmatprep.mubr.f32.mxu1 %v7395_v18 }
 0x432   : > { %4240 = vmatmul.mubr.f32.vlgmr.msra.gmra.mrb[74].mxu1 %v8777_v14 }
 0x433   : > { %4245 = vmatprep.mubr.f32.mxu1 %v7395_v18  ;;  %6898 = vmatpush1.bf16.msra.mxu1 %v6897_v37  ;;  %v3117_v37 = vpop.permute.xlu1 %3116 }
 0x434   : > { %6900 = vmatprep.subr.bf16.mxu1 %v8706_v41 }
 0x436   : > { %4247 = vmatmul.mubr.f32.gmra.mrb[76].mxu1 %v8773_v7 }
 0x437   : > { %4252 = vmatprep.mubr.f32.mxu1 %v7395_v18  ;;  %v3122_v6 = vpop.permute.xlu1 %3121 }
 0x43a   : > { %4254 = vmatmul.mubr.f32.gmra.mrb[78].mxu1 %v8793_v8 }
 0x43b   : > { %4259 = vmatprep.mubr.f32.mxu1 %v7395_v18  ;;  %v3127_v26 = vpop.permute.xlu1 %3126 }
 0x43e   : > { %4261 = vmatmul.mubr.f32.gmra.mrb[80].mxu1 %v8789_v4 }
 0x43f   : > { %4266 = vmatprep.mubr.f32.mxu1 %v7395_v18  ;;  %v3132_v62 = vpop.permute.xlu1 %3131 }
 0x442   : > { %4268 = vmatmul.mubr.f32.gmra.mrb[82].mxu1 %v8817_v9 }
 0x443   : > { %4273 = vmatprep.mubr.f32.mxu1 %v7395_v18  ;;  %v3137_v3 = vpop.permute.xlu1 %3136 }
 0x446   : > { %4275 = vmatmul.mubr.f32.gmra.mrb[84].mxu1 %v8835_v2 }
 0x447   : > { %4280 = vmatprep.mubr.f32.mxu1 %v7395_v18  ;;  %v3142_v5 = vpop.permute.xlu1 %3141 }
 0x44a   : > { %4282 = vmatmul.mubr.f32.gmra.mrb[86].mxu1 %v8851_v10 }
 0x44b   : > { %4287 = vmatprep.mubr.f32.mxu1 %v7395_v18 }
 0x44e   : > { %4289 = vmatmul.mubr.f32.gmra.mrb[88].mxu1 %v8862_v20 }
 0x44f   : > { %4367 = vmatprep.mubr.f32.mxu1 %v7395_v18 }
 0x452   : > { %4370 = vmatmul.mubr.f32.vlgmr.msra.gmra.mrb[74].mxu1 %v8783_v46 }
 0x453   : > { %4375 = vmatprep.mubr.f32.mxu1 %v7395_v18  ;;  %6902 = vmatpush1.bf16.msra.mxu1 %v8711_v42 }
 0x454   : > { %6904 = vmatprep.subr.bf16.mxu1 %v6903_v54 }
 0x456   : > { %4378 = vmatmul.mubr.f32.gmra.mrb[76].mxu1 %v8780_v23 }
 0x457   : > { %4383 = vmatprep.mubr.f32.mxu1 %v7395_v18 }
 0x45a   : > { %4386 = vmatmul.mubr.f32.gmra.mrb[78].mxu1 %v8807_v61 }
 0x45b   : > { %4391 = vmatprep.mubr.f32.mxu1 %v7395_v18 }
 0x45c   : > { %v6613_v45 = vpop.f32.mrb[34].mxu0 }
 0x45d   : > { %v6945_v29 = vadd.f32 %v6613_v45, %v3117_v37  ;;  %v3878_v25 = vpop.f32.mrb[35].mxu0 }
 0x45e   : > { %v6946_v57 = vadd.f32 %v3878_v25, %v3112_v59  ;;  %4394 = vmatmul.mubr.f32.gmra.mrb[80].mxu1 %v8813_v53 }
 0x45f   : > { %v5829_v13 = vmul.f32 -1.442695, %v6945_v29  ;;  %4399 = vmatprep.mubr.f32.mxu1 %v7395_v18 }
 0x460   : > { %v5828_v34 = vmul.f32 -1.442695, %v6946_v57  ;;  %v6616_v35 = vpop.f32.mrb[36].mxu0 }
 0x461   : > { %7281 = vpow2.f32 %v5829_v13  ;;  %v6947_v22 = vadd.f32 %v6616_v35, %v3127_v26  ;;  %v3890_v21 = vpop.f32.mrb[37].mxu0  ;;  %v3147_v26 = vpop.permute.xlu1 %3146 }
 0x462   : > { %7283 = vpow2.f32 %v5828_v34  ;;  %v6948_v1 = vadd.f32 %v3890_v21, %v3122_v6  ;;  %4402 = vmatmul.mubr.f32.gmra.mrb[82].mxu1 %v8833_v28 }
 0x463   : > { %v5831_v36 = vmul.f32 -1.442695, %v6947_v22  ;;  %4407 = vmatprep.mubr.f32.mxu1 %v7395_v18 }
 0x464   : > { %v5830_v32 = vmul.f32 -1.442695, %v6948_v1  ;;  %v6619_v59 = vpop.f32.mrb[38].mxu0 }
 0x465   : > { %7285 = vpow2.f32 %v5831_v36  ;;  %v6949_v37 = vadd.f32 %v6619_v59, %v3137_v3  ;;  %v3902_v54 = vpop.f32.mrb[39].mxu0 }
 0x466   : > { %7287 = vpow2.f32 %v5830_v32  ;;  %v6950_v45 = vadd.f32 %v3902_v54, %v3132_v62  ;;  %4410 = vmatmul.mubr.f32.gmra.mrb[84].mxu1 %v8849_v52 }
 0x467   : > { %v5833_v29 = vmul.f32 -1.442695, %v6949_v37  ;;  %4415 = vmatprep.mubr.f32.mxu1 %v7395_v18 }
 0x468   : > { %v5832_v25 = vmul.f32 -1.442695, %v6950_v45  ;;  %v6622_v6 = vpop.f32.mrb[40].mxu0 }
 0x469   : > { %7289 = vpow2.f32 %v5833_v29  ;;  %v6951_v57 = vadd.f32 %v6622_v6, %v3147_v26  ;;  %v3914_v13 = vpop.f32.mrb[41].mxu0 }
 0x46a   : > { %7291 = vpow2.f32 %v5832_v25  ;;  %v6952_v34 = vadd.f32 %v3914_v13, %v3142_v5  ;;  %4418 = vmatmul.mubr.f32.gmra.mrb[86].mxu1 %v8860_v24  ;;  %v6905_v5 = vpack.c.bf16 %v4174_v15, %v4162_v50 }
 0x46b   : > { %v7282_v35 = vpop.eup %7281  ;;  %v5835_v3 = vmul.f32 -1.442695, %v6951_v57  ;;  %4423 = vmatprep.mubr.f32.mxu1 %v7395_v18 }
 0x46c   : > { %v7284_v62 = vpop.eup %7283  ;;  %v3949_v22 = vadd.f32 1.0, %v7282_v35  ;;  %v5834_v21 = vmul.f32 -1.442695, %v6952_v34 }
 0x46d   : > { %v3948_v1 = vadd.f32 1.0, %v7284_v62  ;;  %7293 = vpow2.f32 %v5835_v3 }
 0x46e   : > { %7295 = vrcp.f32 %v3949_v22  ;;  %4426 = vmatmul.mubr.f32.gmra.mrb[88].mxu1 %v8870_v38 }
 0x46f   : > { %v7286_v36 = vpop.eup %7285  ;;  %7297 = vrcp.f32 %v3948_v1  ;;  %4500 = vmatprep.mubr.f32.mxu1 %v7395_v18 }
 0x470   : > { %v7288_v32 = vpop.eup %7287  ;;  %v3951_v59 = vadd.f32 1.0, %v7286_v36  ;;  %7299 = vpow2.f32 %v5834_v21 }
 0x471   : > { %v3950_v37 = vadd.f32 1.0, %v7288_v32 }
 0x472   : > { %7301 = vrcp.f32 %v3951_v59  ;;  %4504 = vmatmul.mubr.f32.vlgmr.msra.gmra.mrb[74].mxu1 %v4068_v49 }
 0x473   : > { %v7290_v54 = vpop.eup %7289  ;;  %7303 = vrcp.f32 %v3950_v37  ;;  %4509 = vmatprep.mubr.f32.mxu1 %v7395_v18  ;;  %6906 = vmatpush1.bf16.msra.mxu1 %v6905_v5 }
 0x474   : > { %v7292_v45 = vpop.eup %7291  ;;  %v3953_v29 = vadd.f32 1.0, %v7290_v54  ;;  %6908 = vmatprep.subr.bf16.mxu1 %v8706_v41 }
 0x475   : > { %v3952_v44 = vadd.f32 1.0, %v7292_v45 }
 0x476   : > { %7305 = vrcp.f32 %v3953_v29  ;;  %4513 = vmatmul.mubr.f32.gmra.mrb[76].mxu1 %v4079_v55 }
 0x477   : > { %v7294_v56 = vpop.eup %7293  ;;  %7307 = vrcp.f32 %v3952_v44  ;;  %4518 = vmatprep.mubr.f32.mxu1 %v7395_v18 }
 0x478   : > { %v7296_v50 = vpop.eup %7295  ;;  %v3955_v23 = vadd.f32 1.0, %v7294_v56 }
 0x479   : > { %v7298_v15 = vpop.eup %7297  ;;  %v4835_v46 = vsel %vm3972_vm3, %v7296_v50, 0 }
 0x47a   : > { %v7300_v49 = vpop.eup %7299  ;;  %v4832_v26 = vsel %vm3972_vm3, %v7298_v15, 0  ;;  %4522 = vmatmul.mubr.f32.gmra.mrb[78].mxu1 %v4090_v40  ;;  %v8943_v41 = vand.u32 4294901760, %v4835_v46 }
 0x47b   : > { %v8945_v25 = vand.u32 4294901760, %v4832_v26  ;;  %v3954_v55 = vadd.f32 1.0, %v7300_v49  ;;  %4527 = vmatprep.mubr.f32.mxu1 %v7395_v18 }
 0x47c   : > { %v7302_v6 = vpop.eup %7301  ;;  %v8949_v57 = vsub.f32 %v4835_v46, %v8943_v41 }
 0x47d   : > { %v7304_v13 = vpop.eup %7303  ;;  %v8952_v34 = vsub.f32 %v4832_v26, %v8945_v25  ;;  %7309 = vrcp.f32 %v3954_v55  ;;  %v4841_v61 = vsel %vm3972_vm3, %v7302_v6, 0 }
 0x47e   : > { %4531 = vmatmul.mubr.f32.gmra.mrb[80].mxu1 %v4101_v11  ;;  %v4838_v40 = vsel %vm3972_vm3, %v7304_v13, 0  ;;  %v8958_v35 = vand.u32 4294901760, %v4841_v61  ;;  %7311 = vrcp.f32 %v3955_v23  ;;  %v4937_v62 = vand.u32 4294901760, %v8949_v57 }
 0x47f   : > { %4536 = vmatprep.mubr.f32.mxu1 %v7395_v18  ;;  %v4926_v3 = vand.u32 4294901760, %v8952_v34  ;;  %v8963_v22 = vand.u32 4294901760, %v4838_v40 }
 0x480   : > { %v7306_v21 = vpop.eup %7305  ;;  %v8974_v36 = vsub.f32 %v4841_v61, %v8958_v35  ;;  %v4938_v59 = vsub.f32 %v8949_v57, %v4937_v62 }
 0x481   : > { %v7308_v1 = vpop.eup %7307  ;;  %v4927_v53 = vsub.f32 %v8952_v34, %v4926_v3  ;;  %v8969_v11 = vsub.f32 %v4838_v40, %v8963_v22  ;;  %v4847_v45 = vsel %vm3972_vm3, %v7306_v21, 0 }
 0x482   : > { %4540 = vmatmul.mubr.f32.gmra.mrb[82].mxu1 %v4112_v16  ;;  %v4844_v5 = vsel %vm3972_vm3, %v7308_v1, 0  ;;  %v4959_v28 = vand.u32 4294901760, %v8974_v36  ;;  %v4939_v29 = vand.u32 4294901760, %v4938_v59  ;;  %v8997_v50 = vand.u32 4294901760, %v4847_v45 }
 0x483   : > { %4545 = vmatprep.mubr.f32.mxu1 %v7395_v18  ;;  %v4928_v32 = vand.u32 4294901760, %v4927_v53  ;;  %v4948_v37 = vand.u32 4294901760, %v8969_v11  ;;  %v8982_v54 = vand.u32 4294901760, %v4844_v5 }
 0x484   : > { %v9012_v49 = vsub.f32 %v4847_v45, %v8997_v50 }
 0x485   : > { %4929 = vmatmul.mubr.f32.vlgmr.msra.gmra.mrb[42].mxu0 %v4928_v32  ;;  %v4949_v44 = vsub.f32 %v8969_v11, %v4948_v37  ;;  %v8995_v56 = vsub.f32 %v4844_v5, %v8982_v54  ;;  %v7315_v32 = vld [vmem:[%s7664_s11 + $0x10] sm:$0xff] }
 0x486   : > { %4549 = vmatmul.mubr.f32.gmra.mrb[84].mxu1 %v4123_v43  ;;  %4934 = vmatprep.mubr.f32.mxu0 %v7395_v18  ;;  %v4981_v23 = vand.u32 4294901760, %v9012_v49 }
 0x487   : > { %v7310_v16 = vpop.eup %7309  ;;  %4554 = vmatprep.mubr.f32.mxu1 %v7395_v18  ;;  %6918 = vmatpush1.bf16.msra.mxu0 %v8841_v17  ;;  %v4960_v17 = vsub.f32 %v8974_v36, %v4959_v28  ;;  %v4950_v15 = vand.u32 4294901760, %v4949_v44  ;;  %v4970_v46 = vand.u32 4294901760, %v8995_v56  ;;  %v7317_v44 = vld [vmem:[%s7664_s11 + $0x20] sm:$0xff] }
 0x488   : > { %v4850_v52 = vsel %vm3972_vm3, %v7310_v16, 0  ;;  %6920 = vmatprep.subr.bf16.mxu0 %v6919_v31  ;;  %v7312_v43 = vpop.eup %7311 }
 0x489   : > { %4940 = vmatmul.mubr.f32.gmra.mrb[44].mxu0 %v4939_v29  ;;  %v9014_v31 = vand.u32 4294901760, %v4850_v52  ;;  %v4853_v26 = vsel %vm3972_vm3, %v7312_v43, 0  ;;  %v4961_v24 = vand.u32 4294901760, %v4960_v17 }
 0x48a   : > { %4558 = vmatmul.mubr.f32.gmra.mrb[86].mxu1 %v4134_v19  ;;  %4945 = vmatprep.mubr.f32.mxu0 %v7395_v18  ;;  %v4971_v19 = vsub.f32 %v8995_v56, %v4970_v46  ;;  %v9028_v6 = vand.u32 4294901760, %v4853_v26 }
 0x48b   : > { %4563 = vmatprep.mubr.f32.mxu1 %v7395_v18  ;;  %v9026_v55 = vsub.f32 %v4850_v52, %v9014_v31 }
 0x48c   : > { %v4972_v38 = vand.u32 4294901760, %v4971_v19  ;;  %v9038_v61 = vsub.f32 %v4853_v26, %v9028_v6  ;;  %v7320_v26 = vld [vmem:[%s7664_s11 + $0x38] sm:$0xff] }
 0x48d   : > { %4951 = vmatmul.mubr.f32.gmra.mrb[46].mxu0 %v4950_v15  ;;  %v4992_v13 = vand.u32 4294901760, %v9026_v55 }
 0x48e   : > { %4567 = vmatmul.mubr.f32.gmra.mrb[88].mxu1 %v4145_v33  ;;  %4956 = vmatprep.mubr.f32.mxu0 %v7395_v18  ;;  %v4982_v33 = vsub.f32 %v9012_v49, %v4981_v23  ;;  %v5003_v1 = vand.u32 4294901760, %v9038_v61 }
 0x48f   : > { %4649 = vmatprep.mubr.f32.mxu1 %v7395_v18  ;;  %v4993_v21 = vsub.f32 %v9026_v55, %v4992_v13 }
 0x490   : > { %v4983_v40 = vand.u32 4294901760, %v4982_v33  ;;  %v5004_v53 = vsub.f32 %v9038_v61, %v5003_v1 }
 0x491   : > { %4962 = vmatmul.mubr.f32.gmra.mrb[48].mxu0 %v4961_v24 }
 0x492   : > { %4651 = vmatmul.mubr.f32.vlgmr.msra.gmra.mrb[74].mxu1 %v8777_v14  ;;  %4967 = vmatprep.mubr.f32.mxu0 %v7395_v18  ;;  %v5005_v5 = vand.u32 4294901760, %v5004_v53  ;;  %v7323_v53 = vld [vmem:[%s7664_s11 + $0x50] sm:$0xff] }
 0x493   : > { %4656 = vmatprep.mubr.f32.mxu1 %v7395_v18  ;;  %6910 = vmatpush1.bf16.msra.mxu1 %v8711_v42  ;;  %v4994_v42 = vand.u32 4294901760, %v4993_v21 }
 0x495   : > { %4973 = vmatmul.mubr.f32.gmra.mrb[50].mxu0 %v4972_v38  ;;  %v7321_v38 = vld [vmem:[%s7664_s11 + $0x40] sm:$0xff] }
 0x496   : > { %4658 = vmatmul.mubr.f32.gmra.mrb[76].mxu1 %v8773_v7  ;;  %4978 = vmatprep.mubr.f32.mxu0 %v7395_v18 }
 0x497   : > { %4663 = vmatprep.mubr.f32.mxu1 %v7395_v18 }
 0x499   : > { %4984 = vmatmul.mubr.f32.gmra.mrb[52].mxu0 %v4983_v40 }
 0x49a   : > { %4665 = vmatmul.mubr.f32.gmra.mrb[78].mxu1 %v8793_v8  ;;  %4989 = vmatprep.mubr.f32.mxu0 %v7395_v18 }
 0x49b   : > { %4670 = vmatprep.mubr.f32.mxu1 %v7395_v18 }
 0x49d   : > { %4995 = vmatmul.mubr.f32.gmra.mrb[54].mxu0 %v4994_v42 }
 0x49e   : > { %4672 = vmatmul.mubr.f32.gmra.mrb[80].mxu1 %v8789_v4  ;;  %5000 = vmatprep.mubr.f32.mxu0 %v7395_v18 }
 0x49f   : > { %4677 = vmatprep.mubr.f32.mxu1 %v7395_v18 }
 0x4a1   : > { %5006 = vmatmul.mubr.f32.gmra.mrb[56].mxu0 %v5005_v5 }
 0x4a2   : > { %4679 = vmatmul.mubr.f32.gmra.mrb[82].mxu1 %v8817_v9  ;;  %5096 = vmatprep.mubr.f32.mxu0 %v7395_v18 }
 0x4a3   : > { %4684 = vmatprep.mubr.f32.mxu1 %v7395_v18 }
 0x4a5   : > { %5098 = vmatmul.mubr.f32.vlgmr.msra.gmra.mrb[42].mxu0 %v8945_v25 }
 0x4a6   : > { %4686 = vmatmul.mubr.f32.gmra.mrb[84].mxu1 %v8835_v2  ;;  %5103 = vmatprep.mubr.f32.mxu0 %v7395_v18 }
 0x4a7   : > { %4691 = vmatprep.mubr.f32.mxu1 %v7395_v18  ;;  %6922 = vmatpush1.bf16.msra.mxu0 %v6921_v48 }
 0x4a8   : > { %6924 = vmatprep.subr.bf16.mxu0 %v8759_v39 }
 0x4a9   : > { %5105 = vmatmul.mubr.f32.gmra.mrb[44].mxu0 %v8943_v41 }
 0x4aa   : > { %4693 = vmatmul.mubr.f32.gmra.mrb[86].mxu1 %v8851_v10  ;;  %5110 = vmatprep.mubr.f32.mxu0 %v7395_v18 }
 0x4ab   : > { %4698 = vmatprep.mubr.f32.mxu1 %v7395_v18 }
 0x4ad   : > { %5112 = vmatmul.mubr.f32.gmra.mrb[46].mxu0 %v8963_v22 }
 0x4ae   : > { %4700 = vmatmul.mubr.f32.gmra.mrb[88].mxu1 %v8862_v20  ;;  %5117 = vmatprep.mubr.f32.mxu0 %v7395_v18 }
 0x4af   : > { %4774 = vmatprep.mubr.f32.mxu1 %v7395_v18 }
 0x4b1   : > { %5119 = vmatmul.mubr.f32.gmra.mrb[48].mxu0 %v8958_v35 }
 0x4b2   : > { %4776 = vmatmul.mubr.f32.vlgmr.msra.gmra.mrb[74].mxu1 %v8777_v14  ;;  %5124 = vmatprep.mubr.f32.mxu0 %v7395_v18 }
 0x4b3   : > { %4781 = vmatprep.mubr.f32.mxu1 %v7395_v18 }
 0x4b5   : > { %5126 = vmatmul.mubr.f32.gmra.mrb[50].mxu0 %v8982_v54 }
 0x4b6   : > { %4783 = vmatmul.mubr.f32.gmra.mrb[76].mxu1 %v8773_v7  ;;  %5131 = vmatprep.mubr.f32.mxu0 %v7395_v18  ;;  %v6927_v7 = vpack.c.bf16 %v5026_v58, %v5014_v51 }
 0x4b7   : > { %4788 = vmatprep.mubr.f32.mxu1 %v7395_v18 }
 0x4b9   : > { %5133 = vmatmul.mubr.f32.gmra.mrb[52].mxu0 %v8997_v50 }
 0x4ba   : > { %4790 = vmatmul.mubr.f32.gmra.mrb[78].mxu1 %v8793_v8  ;;  %5138 = vmatprep.mubr.f32.mxu0 %v7395_v18 }
 0x4bb   : > { %4795 = vmatprep.mubr.f32.mxu1 %v7395_v18 }
 0x4bd   : > { %5140 = vmatmul.mubr.f32.gmra.mrb[54].mxu0 %v9014_v31 }
 0x4be   : > { %4797 = vmatmul.mubr.f32.gmra.mrb[80].mxu1 %v8789_v4  ;;  %5145 = vmatprep.mubr.f32.mxu0 %v7395_v18 }
 0x4bf   : > { %4802 = vmatprep.mubr.f32.mxu1 %v7395_v18 }
 0x4c1   : > { %5147 = vmatmul.mubr.f32.gmra.mrb[56].mxu0 %v9028_v6 }
 0x4c2   : > { %4804 = vmatmul.mubr.f32.gmra.mrb[82].mxu1 %v8817_v9  ;;  %5225 = vmatprep.mubr.f32.mxu0 %v7395_v18 }
 0x4c3   : > { %4809 = vmatprep.mubr.f32.mxu1 %v7395_v18 }
 0x4c5   : > { %5228 = vmatmul.mubr.f32.vlgmr.msra.gmra.mrb[42].mxu0 %v8952_v34 }
 0x4c6   : > { %4811 = vmatmul.mubr.f32.gmra.mrb[84].mxu1 %v8835_v2  ;;  %5233 = vmatprep.mubr.f32.mxu0 %v7395_v18 }
 0x4c7   : > { %4816 = vmatprep.mubr.f32.mxu1 %v7395_v18  ;;  %6926 = vmatpush1.bf16.msra.mxu0 %v8761_v27 }
 0x4c8   : > { %6928 = vmatprep.subr.bf16.mxu0 %v6927_v7  ;;  %v7324_v7 = vld [vmem:[%s7664_s11 + $0x58] sm:$0xff] }
 0x4c9   : > { %5236 = vmatmul.mubr.f32.gmra.mrb[44].mxu0 %v8949_v57  ;;  %v7313_v57 = vld [vmem:[%s7664_s11] sm:$0xff] }
 0x4ca   : > { %4818 = vmatmul.mubr.f32.gmra.mrb[86].mxu1 %v8851_v10  ;;  %5241 = vmatprep.mubr.f32.mxu0 %v7395_v18 }
 0x4cb   : > { %4823 = vmatprep.mubr.f32.mxu1 %v7395_v18 }
 0x4cd   : > { %5244 = vmatmul.mubr.f32.gmra.mrb[46].mxu0 %v8969_v11 }
 0x4ce   : > { %4825 = vmatmul.mubr.f32.gmra.mrb[88].mxu1 %v8862_v20  ;;  %5249 = vmatprep.mubr.f32.mxu0 %v7395_v18 }
 0x4d1   : > { %5252 = vmatmul.mubr.f32.gmra.mrb[48].mxu0 %v8974_v36 }
 0x4d2   : > { %5257 = vmatprep.mubr.f32.mxu0 %v7395_v18 }
 0x4d5   : > { %5260 = vmatmul.mubr.f32.gmra.mrb[50].mxu0 %v8995_v56 }
 0x4d6   : > { %5265 = vmatprep.mubr.f32.mxu0 %v7395_v18 }
 0x4d9   : > { %5268 = vmatmul.mubr.f32.gmra.mrb[52].mxu0 %v9012_v49  ;;  %v7319_v49 = vld [vmem:[%s7664_s11 + $0x30] sm:$0xff] }
 0x4da   : > { %5273 = vmatprep.mubr.f32.mxu0 %v7395_v18 }
 0x4dd   : > { %5276 = vmatmul.mubr.f32.gmra.mrb[54].mxu0 %v9026_v55 }
 0x4de   : > { %5281 = vmatprep.mubr.f32.mxu0 %v7395_v18 }
 0x4e1   : > { %5284 = vmatmul.mubr.f32.gmra.mrb[56].mxu0 %v9038_v61 }
 0x4e2   : > { %5358 = vmatprep.mubr.f32.mxu0 %v7395_v18 }
 0x4e5   : > { %5362 = vmatmul.mubr.f32.vlgmr.msra.gmra.mrb[42].mxu0 %v4926_v3 }
 0x4e6   : > { %5367 = vmatprep.mubr.f32.mxu0 %v7395_v18  ;;  %6930 = vmatpush1.bf16.msra.mxu0 %v6929_v30 }
 0x4e7   : > { %6932 = vmatprep.subr.bf16.mxu0 %v8759_v39 }
 0x4e9   : > { %5371 = vmatmul.mubr.f32.gmra.mrb[44].mxu0 %v4937_v62 }
 0x4ea   : > { %5376 = vmatprep.mubr.f32.mxu0 %v7395_v18 }
 0x4ed   : > { %5380 = vmatmul.mubr.f32.gmra.mrb[46].mxu0 %v4948_v37  ;;  %v7316_v37 = vld [vmem:[%s7664_s11 + $0x18] sm:$0xff] }
 0x4ee   : > { %5385 = vmatprep.mubr.f32.mxu0 %v7395_v18 }
 0x4f1   : > { %5389 = vmatmul.mubr.f32.gmra.mrb[48].mxu0 %v4959_v28 }
 0x4f2   : > { %5394 = vmatprep.mubr.f32.mxu0 %v7395_v18 }
 0x4f5   : > { %5398 = vmatmul.mubr.f32.gmra.mrb[50].mxu0 %v4970_v46 }
 0x4f6   : > { %5403 = vmatprep.mubr.f32.mxu0 %v7395_v18 }
 0x4f9   : > { %5407 = vmatmul.mubr.f32.gmra.mrb[52].mxu0 %v4981_v23 }
 0x4fa   : > { %5412 = vmatprep.mubr.f32.mxu0 %v7395_v18 }
 0x4fd   : > { %5416 = vmatmul.mubr.f32.gmra.mrb[54].mxu0 %v4992_v13  ;;  %v7322_v13 = vld [vmem:[%s7664_s11 + $0x48] sm:$0xff] }
 0x4fe   : > { %5421 = vmatprep.mubr.f32.mxu0 %v7395_v18 }
 0x501   : > { %5425 = vmatmul.mubr.f32.gmra.mrb[56].mxu0 %v5003_v1 }
 0x502   : > { %5507 = vmatprep.mubr.f32.mxu0 %v7395_v18 }
 0x505   : > { %5509 = vmatmul.mubr.f32.vlgmr.msra.gmra.mrb[42].mxu0 %v8945_v25 }
 0x506   : > { %5514 = vmatprep.mubr.f32.mxu0 %v7395_v18  ;;  %6934 = vmatpush1.bf16.msra.mxu0 %v8761_v27 }
 0x509   : > { %5516 = vmatmul.mubr.f32.gmra.mrb[44].mxu0 %v8943_v41 }
 0x50a   : > { %5521 = vmatprep.mubr.f32.mxu0 %v7395_v18 }
 0x50d   : > { %5523 = vmatmul.mubr.f32.gmra.mrb[46].mxu0 %v8963_v22 }
 0x50e   : > { %5528 = vmatprep.mubr.f32.mxu0 %v7395_v18 }
 0x511   : > { %5530 = vmatmul.mubr.f32.gmra.mrb[48].mxu0 %v8958_v35 }
 0x512   : > { %5535 = vmatprep.mubr.f32.mxu0 %v7395_v18 }
 0x515   : > { %5537 = vmatmul.mubr.f32.gmra.mrb[50].mxu0 %v8982_v54 }
 0x516   : > { %5542 = vmatprep.mubr.f32.mxu0 %v7395_v18 }
 0x519   : > { %5544 = vmatmul.mubr.f32.gmra.mrb[52].mxu0 %v8997_v50 }
 0x51a   : > { %5549 = vmatprep.mubr.f32.mxu0 %v7395_v18 }
 0x51d   : > { %5551 = vmatmul.mubr.f32.gmra.mrb[54].mxu0 %v9014_v31 }
 0x51e   : > { %5556 = vmatprep.mubr.f32.mxu0 %v7395_v18 }
 0x521   : > { %5558 = vmatmul.mubr.f32.gmra.mrb[56].mxu0 %v9028_v6 }
 0x522   : > { %5632 = vmatprep.mubr.f32.mxu0 %v7395_v18 }
 0x525   : > { %5634 = vmatmul.mubr.f32.vlgmr.msra.gmra.mrb[42].mxu0 %v8945_v25 }
 0x526   : > { %5639 = vmatprep.mubr.f32.mxu0 %v7395_v18 }
 0x529   : > { %5641 = vmatmul.mubr.f32.gmra.mrb[44].mxu0 %v8943_v41 }
 0x52a   : > { %5646 = vmatprep.mubr.f32.mxu0 %v7395_v18 }
 0x52d   : > { %5648 = vmatmul.mubr.f32.gmra.mrb[46].mxu0 %v8963_v22 }
 0x52e   : > { %5653 = vmatprep.mubr.f32.mxu0 %v7395_v18 }
 0x531   : > { %5655 = vmatmul.mubr.f32.gmra.mrb[48].mxu0 %v8958_v35  ;;  %v7314_v35 = vld [vmem:[%s7664_s11 + $0x8] sm:$0xff] }
 0x532   : > { %5660 = vmatprep.mubr.f32.mxu0 %v7395_v18 }
 0x535   : > { %5662 = vmatmul.mubr.f32.gmra.mrb[50].mxu0 %v8982_v54 }
 0x536   : > { %5667 = vmatprep.mubr.f32.mxu0 %v7395_v18 }
 0x539   : > { %5669 = vmatmul.mubr.f32.gmra.mrb[52].mxu0 %v8997_v50  ;;  %v7318_v50 = vld [vmem:[%s7664_s11 + $0x28] sm:$0xff] }
 0x53a   : > { %5674 = vmatprep.mubr.f32.mxu0 %v7395_v18 }
 0x53d   : > { %5676 = vmatmul.mubr.f32.gmra.mrb[54].mxu0 %v9014_v31 }
 0x53e   : > { %5681 = vmatprep.mubr.f32.mxu0 %v7395_v18 }
 0x541   : > { %5683 = vmatmul.mubr.f32.gmra.mrb[56].mxu0 %v9028_v6 }
 0x585   : > { %v4777_v39 = vpop.f32.mrb[74].mxu1 }
 0x586   : > { %v4779_v27 = vpop.f32.mrb[75].mxu1 }
 0x589   : > { %v4784_v60 = vpop.f32.mrb[76].mxu1 }
 0x58a   : > { %v4786_v47 = vpop.f32.mrb[77].mxu1 }
 0x58d   : > { %v4791_v63 = vpop.f32.mrb[78].mxu1 }
 0x58e   : > { %v4793_v14 = vpop.f32.mrb[79].mxu1 }
 0x591   : > { %v4798_v51 = vpop.f32.mrb[80].mxu1 }
 0x592   : > { %v4800_v4 = vpop.f32.mrb[81].mxu1 }
 0x595   : > { %v4805_v58 = vpop.f32.mrb[82].mxu1 }
 0x596   : > { %v4807_v8 = vpop.f32.mrb[83].mxu1 }
 0x599   : > { %v4812_v0 = vpop.f32.mrb[84].mxu1 }
 0x59a   : > { %v4814_v12 = vpop.f32.mrb[85].mxu1 }
 0x59d   : > { %v9183_v9 = vpop.f32.mrb[86].mxu1 }
 0x59e   : > { %v9185_v18 = vpop.f32.mrb[87].mxu1 }
 0x5a1   : > { %v9187_v2 = vpop.f32.mrb[88].mxu1 }
 0x5a2   : > { %v9189_v10 = vpop.f32.mrb[89].mxu1 }
 0x5f8   : > { %v5635_v20 = vpop.f32.mrb[42].mxu0 }
 0x5f9   : > { %v5689_v48 = vmul.f32 %v5635_v20, %v4777_v39  ;;  %v5637_v41 = vpop.f32.mrb[43].mxu0  ;;  %v7328_v20 = vld [vmem:[%s7664_s11 + $0x78] sm:$0xff] }
 0x5fa   : > { %v5690_v25 = vmul.f32 %v5637_v41, %v4779_v27 }
 0x5fb   : > { %v5705_v34 = vmul.f32 %v7313_v57, %v5689_v48 }
 0x5fc   : > { %v5706_v3 = vmul.f32 %v7314_v35, %v5690_v25  ;;  %v5642_v62 = vpop.f32.mrb[44].mxu0 }
 0x5fd   : > { %5721 = vst [vmem:[%s9196_s26] sm:$0xff] %v5705_v34  ;;  %v5691_v22 = vmul.f32 %v5642_v62, %v4784_v60  ;;  %v5644_v11 = vpop.f32.mrb[45].mxu0 }
 0x5fe   : > { %5722 = vst [vmem:[%s9196_s26 + $0x8] sm:$0xff] %v5706_v3  ;;  %v5692_v36 = vmul.f32 %v5644_v11, %v4786_v47 }
 0x5ff   : > { %v5707_v59 = vmul.f32 %v7315_v32, %v5691_v22 }
 0x600   : > { %v5708_v54 = vmul.f32 %v7316_v37, %v5692_v36  ;;  %v5649_v45 = vpop.f32.mrb[46].mxu0 }
 0x601   : > { %5723 = vst [vmem:[%s9196_s26 + $0x10] sm:$0xff] %v5707_v59  ;;  %v5693_v28 = vmul.f32 %v5649_v45, %v4791_v63  ;;  %v5651_v16 = vpop.f32.mrb[47].mxu0  ;;  %v7325_v63 = vld [vmem:[%s7664_s11 + $0x60] sm:$0xff] }
 0x602   : > { %5724 = vst [vmem:[%s9196_s26 + $0x18] sm:$0xff] %v5708_v54  ;;  %v5694_v29 = vmul.f32 %v5651_v16, %v4793_v14 }
 0x603   : > { %v5709_v56 = vmul.f32 %v7317_v44, %v5693_v28 }
 0x604   : > { %v5710_v52 = vmul.f32 %v7318_v50, %v5694_v29  ;;  %v5656_v43 = vpop.f32.mrb[48].mxu0 }
 0x605   : > { %5725 = vst [vmem:[%s9196_s26 + $0x20] sm:$0xff] %v5709_v56  ;;  %v5695_v17 = vmul.f32 %v5656_v43, %v4798_v51  ;;  %v5658_v15 = vpop.f32.mrb[49].mxu0  ;;  %v7326_v51 = vld [vmem:[%s7664_s11 + $0x68] sm:$0xff] }
 0x606   : > { %5726 = vst [vmem:[%s9196_s26 + $0x28] sm:$0xff] %v5710_v52  ;;  %v5696_v46 = vmul.f32 %v5658_v15, %v4800_v4 }
 0x607   : > { %v5711_v31 = vmul.f32 %v7319_v49, %v5695_v17 }
 0x608   : > { %v5712_v24 = vmul.f32 %v7320_v26, %v5696_v46  ;;  %v5663_v19 = vpop.f32.mrb[50].mxu0 }
 0x609   : > { %5727 = vst [vmem:[%s9196_s26 + $0x30] sm:$0xff] %v5711_v31  ;;  %v5697_v23 = vmul.f32 %v5663_v19, %v4805_v58  ;;  %v5665_v55 = vpop.f32.mrb[51].mxu0 }
 0x60a   : > { %5728 = vst [vmem:[%s9196_s26 + $0x38] sm:$0xff] %v5712_v24  ;;  %v5698_v6 = vmul.f32 %v5665_v55, %v4807_v8 }
 0x60b   : > { %v5713_v33 = vmul.f32 %v7321_v38, %v5697_v23 }
 0x60c   : > { %v5714_v61 = vmul.f32 %v7322_v13, %v5698_v6  ;;  %v5670_v40 = vpop.f32.mrb[52].mxu0 }
 0x60d   : > { %5729 = vst [vmem:[%s9196_s26 + $0x40] sm:$0xff] %v5713_v33  ;;  %v5699_v21 = vmul.f32 %v5670_v40, %v4812_v0  ;;  %v5672_v1 = vpop.f32.mrb[53].mxu0 }
 0x60e   : > { %5730 = vst [vmem:[%s9196_s26 + $0x48] sm:$0xff] %v5714_v61  ;;  %v5700_v42 = vmul.f32 %v5672_v1, %v4814_v12 }
 0x60f   : > { %v5715_v5 = vmul.f32 %v7323_v53, %v5699_v21 }
 0x610   : > { %v5716_v30 = vmul.f32 %v7324_v7, %v5700_v42  ;;  %v5677_v39 = vpop.f32.mrb[54].mxu0 }
 0x611   : > { %5731 = vst [vmem:[%s9196_s26 + $0x50] sm:$0xff] %v5715_v5  ;;  %v5701_v27 = vmul.f32 %v5677_v39, %v9183_v9  ;;  %v5679_v60 = vpop.f32.mrb[55].mxu0  ;;  %v7327_v9 = vld [vmem:[%s7664_s11 + $0x70] sm:$0xff] }
 0x612   : > { %5732 = vst [vmem:[%s9196_s26 + $0x58] sm:$0xff] %v5716_v30  ;;  %v5702_v47 = vmul.f32 %v5679_v60, %v9185_v18 }
 0x613   : > { %v5717_v14 = vmul.f32 %v7325_v63, %v5701_v27 }
 0x614   : > { %v5718_v4 = vmul.f32 %v7326_v51, %v5702_v47  ;;  %v5684_v58 = vpop.f32.mrb[56].mxu0 }
 0x615   : > { %5733 = vst [vmem:[%s9196_s26 + $0x60] sm:$0xff] %v5717_v14  ;;  %v5703_v8 = vmul.f32 %v5684_v58, %v9187_v2  ;;  %v5686_v0 = vpop.f32.mrb[57].mxu0 }
 0x616   : > { %5734 = vst [vmem:[%s9196_s26 + $0x68] sm:$0xff] %v5718_v4  ;;  %v5704_v12 = vmul.f32 %v5686_v0, %v9189_v10 }
 0x617   : > { %v5719_v18 = vmul.f32 %v7327_v9, %v5703_v8 }
 0x618   : > { %v5720_v48 = vmul.f32 %v7328_v20, %v5704_v12 }
 0x619   : > { %5735 = vst [vmem:[%s9196_s26 + $0x70] sm:$0xff] %v5719_v18 }
 0x61a   : > { %5736 = vst [vmem:[%s9196_s26 + $0x78] sm:$0xff] %v5720_v48 }
 0x61b   : > { %7342 = shalt.err (!%p7339_p3)
}
 0x61c   : > { %s7343_s11 = scalar_lea.hbm %s9234_s12, 2048  ;;  %s7347_s30 = scalar_lea.hbm %s9294_s10, 4096 }
 0x61d   : > { %p7344_p4 = scmp.ne.s32.totalorder %s9234_s12, %s7343_s11  ;;  %p7348_p9 = scmp.lt.u32.totalorder %s9234_s12, %s9294_s10 }
 0x61e   : > { %p7349_p10 = scmp.lt.u32.totalorder %s7347_s30, %s7343_s11  ;;  %p7351_p12 = scmp.lt.u32.totalorder %s7343_s11, %s9234_s12 }
 0x61f   : > { %p7345_p7 = pnand %p7344_p4, %p7494_p5 }
 0x620   : > { %p7350_p11 = por %p7349_p10, %p7348_p9 }
 0x621   : > { %p7346_p8 = pneg %p7345_p7 }
 0x622   : > { %p7352_p13 = por %p7351_p12, %p7350_p11 }
 0x624   : > { %p7353_p0 = pnand %p7352_p13, %p7346_p8 }
 0x626   : > { %7356 = shalt.err (!%p7353_p0)
}
 0x627   : > { %s7399_s20 = smov 256   ;;  %s7400_s25 = smov 16  }
 0x628   : > { %7201 = dma.vmem_to_hbm [thread:$0]  (%p7494_p5), %s9236_s28, 2048, %s9234_s12, %s9243_s17, %s7399_s20, %s7399_s20, %s7400_s25  }
 0x629 PF: > { %p7207_p1 = scmp.ge.s32.totalorder %s7391_s16, 2  ;;  %s5766_s27 = sand.u32 1, %s7379_s13  }
 0x62a   : > { %s5767_s11 = scalar_lea.sflag [#allocation3], %s5766_s27 }
 0x62b   : > { %p7204_p2 = pnand %p7207_p1, %p7498_p6 }
 0x62d   : > { %7374 = dma.done.wait (!%p7204_p2), %s5767_s11, 2048  }
 0x62e   : > { %7376 = vsyncadd (!%p7204_p2), %s5767_s11, 4294965248  ;;  %p20_p3 = scmp.ge.s32.totalorder %s7481_s19, 4   ;;  %s9528_s13 = smov %s7383_s14 }
 0x62f   : > { %s9529_s14 = smov %s7387_s15  ;;  %s9530_s15 = smov %s7492_s22 }
 0x630   : > { %s9531_s16 = smov %s7481_s19  ;;  %22 = sbr.rel (!%p20_p3) target bundleno = 3 (0x3), region = 95 }
 0x637   :  { %5772 = vsyncpa [#allocation3], 1 }
 0x638   :  { %5774 = vsyncpa [#allocation3 + $0x1], 1 }

</bundles_post_ra>
